<compile_context>
chip_gen: v7x
topology: tpu7x:2x2x1
jax: 0.10.0
libtpu: 0.0.40
codegen_flags: <defaults>
</compile_context>

<pallas_src>
import jax
import jax.numpy as jnp
from jax import lax
from jax.experimental import pallas as pl
from jax.experimental.pallas import tpu as pltpu  # noqa: F401  (kept for parity / future scratch use)

# ---- small but structurally-faithful hyper-parameters -----------------------
BATCH = 2
SEQ = 8
HIDDEN = 64                    # config.hidden_dim
H = HIDDEN // 2                # per-direction LSTM hidden size
EMBED_DIMS = {"word": 48, "flag": 32, "bound": 16, "radical": 16, "pinyin": 16}
FEA_LIST = ["word", "flag", "bound", "radical", "pinyin"]
EMBED = sum(EMBED_DIMS.values())          # 128 = self.embedding_dim
VOCAB = {"word": 20, "flag": 10, "bound": 6, "radical": 12, "pinyin": 15}
TAGSET = 8                     # tagset_size (incl. <START>, <STOP>)
START = 6                      # tag_to_ix['<START>']
STOP = 7                       # tag_to_ix['<STOP>']


# ---------------------------------------------------------------------------
# Fused kernel: BiLSTM -> hidden2tag -> batched Viterbi decode
# ---------------------------------------------------------------------------
def bilstm_crf_kernel(x_ref, wih_ref, whh_f_ref, whh_r_ref, b_ref,
                      h0_ref, c0_ref, wo_ref, bo_ref, trans_ref,
                      score_ref, path_ref):
    T, B, K = SEQ, BATCH, TAGSET

    # ---- Stage 1: ONE MXU pass for both directions' input projections ------
    # [T*B, E] @ [E, 8H]  (cols 0:4H = forward gates, 4H:8H = reverse gates)
    gates_in = (jnp.dot(x_ref[...], wih_ref[...],
                        preferred_element_type=jnp.float32) + b_ref[...])

    whh_f = whh_f_ref[...]                     # [H, 4H]
    whh_r = whh_r_ref[...]                     # [H, 4H]

    def gate_act(g, c):
        # PyTorch gate order (i, f, g, o)
        i_g = jax.nn.sigmoid(g[:, 0 * H:1 * H])
        f_g = jax.nn.sigmoid(g[:, 1 * H:2 * H])
        g_g = jnp.tanh(g[:, 2 * H:3 * H])
        o_g = jax.nn.sigmoid(g[:, 3 * H:4 * H])
        c_new = f_g * c + i_g * g_g
        h_new = o_g * jnp.tanh(c_new)
        return h_new, c_new

    # ---- Stage 2: interleaved fwd/rev recurrences (only h @ W_hh serial) ----
    h_f, c_f = h0_ref[0], c0_ref[0]            # forward-direction init state
    h_r, c_r = h0_ref[1], c0_ref[1]            # reverse-direction init state
    hs_f = [None] * T
    hs_r = [None] * T
    for s in range(T):                         # T = 8, fully unrolled
        t_r = T - 1 - s
        g_f = (gates_in[s * B:(s + 1) * B, 0:4 * H]
               + jnp.dot(h_f, whh_f, preferred_element_type=jnp.float32))
        g_r = (gates_in[t_r * B:(t_r + 1) * B, 4 * H:8 * H]
               + jnp.dot(h_r, whh_r, preferred_element_type=jnp.float32))
        h_f, c_f = gate_act(g_f, c_f)
        h_r, c_r = gate_act(g_r, c_r)
        hs_f[s] = h_f
        hs_r[t_r] = h_r

    # ---- Stage 3: deferred hidden2tag (bulk matmuls, no per-step stores) ----
    hf_all = jnp.concatenate(hs_f, axis=0)     # [T*B, H]
    hr_all = jnp.concatenate(hs_r, axis=0)     # [T*B, H]
    wo = wo_ref[...]                           # [2H, K]
    emit = (jnp.dot(hf_all, wo[0:H, :], preferred_element_type=jnp.float32)
            + jnp.dot(hr_all, wo[H:2 * H, :], preferred_element_type=jnp.float32)
            + bo_ref[...])                     # [T*B, K]
    # TODO(synk): nn.Dropout(p=0.2) after hidden2tag treated as identity
    # (inference / eval-mode semantics); training-mode stochastic dropout not implemented.

    # ---- Stage 4: vectorized batched Viterbi forward pass -------------------
    trans = trans_ref[...]                                        # [K, K]
    neg = jnp.float32(-10000.0)
    k_iota_bk = lax.broadcasted_iota(jnp.int32, (B, K), 1)        # prev-tag lane index
    k_iota_bkk = lax.broadcasted_iota(jnp.int32, (B, K, K), 2)
    trans_b = jnp.broadcast_to(trans[None, :, :], (B, K, K))      # hoisted broadcast

    # init_vvars: -10000 everywhere except START tag
    vvar = jnp.where(k_iota_bk == START, jnp.float32(0.0), neg)   # [B, K]

    bptrs = [None] * T
    for t in range(T):
        # scores[b, next, prev] = vvar[b, prev] + transitions[next, prev]
        scores = jnp.broadcast_to(vvar[:, None, :], (B, K, K)) + trans_b
        best_val = jnp.max(scores, axis=-1)                       # [B, K]
        m = jnp.max(scores, axis=-1, keepdims=True)               # [B, K, 1]
        # first index attaining the max (matches torch.max tie-breaking)
        best_prev = jnp.min(jnp.where(scores == m, k_iota_bkk, K),
                            axis=-1).astype(jnp.int32)            # [B, K]
        bptrs[t] = best_prev
        vvar = best_val + emit[t * B:(t + 1) * B, :]

    # terminal transition into STOP
    tv = vvar + trans[STOP:STOP + 1, :]                           # [B, K]
    max_tv = jnp.max(tv, axis=-1, keepdims=True)                  # [B, 1]
    best_last = jnp.min(jnp.where(tv == max_tv, k_iota_bk, K),
                        axis=-1, keepdims=True).astype(jnp.int32) # [B, 1]
    score_ref[...] = max_tv

    # ---- Stage 5: backtrace via one-hot selects; one lane-dense path store --
    cur_tag = best_last                                           # [B, 1]
    cur_oh = (k_iota_bk == cur_tag)                               # [B, K]
    path_cols = [None] * T
    for i in range(T):
        t = T - 1 - i
        path_cols[t] = cur_tag
        prev_tag = jnp.sum(jnp.where(cur_oh, bptrs[t], 0),
                           axis=-1, keepdims=True).astype(jnp.int32)
        cur_oh = (k_iota_bk == prev_tag)
        cur_tag = prev_tag
    path_ref[...] = jnp.concatenate(path_cols, axis=-1)           # [B, T], single store
    # TODO(synk): on v7x the two LSTM directions could be split across the 2 TensorCores
    # (pl.core_map / grid + 'parallel'); not done here since Viterbi needs both directions.


# ---------------------------------------------------------------------------
# Parameters (deterministic, synthetic) + host-side weight fusion
# ---------------------------------------------------------------------------
def init_params(seed=0):
    key = jax.random.PRNGKey(seed)
    ks = jax.random.split(key, 16)
    params = {"embed": {}}
    for i, fea in enumerate(FEA_LIST):
        params["embed"][fea] = jax.random.normal(
            ks[i], (VOCAB[fea], EMBED_DIMS[fea]), jnp.float32)

    bound = 1.0 / float(H) ** 0.5

    def unif(k, shape):
        return jax.random.uniform(k, shape, jnp.float32, -bound, bound)

    params["w_ih_f"] = unif(ks[5], (4 * H, EMBED))
    params["w_hh_f"] = unif(ks[6], (4 * H, H))
    params["b_ih_f"] = unif(ks[7], (4 * H,))
    params["b_hh_f"] = unif(ks[8], (4 * H,))
    params["w_ih_r"] = unif(ks[9], (4 * H, EMBED))
    params["w_hh_r"] = unif(ks[10], (4 * H, H))
    params["b_ih_r"] = unif(ks[11], (4 * H,))
    params["b_hh_r"] = unif(ks[12], (4 * H,))
    params["w_out"] = unif(ks[13], (TAGSET, HIDDEN))
    params["b_out"] = unif(ks[14], (TAGSET,))

    trans = jax.random.normal(ks[15], (TAGSET, TAGSET), jnp.float32)
    trans = trans.at[START, :].set(-10000.0)
    trans = trans.at[:, STOP].set(-10000.0)
    params["transitions"] = trans

    # _init_hidden(): random (h0, c0) — fixed deterministically here
    kh, kc = jax.random.split(jax.random.PRNGKey(seed + 1))
    params["h0"] = jax.random.normal(kh, (2, BATCH, H), jnp.float32)
    params["c0"] = jax.random.normal(kc, (2, BATCH, H), jnp.float32)
    return params


def prepare_inference_params(params):
    """Pre-fuse / transpose weights host-side so the traced forward has no transposes."""
    wih = jnp.concatenate([params["w_ih_f"].T, params["w_ih_r"].T], axis=1)   # [E, 8H]
    b = jnp.concatenate([params["b_ih_f"] + params["b_hh_f"],
                         params["b_ih_r"] + params["b_hh_r"]])[None, :]       # [1, 8H]
    return {
        "embed": params["embed"],
        "wih": wih,
        "whh_f": params["w_hh_f"].T,                                          # [H, 4H]
        "whh_r": params["w_hh_r"].T,                                          # [H, 4H]
        "b": b,
        "h0": params["h0"],
        "c0": params["c0"],
        "wo": params["w_out"].T,                                              # [2H, K]
        "bo": params["b_out"][None, :],                                       # [1, K]
        "trans": params["transitions"],                                       # [K, K]
    }


# ---------------------------------------------------------------------------
# Forward pass (embedding gather in plain JAX, everything else in ONE kernel)
# ---------------------------------------------------------------------------
def bilstm_crf_forward(inf_params, fea_data):
    # fea_data: [num_fea, B, T] int32 — one id-sequence per feature
    emb = jnp.concatenate(
        [jnp.take(inf_params["embed"][fea], fea_data[i], axis=0)
         for i, fea in enumerate(FEA_LIST)],
        axis=-1)                                               # [B, T, E]
    # time-major, flattened: row (t*B + b) = token t of sentence b
    x_flat = jnp.transpose(emb, (1, 0, 2)).reshape(SEQ * BATCH, EMBED)

    score, path = pl.pallas_call(
        bilstm_crf_kernel,
        out_shape=(jax.ShapeDtypeStruct((BATCH, 1), jnp.float32),
                   jax.ShapeDtypeStruct((BATCH, SEQ), jnp.int32)),
    )(x_flat, inf_params["wih"], inf_params["whh_f"], inf_params["whh_r"],
      inf_params["b"], inf_params["h0"], inf_params["c0"],
      inf_params["wo"], inf_params["bo"], inf_params["trans"])

    # match PyTorch return convention: (batch_path_score [B], batch_best_path [B, T])
    return score[:, 0], path


if __name__ == "__main__":
    params = init_params(0)
    inf_params = prepare_inference_params(params)

    key = jax.random.PRNGKey(0)
    ks = jax.random.split(key, len(FEA_LIST))
    fea_data = jnp.stack(
        [jax.random.randint(ks[i], (BATCH, SEQ), 0, VOCAB[fea], dtype=jnp.int32)
         for i, fea in enumerate(FEA_LIST)],
        axis=0)                                                # [num_fea, B, T]

    score, tag_seq = jax.jit(bilstm_crf_forward)(inf_params, fea_data)
    jax.block_until_ready((score, tag_seq))

    assert score.shape == (BATCH,)
    assert tag_seq.shape == (BATCH, SEQ)
    print("KERNEL_OK")
</pallas_src>

<mosaic_0001>
module attributes {stable_mosaic.version = 11 : i64} {
  func.func @bilstm_crf_kernel(%arg0: memref<16x128xf32, #tpu.memory_space<vmem>>, %arg1: memref<128x256xf32, #tpu.memory_space<vmem>>, %arg2: memref<32x128xf32, #tpu.memory_space<vmem>>, %arg3: memref<32x128xf32, #tpu.memory_space<vmem>>, %arg4: memref<1x256xf32, #tpu.memory_space<vmem>>, %arg5: memref<2x2x32xf32, #tpu.memory_space<vmem>>, %arg6: memref<2x2x32xf32, #tpu.memory_space<vmem>>, %arg7: memref<64x8xf32, #tpu.memory_space<vmem>>, %arg8: memref<1x8xf32, #tpu.memory_space<vmem>>, %arg9: memref<8x8xf32, #tpu.memory_space<vmem>>, %arg10: memref<2x1xf32, #tpu.memory_space<vmem>>, %arg11: memref<2x8xi32, #tpu.memory_space<vmem>>) attributes {dimension_semantics = [], scalar_prefetch = 0 : i64, scratch_operands = 0 : i64, tpu.core_type = #tpu.core_type<tc>} {
    %c0 = arith.constant 0 : index
    %c0_0 = arith.constant 0 : index
    %0 = vector.load %arg0[%c0, %c0_0] : memref<16x128xf32, #tpu.memory_space<vmem>>, vector<16x128xf32>
    %c0_1 = arith.constant 0 : index
    %c0_2 = arith.constant 0 : index
    %1 = vector.load %arg1[%c0_1, %c0_2] : memref<128x256xf32, #tpu.memory_space<vmem>>, vector<128x256xf32>
    %cst = arith.constant dense<0.000000e+00> : vector<16x256xf32>
    %2 = tpu.matmul %0, %1, %cst {dimension_numbers = #tpu.dot_dimension_numbers<[1], [0], [0], [1], [0, 0, 1, 1], [], []>} : vector<16x128xf32>, vector<128x256xf32>, vector<16x256xf32> -> vector<16x256xf32>
    %c0_3 = arith.constant 0 : index
    %c0_4 = arith.constant 0 : index
    %3 = vector.load %arg4[%c0_3, %c0_4] : memref<1x256xf32, #tpu.memory_space<vmem>>, vector<1x256xf32>
    %4 = vector.broadcast %3 : vector<1x256xf32> to vector<16x256xf32>
    %5 = arith.addf %2, %4 : vector<16x256xf32>
    %c0_5 = arith.constant 0 : index
    %c0_6 = arith.constant 0 : index
    %6 = vector.load %arg2[%c0_5, %c0_6] : memref<32x128xf32, #tpu.memory_space<vmem>>, vector<32x128xf32>
    %c0_7 = arith.constant 0 : index
    %c0_8 = arith.constant 0 : index
    %7 = vector.load %arg3[%c0_7, %c0_8] : memref<32x128xf32, #tpu.memory_space<vmem>>, vector<32x128xf32>
    %c0_9 = arith.constant 0 : index
    %c0_10 = arith.constant 0 : index
    %c0_11 = arith.constant 0 : index
    %8 = vector.load %arg5[%c0_9, %c0_10, %c0_11] : memref<2x2x32xf32, #tpu.memory_space<vmem>>, vector<1x2x32xf32>
    %9 = vector.shape_cast %8 : vector<1x2x32xf32> to vector<2x32xf32>
    %c0_12 = arith.constant 0 : index
    %c0_13 = arith.constant 0 : index
    %c0_14 = arith.constant 0 : index
    %10 = vector.load %arg6[%c0_12, %c0_13, %c0_14] : memref<2x2x32xf32, #tpu.memory_space<vmem>>, vector<1x2x32xf32>
    %11 = vector.shape_cast %10 : vector<1x2x32xf32> to vector<2x32xf32>
    %c1 = arith.constant 1 : index
    %c0_15 = arith.constant 0 : index
    %c0_16 = arith.constant 0 : index
    %12 = vector.load %arg5[%c1, %c0_15, %c0_16] : memref<2x2x32xf32, #tpu.memory_space<vmem>>, vector<1x2x32xf32>
    %13 = vector.shape_cast %12 : vector<1x2x32xf32> to vector<2x32xf32>
    %c1_17 = arith.constant 1 : index
    %c0_18 = arith.constant 0 : index
    %c0_19 = arith.constant 0 : index
    %14 = vector.load %arg6[%c1_17, %c0_18, %c0_19] : memref<2x2x32xf32, #tpu.memory_space<vmem>>, vector<1x2x32xf32>
    %15 = vector.shape_cast %14 : vector<1x2x32xf32> to vector<2x32xf32>
    %16 = vector.extract_strided_slice %5 {offsets = [0, 0], sizes = [2, 128], strides = [1, 1]} : vector<16x256xf32> to vector<2x128xf32>
    %cst_20 = arith.constant dense<0.000000e+00> : vector<2x128xf32>
    %17 = tpu.matmul %9, %6, %cst_20 {dimension_numbers = #tpu.dot_dimension_numbers<[1], [0], [0], [1], [0, 0, 1, 1], [], []>} : vector<2x32xf32>, vector<32x128xf32>, vector<2x128xf32> -> vector<2x128xf32>
    %18 = arith.addf %16, %17 : vector<2x128xf32>
    %19 = vector.extract_strided_slice %5 {offsets = [14, 128], sizes = [2, 128], strides = [1, 1]} : vector<16x256xf32> to vector<2x128xf32>
    %cst_21 = arith.constant dense<0.000000e+00> : vector<2x128xf32>
    %20 = tpu.matmul %13, %7, %cst_21 {dimension_numbers = #tpu.dot_dimension_numbers<[1], [0], [0], [1], [0, 0, 1, 1], [], []>} : vector<2x32xf32>, vector<32x128xf32>, vector<2x128xf32> -> vector<2x128xf32>
    %21 = arith.addf %19, %20 : vector<2x128xf32>
    %22 = vector.extract_strided_slice %18 {offsets = [0, 0], sizes = [2, 32], strides = [1, 1]} : vector<2x128xf32> to vector<2x32xf32>
    %23 = arith.negf %22 : vector<2x32xf32>
    %24 = math.exp %23 : vector<2x32xf32>
    %cst_22 = arith.constant 1.000000e+00 : f32
    %25 = vector.broadcast %cst_22 : f32 to vector<2x32xf32>
    %26 = arith.addf %25, %24 : vector<2x32xf32>
    %27 = arith.divf %25, %26 : vector<2x32xf32>
    %28 = vector.extract_strided_slice %18 {offsets = [0, 32], sizes = [2, 32], strides = [1, 1]} : vector<2x128xf32> to vector<2x32xf32>
    %29 = arith.negf %28 : vector<2x32xf32>
    %30 = math.exp %29 : vector<2x32xf32>
    %cst_23 = arith.constant 1.000000e+00 : f32
    %31 = vector.broadcast %cst_23 : f32 to vector<2x32xf32>
    %32 = arith.addf %31, %30 : vector<2x32xf32>
    %33 = arith.divf %31, %32 : vector<2x32xf32>
    %34 = vector.extract_strided_slice %18 {offsets = [0, 64], sizes = [2, 32], strides = [1, 1]} : vector<2x128xf32> to vector<2x32xf32>
    %35 = math.tanh %34 : vector<2x32xf32>
    %36 = vector.extract_strided_slice %18 {offsets = [0, 96], sizes = [2, 32], strides = [1, 1]} : vector<2x128xf32> to vector<2x32xf32>
    %37 = arith.negf %36 : vector<2x32xf32>
    %38 = math.exp %37 : vector<2x32xf32>
    %cst_24 = arith.constant 1.000000e+00 : f32
    %39 = vector.broadcast %cst_24 : f32 to vector<2x32xf32>
    %40 = arith.addf %39, %38 : vector<2x32xf32>
    %41 = arith.divf %39, %40 : vector<2x32xf32>
    %42 = arith.mulf %33, %11 : vector<2x32xf32>
    %43 = arith.mulf %27, %35 : vector<2x32xf32>
    %44 = arith.addf %42, %43 : vector<2x32xf32>
    %45 = math.tanh %44 : vector<2x32xf32>
    %46 = arith.mulf %41, %45 : vector<2x32xf32>
    %47 = vector.extract_strided_slice %21 {offsets = [0, 0], sizes = [2, 32], strides = [1, 1]} : vector<2x128xf32> to vector<2x32xf32>
    %48 = arith.negf %47 : vector<2x32xf32>
    %49 = math.exp %48 : vector<2x32xf32>
    %cst_25 = arith.constant 1.000000e+00 : f32
    %50 = vector.broadcast %cst_25 : f32 to vector<2x32xf32>
    %51 = arith.addf %50, %49 : vector<2x32xf32>
    %52 = arith.divf %50, %51 : vector<2x32xf32>
    %53 = vector.extract_strided_slice %21 {offsets = [0, 32], sizes = [2, 32], strides = [1, 1]} : vector<2x128xf32> to vector<2x32xf32>
    %54 = arith.negf %53 : vector<2x32xf32>
    %55 = math.exp %54 : vector<2x32xf32>
    %cst_26 = arith.constant 1.000000e+00 : f32
    %56 = vector.broadcast %cst_26 : f32 to vector<2x32xf32>
    %57 = arith.addf %56, %55 : vector<2x32xf32>
    %58 = arith.divf %56, %57 : vector<2x32xf32>
    %59 = vector.extract_strided_slice %21 {offsets = [0, 64], sizes = [2, 32], strides = [1, 1]} : vector<2x128xf32> to vector<2x32xf32>
    %60 = math.tanh %59 : vector<2x32xf32>
    %61 = vector.extract_strided_slice %21 {offsets = [0, 96], sizes = [2, 32], strides = [1, 1]} : vector<2x128xf32> to vector<2x32xf32>
    %62 = arith.negf %61 : vector<2x32xf32>
    %63 = math.exp %62 : vector<2x32xf32>
    %cst_27 = arith.constant 1.000000e+00 : f32
    %64 = vector.broadcast %cst_27 : f32 to vector<2x32xf32>
    %65 = arith.addf %64, %63 : vector<2x32xf32>
    %66 = arith.divf %64, %65 : vector<2x32xf32>
    %67 = arith.mulf %58, %15 : vector<2x32xf32>
    %68 = arith.mulf %52, %60 : vector<2x32xf32>
    %69 = arith.addf %67, %68 : vector<2x32xf32>
    %70 = math.tanh %69 : vector<2x32xf32>
    %71 = arith.mulf %66, %70 : vector<2x32xf32>
    %72 = vector.extract_strided_slice %5 {offsets = [2, 0], sizes = [2, 128], strides = [1, 1]} : vector<16x256xf32> to vector<2x128xf32>
    %cst_28 = arith.constant dense<0.000000e+00> : vector<2x128xf32>
    %73 = tpu.matmul %46, %6, %cst_28 {dimension_numbers = #tpu.dot_dimension_numbers<[1], [0], [0], [1], [0, 0, 1, 1], [], []>} : vector<2x32xf32>, vector<32x128xf32>, vector<2x128xf32> -> vector<2x128xf32>
    %74 = arith.addf %72, %73 : vector<2x128xf32>
    %75 = vector.extract_strided_slice %5 {offsets = [12, 128], sizes = [2, 128], strides = [1, 1]} : vector<16x256xf32> to vector<2x128xf32>
    %cst_29 = arith.constant dense<0.000000e+00> : vector<2x128xf32>
    %76 = tpu.matmul %71, %7, %cst_29 {dimension_numbers = #tpu.dot_dimension_numbers<[1], [0], [0], [1], [0, 0, 1, 1], [], []>} : vector<2x32xf32>, vector<32x128xf32>, vector<2x128xf32> -> vector<2x128xf32>
    %77 = arith.addf %75, %76 : vector<2x128xf32>
    %78 = vector.extract_strided_slice %74 {offsets = [0, 0], sizes = [2, 32], strides = [1, 1]} : vector<2x128xf32> to vector<2x32xf32>
    %79 = arith.negf %78 : vector<2x32xf32>
    %80 = math.exp %79 : vector<2x32xf32>
    %cst_30 = arith.constant 1.000000e+00 : f32
    %81 = vector.broadcast %cst_30 : f32 to vector<2x32xf32>
    %82 = arith.addf %81, %80 : vector<2x32xf32>
    %83 = arith.divf %81, %82 : vector<2x32xf32>
    %84 = vector.extract_strided_slice %74 {offsets = [0, 32], sizes = [2, 32], strides = [1, 1]} : vector<2x128xf32> to vector<2x32xf32>
    %85 = arith.negf %84 : vector<2x32xf32>
    %86 = math.exp %85 : vector<2x32xf32>
    %cst_31 = arith.constant 1.000000e+00 : f32
    %87 = vector.broadcast %cst_31 : f32 to vector<2x32xf32>
    %88 = arith.addf %87, %86 : vector<2x32xf32>
    %89 = arith.divf %87, %88 : vector<2x32xf32>
    %90 = vector.extract_strided_slice %74 {offsets = [0, 64], sizes = [2, 32], strides = [1, 1]} : vector<2x128xf32> to vector<2x32xf32>
    %91 = math.tanh %90 : vector<2x32xf32>
    %92 = vector.extract_strided_slice %74 {offsets = [0, 96], sizes = [2, 32], strides = [1, 1]} : vector<2x128xf32> to vector<2x32xf32>
    %93 = arith.negf %92 : vector<2x32xf32>
    %94 = math.exp %93 : vector<2x32xf32>
    %cst_32 = arith.constant 1.000000e+00 : f32
    %95 = vector.broadcast %cst_32 : f32 to vector<2x32xf32>
    %96 = arith.addf %95, %94 : vector<2x32xf32>
    %97 = arith.divf %95, %96 : vector<2x32xf32>
    %98 = arith.mulf %89, %44 : vector<2x32xf32>
    %99 = arith.mulf %83, %91 : vector<2x32xf32>
    %100 = arith.addf %98, %99 : vector<2x32xf32>
    %101 = math.tanh %100 : vector<2x32xf32>
    %102 = arith.mulf %97, %101 : vector<2x32xf32>
    %103 = vector.extract_strided_slice %77 {offsets = [0, 0], sizes = [2, 32], strides = [1, 1]} : vector<2x128xf32> to vector<2x32xf32>
    %104 = arith.negf %103 : vector<2x32xf32>
    %105 = math.exp %104 : vector<2x32xf32>
    %cst_33 = arith.constant 1.000000e+00 : f32
    %106 = vector.broadcast %cst_33 : f32 to vector<2x32xf32>
    %107 = arith.addf %106, %105 : vector<2x32xf32>
    %108 = arith.divf %106, %107 : vector<2x32xf32>
    %109 = vector.extract_strided_slice %77 {offsets = [0, 32], sizes = [2, 32], strides = [1, 1]} : vector<2x128xf32> to vector<2x32xf32>
    %110 = arith.negf %109 : vector<2x32xf32>
    %111 = math.exp %110 : vector<2x32xf32>
    %cst_34 = arith.constant 1.000000e+00 : f32
    %112 = vector.broadcast %cst_34 : f32 to vector<2x32xf32>
    %113 = arith.addf %112, %111 : vector<2x32xf32>
    %114 = arith.divf %112, %113 : vector<2x32xf32>
    %115 = vector.extract_strided_slice %77 {offsets = [0, 64], sizes = [2, 32], strides = [1, 1]} : vector<2x128xf32> to vector<2x32xf32>
    %116 = math.tanh %115 : vector<2x32xf32>
    %117 = vector.extract_strided_slice %77 {offsets = [0, 96], sizes = [2, 32], strides = [1, 1]} : vector<2x128xf32> to vector<2x32xf32>
    %118 = arith.negf %117 : vector<2x32xf32>
    %119 = math.exp %118 : vector<2x32xf32>
    %cst_35 = arith.constant 1.000000e+00 : f32
    %120 = vector.broadcast %cst_35 : f32 to vector<2x32xf32>
    %121 = arith.addf %120, %119 : vector<2x32xf32>
    %122 = arith.divf %120, %121 : vector<2x32xf32>
    %123 = arith.mulf %114, %69 : vector<2x32xf32>
    %124 = arith.mulf %108, %116 : vector<2x32xf32>
    %125 = arith.addf %123, %124 : vector<2x32xf32>
    %126 = math.tanh %125 : vector<2x32xf32>
    %127 = arith.mulf %122, %126 : vector<2x32xf32>
    %128 = vector.extract_strided_slice %5 {offsets = [4, 0], sizes = [2, 128], strides = [1, 1]} : vector<16x256xf32> to vector<2x128xf32>
    %cst_36 = arith.constant dense<0.000000e+00> : vector<2x128xf32>
    %129 = tpu.matmul %102, %6, %cst_36 {dimension_numbers = #tpu.dot_dimension_numbers<[1], [0], [0], [1], [0, 0, 1, 1], [], []>} : vector<2x32xf32>, vector<32x128xf32>, vector<2x128xf32> -> vector<2x128xf32>
    %130 = arith.addf %128, %129 : vector<2x128xf32>
    %131 = vector.extract_strided_slice %5 {offsets = [10, 128], sizes = [2, 128], strides = [1, 1]} : vector<16x256xf32> to vector<2x128xf32>
    %cst_37 = arith.constant dense<0.000000e+00> : vector<2x128xf32>
    %132 = tpu.matmul %127, %7, %cst_37 {dimension_numbers = #tpu.dot_dimension_numbers<[1], [0], [0], [1], [0, 0, 1, 1], [], []>} : vector<2x32xf32>, vector<32x128xf32>, vector<2x128xf32> -> vector<2x128xf32>
    %133 = arith.addf %131, %132 : vector<2x128xf32>
    %134 = vector.extract_strided_slice %130 {offsets = [0, 0], sizes = [2, 32], strides = [1, 1]} : vector<2x128xf32> to vector<2x32xf32>
    %135 = arith.negf %134 : vector<2x32xf32>
    %136 = math.exp %135 : vector<2x32xf32>
    %cst_38 = arith.constant 1.000000e+00 : f32
    %137 = vector.broadcast %cst_38 : f32 to vector<2x32xf32>
    %138 = arith.addf %137, %136 : vector<2x32xf32>
    %139 = arith.divf %137, %138 : vector<2x32xf32>
    %140 = vector.extract_strided_slice %130 {offsets = [0, 32], sizes = [2, 32], strides = [1, 1]} : vector<2x128xf32> to vector<2x32xf32>
    %141 = arith.negf %140 : vector<2x32xf32>
    %142 = math.exp %141 : vector<2x32xf32>
    %cst_39 = arith.constant 1.000000e+00 : f32
    %143 = vector.broadcast %cst_39 : f32 to vector<2x32xf32>
    %144 = arith.addf %143, %142 : vector<2x32xf32>
    %145 = arith.divf %143, %144 : vector<2x32xf32>
    %146 = vector.extract_strided_slice %130 {offsets = [0, 64], sizes = [2, 32], strides = [1, 1]} : vector<2x128xf32> to vector<2x32xf32>
    %147 = math.tanh %146 : vector<2x32xf32>
    %148 = vector.extract_strided_slice %130 {offsets = [0, 96], sizes = [2, 32], strides = [1, 1]} : vector<2x128xf32> to vector<2x32xf32>
    %149 = arith.negf %148 : vector<2x32xf32>
    %150 = math.exp %149 : vector<2x32xf32>
    %cst_40 = arith.constant 1.000000e+00 : f32
    %151 = vector.broadcast %cst_40 : f32 to vector<2x32xf32>
    %152 = arith.addf %151, %150 : vector<2x32xf32>
    %153 = arith.divf %151, %152 : vector<2x32xf32>
    %154 = arith.mulf %145, %100 : vector<2x32xf32>
    %155 = arith.mulf %139, %147 : vector<2x32xf32>
    %156 = arith.addf %154, %155 : vector<2x32xf32>
    %157 = math.tanh %156 : vector<2x32xf32>
    %158 = arith.mulf %153, %157 : vector<2x32xf32>
    %159 = vector.extract_strided_slice %133 {offsets = [0, 0], sizes = [2, 32], strides = [1, 1]} : vector<2x128xf32> to vector<2x32xf32>
    %160 = arith.negf %159 : vector<2x32xf32>
    %161 = math.exp %160 : vector<2x32xf32>
    %cst_41 = arith.constant 1.000000e+00 : f32
    %162 = vector.broadcast %cst_41 : f32 to vector<2x32xf32>
    %163 = arith.addf %162, %161 : vector<2x32xf32>
    %164 = arith.divf %162, %163 : vector<2x32xf32>
    %165 = vector.extract_strided_slice %133 {offsets = [0, 32], sizes = [2, 32], strides = [1, 1]} : vector<2x128xf32> to vector<2x32xf32>
    %166 = arith.negf %165 : vector<2x32xf32>
    %167 = math.exp %166 : vector<2x32xf32>
    %cst_42 = arith.constant 1.000000e+00 : f32
    %168 = vector.broadcast %cst_42 : f32 to vector<2x32xf32>
    %169 = arith.addf %168, %167 : vector<2x32xf32>
    %170 = arith.divf %168, %169 : vector<2x32xf32>
    %171 = vector.extract_strided_slice %133 {offsets = [0, 64], sizes = [2, 32], strides = [1, 1]} : vector<2x128xf32> to vector<2x32xf32>
    %172 = math.tanh %171 : vector<2x32xf32>
    %173 = vector.extract_strided_slice %133 {offsets = [0, 96], sizes = [2, 32], strides = [1, 1]} : vector<2x128xf32> to vector<2x32xf32>
    %174 = arith.negf %173 : vector<2x32xf32>
    %175 = math.exp %174 : vector<2x32xf32>
    %cst_43 = arith.constant 1.000000e+00 : f32
    %176 = vector.broadcast %cst_43 : f32 to vector<2x32xf32>
    %177 = arith.addf %176, %175 : vector<2x32xf32>
    %178 = arith.divf %176, %177 : vector<2x32xf32>
    %179 = arith.mulf %170, %125 : vector<2x32xf32>
    %180 = arith.mulf %164, %172 : vector<2x32xf32>
    %181 = arith.addf %179, %180 : vector<2x32xf32>
    %182 = math.tanh %181 : vector<2x32xf32>
    %183 = arith.mulf %178, %182 : vector<2x32xf32>
    %184 = vector.extract_strided_slice %5 {offsets = [6, 0], sizes = [2, 128], strides = [1, 1]} : vector<16x256xf32> to vector<2x128xf32>
    %cst_44 = arith.constant dense<0.000000e+00> : vector<2x128xf32>
    %185 = tpu.matmul %158, %6, %cst_44 {dimension_numbers = #tpu.dot_dimension_numbers<[1], [0], [0], [1], [0, 0, 1, 1], [], []>} : vector<2x32xf32>, vector<32x128xf32>, vector<2x128xf32> -> vector<2x128xf32>
    %186 = arith.addf %184, %185 : vector<2x128xf32>
    %187 = vector.extract_strided_slice %5 {offsets = [8, 128], sizes = [2, 128], strides = [1, 1]} : vector<16x256xf32> to vector<2x128xf32>
    %cst_45 = arith.constant dense<0.000000e+00> : vector<2x128xf32>
    %188 = tpu.matmul %183, %7, %cst_45 {dimension_numbers = #tpu.dot_dimension_numbers<[1], [0], [0], [1], [0, 0, 1, 1], [], []>} : vector<2x32xf32>, vector<32x128xf32>, vector<2x128xf32> -> vector<2x128xf32>
    %189 = arith.addf %187, %188 : vector<2x128xf32>
    %190 = vector.extract_strided_slice %186 {offsets = [0, 0], sizes = [2, 32], strides = [1, 1]} : vector<2x128xf32> to vector<2x32xf32>
    %191 = arith.negf %190 : vector<2x32xf32>
    %192 = math.exp %191 : vector<2x32xf32>
    %cst_46 = arith.constant 1.000000e+00 : f32
    %193 = vector.broadcast %cst_46 : f32 to vector<2x32xf32>
    %194 = arith.addf %193, %192 : vector<2x32xf32>
    %195 = arith.divf %193, %194 : vector<2x32xf32>
    %196 = vector.extract_strided_slice %186 {offsets = [0, 32], sizes = [2, 32], strides = [1, 1]} : vector<2x128xf32> to vector<2x32xf32>
    %197 = arith.negf %196 : vector<2x32xf32>
    %198 = math.exp %197 : vector<2x32xf32>
    %cst_47 = arith.constant 1.000000e+00 : f32
    %199 = vector.broadcast %cst_47 : f32 to vector<2x32xf32>
    %200 = arith.addf %199, %198 : vector<2x32xf32>
    %201 = arith.divf %199, %200 : vector<2x32xf32>
    %202 = vector.extract_strided_slice %186 {offsets = [0, 64], sizes = [2, 32], strides = [1, 1]} : vector<2x128xf32> to vector<2x32xf32>
    %203 = math.tanh %202 : vector<2x32xf32>
    %204 = vector.extract_strided_slice %186 {offsets = [0, 96], sizes = [2, 32], strides = [1, 1]} : vector<2x128xf32> to vector<2x32xf32>
    %205 = arith.negf %204 : vector<2x32xf32>
    %206 = math.exp %205 : vector<2x32xf32>
    %cst_48 = arith.constant 1.000000e+00 : f32
    %207 = vector.broadcast %cst_48 : f32 to vector<2x32xf32>
    %208 = arith.addf %207, %206 : vector<2x32xf32>
    %209 = arith.divf %207, %208 : vector<2x32xf32>
    %210 = arith.mulf %201, %156 : vector<2x32xf32>
    %211 = arith.mulf %195, %203 : vector<2x32xf32>
    %212 = arith.addf %210, %211 : vector<2x32xf32>
    %213 = math.tanh %212 : vector<2x32xf32>
    %214 = arith.mulf %209, %213 : vector<2x32xf32>
    %215 = vector.extract_strided_slice %189 {offsets = [0, 0], sizes = [2, 32], strides = [1, 1]} : vector<2x128xf32> to vector<2x32xf32>
    %216 = arith.negf %215 : vector<2x32xf32>
    %217 = math.exp %216 : vector<2x32xf32>
    %cst_49 = arith.constant 1.000000e+00 : f32
    %218 = vector.broadcast %cst_49 : f32 to vector<2x32xf32>
    %219 = arith.addf %218, %217 : vector<2x32xf32>
    %220 = arith.divf %218, %219 : vector<2x32xf32>
    %221 = vector.extract_strided_slice %189 {offsets = [0, 32], sizes = [2, 32], strides = [1, 1]} : vector<2x128xf32> to vector<2x32xf32>
    %222 = arith.negf %221 : vector<2x32xf32>
    %223 = math.exp %222 : vector<2x32xf32>
    %cst_50 = arith.constant 1.000000e+00 : f32
    %224 = vector.broadcast %cst_50 : f32 to vector<2x32xf32>
    %225 = arith.addf %224, %223 : vector<2x32xf32>
    %226 = arith.divf %224, %225 : vector<2x32xf32>
    %227 = vector.extract_strided_slice %189 {offsets = [0, 64], sizes = [2, 32], strides = [1, 1]} : vector<2x128xf32> to vector<2x32xf32>
    %228 = math.tanh %227 : vector<2x32xf32>
    %229 = vector.extract_strided_slice %189 {offsets = [0, 96], sizes = [2, 32], strides = [1, 1]} : vector<2x128xf32> to vector<2x32xf32>
    %230 = arith.negf %229 : vector<2x32xf32>
    %231 = math.exp %230 : vector<2x32xf32>
    %cst_51 = arith.constant 1.000000e+00 : f32
    %232 = vector.broadcast %cst_51 : f32 to vector<2x32xf32>
    %233 = arith.addf %232, %231 : vector<2x32xf32>
    %234 = arith.divf %232, %233 : vector<2x32xf32>
    %235 = arith.mulf %226, %181 : vector<2x32xf32>
    %236 = arith.mulf %220, %228 : vector<2x32xf32>
    %237 = arith.addf %235, %236 : vector<2x32xf32>
    %238 = math.tanh %237 : vector<2x32xf32>
    %239 = arith.mulf %234, %238 : vector<2x32xf32>
    %240 = vector.extract_strided_slice %5 {offsets = [8, 0], sizes = [2, 128], strides = [1, 1]} : vector<16x256xf32> to vector<2x128xf32>
    %cst_52 = arith.constant dense<0.000000e+00> : vector<2x128xf32>
    %241 = tpu.matmul %214, %6, %cst_52 {dimension_numbers = #tpu.dot_dimension_numbers<[1], [0], [0], [1], [0, 0, 1, 1], [], []>} : vector<2x32xf32>, vector<32x128xf32>, vector<2x128xf32> -> vector<2x128xf32>
    %242 = arith.addf %240, %241 : vector<2x128xf32>
    %243 = vector.extract_strided_slice %5 {offsets = [6, 128], sizes = [2, 128], strides = [1, 1]} : vector<16x256xf32> to vector<2x128xf32>
    %cst_53 = arith.constant dense<0.000000e+00> : vector<2x128xf32>
    %244 = tpu.matmul %239, %7, %cst_53 {dimension_numbers = #tpu.dot_dimension_numbers<[1], [0], [0], [1], [0, 0, 1, 1], [], []>} : vector<2x32xf32>, vector<32x128xf32>, vector<2x128xf32> -> vector<2x128xf32>
    %245 = arith.addf %243, %244 : vector<2x128xf32>
    %246 = vector.extract_strided_slice %242 {offsets = [0, 0], sizes = [2, 32], strides = [1, 1]} : vector<2x128xf32> to vector<2x32xf32>
    %247 = arith.negf %246 : vector<2x32xf32>
    %248 = math.exp %247 : vector<2x32xf32>
    %cst_54 = arith.constant 1.000000e+00 : f32
    %249 = vector.broadcast %cst_54 : f32 to vector<2x32xf32>
    %250 = arith.addf %249, %248 : vector<2x32xf32>
    %251 = arith.divf %249, %250 : vector<2x32xf32>
    %252 = vector.extract_strided_slice %242 {offsets = [0, 32], sizes = [2, 32], strides = [1, 1]} : vector<2x128xf32> to vector<2x32xf32>
    %253 = arith.negf %252 : vector<2x32xf32>
    %254 = math.exp %253 : vector<2x32xf32>
    %cst_55 = arith.constant 1.000000e+00 : f32
    %255 = vector.broadcast %cst_55 : f32 to vector<2x32xf32>
    %256 = arith.addf %255, %254 : vector<2x32xf32>
    %257 = arith.divf %255, %256 : vector<2x32xf32>
    %258 = vector.extract_strided_slice %242 {offsets = [0, 64], sizes = [2, 32], strides = [1, 1]} : vector<2x128xf32> to vector<2x32xf32>
    %259 = math.tanh %258 : vector<2x32xf32>
    %260 = vector.extract_strided_slice %242 {offsets = [0, 96], sizes = [2, 32], strides = [1, 1]} : vector<2x128xf32> to vector<2x32xf32>
    %261 = arith.negf %260 : vector<2x32xf32>
    %262 = math.exp %261 : vector<2x32xf32>
    %cst_56 = arith.constant 1.000000e+00 : f32
    %263 = vector.broadcast %cst_56 : f32 to vector<2x32xf32>
    %264 = arith.addf %263, %262 : vector<2x32xf32>
    %265 = arith.divf %263, %264 : vector<2x32xf32>
    %266 = arith.mulf %257, %212 : vector<2x32xf32>
    %267 = arith.mulf %251, %259 : vector<2x32xf32>
    %268 = arith.addf %266, %267 : vector<2x32xf32>
    %269 = math.tanh %268 : vector<2x32xf32>
    %270 = arith.mulf %265, %269 : vector<2x32xf32>
    %271 = vector.extract_strided_slice %245 {offsets = [0, 0], sizes = [2, 32], strides = [1, 1]} : vector<2x128xf32> to vector<2x32xf32>
    %272 = arith.negf %271 : vector<2x32xf32>
    %273 = math.exp %272 : vector<2x32xf32>
    %cst_57 = arith.constant 1.000000e+00 : f32
    %274 = vector.broadcast %cst_57 : f32 to vector<2x32xf32>
    %275 = arith.addf %274, %273 : vector<2x32xf32>
    %276 = arith.divf %274, %275 : vector<2x32xf32>
    %277 = vector.extract_strided_slice %245 {offsets = [0, 32], sizes = [2, 32], strides = [1, 1]} : vector<2x128xf32> to vector<2x32xf32>
    %278 = arith.negf %277 : vector<2x32xf32>
    %279 = math.exp %278 : vector<2x32xf32>
    %cst_58 = arith.constant 1.000000e+00 : f32
    %280 = vector.broadcast %cst_58 : f32 to vector<2x32xf32>
    %281 = arith.addf %280, %279 : vector<2x32xf32>
    %282 = arith.divf %280, %281 : vector<2x32xf32>
    %283 = vector.extract_strided_slice %245 {offsets = [0, 64], sizes = [2, 32], strides = [1, 1]} : vector<2x128xf32> to vector<2x32xf32>
    %284 = math.tanh %283 : vector<2x32xf32>
    %285 = vector.extract_strided_slice %245 {offsets = [0, 96], sizes = [2, 32], strides = [1, 1]} : vector<2x128xf32> to vector<2x32xf32>
    %286 = arith.negf %285 : vector<2x32xf32>
    %287 = math.exp %286 : vector<2x32xf32>
    %cst_59 = arith.constant 1.000000e+00 : f32
    %288 = vector.broadcast %cst_59 : f32 to vector<2x32xf32>
    %289 = arith.addf %288, %287 : vector<2x32xf32>
    %290 = arith.divf %288, %289 : vector<2x32xf32>
    %291 = arith.mulf %282, %237 : vector<2x32xf32>
    %292 = arith.mulf %276, %284 : vector<2x32xf32>
    %293 = arith.addf %291, %292 : vector<2x32xf32>
    %294 = math.tanh %293 : vector<2x32xf32>
    %295 = arith.mulf %290, %294 : vector<2x32xf32>
    %296 = vector.extract_strided_slice %5 {offsets = [10, 0], sizes = [2, 128], strides = [1, 1]} : vector<16x256xf32> to vector<2x128xf32>
    %cst_60 = arith.constant dense<0.000000e+00> : vector<2x128xf32>
    %297 = tpu.matmul %270, %6, %cst_60 {dimension_numbers = #tpu.dot_dimension_numbers<[1], [0], [0], [1], [0, 0, 1, 1], [], []>} : vector<2x32xf32>, vector<32x128xf32>, vector<2x128xf32> -> vector<2x128xf32>
    %298 = arith.addf %296, %297 : vector<2x128xf32>
    %299 = vector.extract_strided_slice %5 {offsets = [4, 128], sizes = [2, 128], strides = [1, 1]} : vector<16x256xf32> to vector<2x128xf32>
    %cst_61 = arith.constant dense<0.000000e+00> : vector<2x128xf32>
    %300 = tpu.matmul %295, %7, %cst_61 {dimension_numbers = #tpu.dot_dimension_numbers<[1], [0], [0], [1], [0, 0, 1, 1], [], []>} : vector<2x32xf32>, vector<32x128xf32>, vector<2x128xf32> -> vector<2x128xf32>
    %301 = arith.addf %299, %300 : vector<2x128xf32>
    %302 = vector.extract_strided_slice %298 {offsets = [0, 0], sizes = [2, 32], strides = [1, 1]} : vector<2x128xf32> to vector<2x32xf32>
    %303 = arith.negf %302 : vector<2x32xf32>
    %304 = math.exp %303 : vector<2x32xf32>
    %cst_62 = arith.constant 1.000000e+00 : f32
    %305 = vector.broadcast %cst_62 : f32 to vector<2x32xf32>
    %306 = arith.addf %305, %304 : vector<2x32xf32>
    %307 = arith.divf %305, %306 : vector<2x32xf32>
    %308 = vector.extract_strided_slice %298 {offsets = [0, 32], sizes = [2, 32], strides = [1, 1]} : vector<2x128xf32> to vector<2x32xf32>
    %309 = arith.negf %308 : vector<2x32xf32>
    %310 = math.exp %309 : vector<2x32xf32>
    %cst_63 = arith.constant 1.000000e+00 : f32
    %311 = vector.broadcast %cst_63 : f32 to vector<2x32xf32>
    %312 = arith.addf %311, %310 : vector<2x32xf32>
    %313 = arith.divf %311, %312 : vector<2x32xf32>
    %314 = vector.extract_strided_slice %298 {offsets = [0, 64], sizes = [2, 32], strides = [1, 1]} : vector<2x128xf32> to vector<2x32xf32>
    %315 = math.tanh %314 : vector<2x32xf32>
    %316 = vector.extract_strided_slice %298 {offsets = [0, 96], sizes = [2, 32], strides = [1, 1]} : vector<2x128xf32> to vector<2x32xf32>
    %317 = arith.negf %316 : vector<2x32xf32>
    %318 = math.exp %317 : vector<2x32xf32>
    %cst_64 = arith.constant 1.000000e+00 : f32
    %319 = vector.broadcast %cst_64 : f32 to vector<2x32xf32>
    %320 = arith.addf %319, %318 : vector<2x32xf32>
    %321 = arith.divf %319, %320 : vector<2x32xf32>
    %322 = arith.mulf %313, %268 : vector<2x32xf32>
    %323 = arith.mulf %307, %315 : vector<2x32xf32>
    %324 = arith.addf %322, %323 : vector<2x32xf32>
    %325 = math.tanh %324 : vector<2x32xf32>
    %326 = arith.mulf %321, %325 : vector<2x32xf32>
    %327 = vector.extract_strided_slice %301 {offsets = [0, 0], sizes = [2, 32], strides = [1, 1]} : vector<2x128xf32> to vector<2x32xf32>
    %328 = arith.negf %327 : vector<2x32xf32>
    %329 = math.exp %328 : vector<2x32xf32>
    %cst_65 = arith.constant 1.000000e+00 : f32
    %330 = vector.broadcast %cst_65 : f32 to vector<2x32xf32>
    %331 = arith.addf %330, %329 : vector<2x32xf32>
    %332 = arith.divf %330, %331 : vector<2x32xf32>
    %333 = vector.extract_strided_slice %301 {offsets = [0, 32], sizes = [2, 32], strides = [1, 1]} : vector<2x128xf32> to vector<2x32xf32>
    %334 = arith.negf %333 : vector<2x32xf32>
    %335 = math.exp %334 : vector<2x32xf32>
    %cst_66 = arith.constant 1.000000e+00 : f32
    %336 = vector.broadcast %cst_66 : f32 to vector<2x32xf32>
    %337 = arith.addf %336, %335 : vector<2x32xf32>
    %338 = arith.divf %336, %337 : vector<2x32xf32>
    %339 = vector.extract_strided_slice %301 {offsets = [0, 64], sizes = [2, 32], strides = [1, 1]} : vector<2x128xf32> to vector<2x32xf32>
    %340 = math.tanh %339 : vector<2x32xf32>
    %341 = vector.extract_strided_slice %301 {offsets = [0, 96], sizes = [2, 32], strides = [1, 1]} : vector<2x128xf32> to vector<2x32xf32>
    %342 = arith.negf %341 : vector<2x32xf32>
    %343 = math.exp %342 : vector<2x32xf32>
    %cst_67 = arith.constant 1.000000e+00 : f32
    %344 = vector.broadcast %cst_67 : f32 to vector<2x32xf32>
    %345 = arith.addf %344, %343 : vector<2x32xf32>
    %346 = arith.divf %344, %345 : vector<2x32xf32>
    %347 = arith.mulf %338, %293 : vector<2x32xf32>
    %348 = arith.mulf %332, %340 : vector<2x32xf32>
    %349 = arith.addf %347, %348 : vector<2x32xf32>
    %350 = math.tanh %349 : vector<2x32xf32>
    %351 = arith.mulf %346, %350 : vector<2x32xf32>
    %352 = vector.extract_strided_slice %5 {offsets = [12, 0], sizes = [2, 128], strides = [1, 1]} : vector<16x256xf32> to vector<2x128xf32>
    %cst_68 = arith.constant dense<0.000000e+00> : vector<2x128xf32>
    %353 = tpu.matmul %326, %6, %cst_68 {dimension_numbers = #tpu.dot_dimension_numbers<[1], [0], [0], [1], [0, 0, 1, 1], [], []>} : vector<2x32xf32>, vector<32x128xf32>, vector<2x128xf32> -> vector<2x128xf32>
    %354 = arith.addf %352, %353 : vector<2x128xf32>
    %355 = vector.extract_strided_slice %5 {offsets = [2, 128], sizes = [2, 128], strides = [1, 1]} : vector<16x256xf32> to vector<2x128xf32>
    %cst_69 = arith.constant dense<0.000000e+00> : vector<2x128xf32>
    %356 = tpu.matmul %351, %7, %cst_69 {dimension_numbers = #tpu.dot_dimension_numbers<[1], [0], [0], [1], [0, 0, 1, 1], [], []>} : vector<2x32xf32>, vector<32x128xf32>, vector<2x128xf32> -> vector<2x128xf32>
    %357 = arith.addf %355, %356 : vector<2x128xf32>
    %358 = vector.extract_strided_slice %354 {offsets = [0, 0], sizes = [2, 32], strides = [1, 1]} : vector<2x128xf32> to vector<2x32xf32>
    %359 = arith.negf %358 : vector<2x32xf32>
    %360 = math.exp %359 : vector<2x32xf32>
    %cst_70 = arith.constant 1.000000e+00 : f32
    %361 = vector.broadcast %cst_70 : f32 to vector<2x32xf32>
    %362 = arith.addf %361, %360 : vector<2x32xf32>
    %363 = arith.divf %361, %362 : vector<2x32xf32>
    %364 = vector.extract_strided_slice %354 {offsets = [0, 32], sizes = [2, 32], strides = [1, 1]} : vector<2x128xf32> to vector<2x32xf32>
    %365 = arith.negf %364 : vector<2x32xf32>
    %366 = math.exp %365 : vector<2x32xf32>
    %cst_71 = arith.constant 1.000000e+00 : f32
    %367 = vector.broadcast %cst_71 : f32 to vector<2x32xf32>
    %368 = arith.addf %367, %366 : vector<2x32xf32>
    %369 = arith.divf %367, %368 : vector<2x32xf32>
    %370 = vector.extract_strided_slice %354 {offsets = [0, 64], sizes = [2, 32], strides = [1, 1]} : vector<2x128xf32> to vector<2x32xf32>
    %371 = math.tanh %370 : vector<2x32xf32>
    %372 = vector.extract_strided_slice %354 {offsets = [0, 96], sizes = [2, 32], strides = [1, 1]} : vector<2x128xf32> to vector<2x32xf32>
    %373 = arith.negf %372 : vector<2x32xf32>
    %374 = math.exp %373 : vector<2x32xf32>
    %cst_72 = arith.constant 1.000000e+00 : f32
    %375 = vector.broadcast %cst_72 : f32 to vector<2x32xf32>
    %376 = arith.addf %375, %374 : vector<2x32xf32>
    %377 = arith.divf %375, %376 : vector<2x32xf32>
    %378 = arith.mulf %369, %324 : vector<2x32xf32>
    %379 = arith.mulf %363, %371 : vector<2x32xf32>
    %380 = arith.addf %378, %379 : vector<2x32xf32>
    %381 = math.tanh %380 : vector<2x32xf32>
    %382 = arith.mulf %377, %381 : vector<2x32xf32>
    %383 = vector.extract_strided_slice %357 {offsets = [0, 0], sizes = [2, 32], strides = [1, 1]} : vector<2x128xf32> to vector<2x32xf32>
    %384 = arith.negf %383 : vector<2x32xf32>
    %385 = math.exp %384 : vector<2x32xf32>
    %cst_73 = arith.constant 1.000000e+00 : f32
    %386 = vector.broadcast %cst_73 : f32 to vector<2x32xf32>
    %387 = arith.addf %386, %385 : vector<2x32xf32>
    %388 = arith.divf %386, %387 : vector<2x32xf32>
    %389 = vector.extract_strided_slice %357 {offsets = [0, 32], sizes = [2, 32], strides = [1, 1]} : vector<2x128xf32> to vector<2x32xf32>
    %390 = arith.negf %389 : vector<2x32xf32>
    %391 = math.exp %390 : vector<2x32xf32>
    %cst_74 = arith.constant 1.000000e+00 : f32
    %392 = vector.broadcast %cst_74 : f32 to vector<2x32xf32>
    %393 = arith.addf %392, %391 : vector<2x32xf32>
    %394 = arith.divf %392, %393 : vector<2x32xf32>
    %395 = vector.extract_strided_slice %357 {offsets = [0, 64], sizes = [2, 32], strides = [1, 1]} : vector<2x128xf32> to vector<2x32xf32>
    %396 = math.tanh %395 : vector<2x32xf32>
    %397 = vector.extract_strided_slice %357 {offsets = [0, 96], sizes = [2, 32], strides = [1, 1]} : vector<2x128xf32> to vector<2x32xf32>
    %398 = arith.negf %397 : vector<2x32xf32>
    %399 = math.exp %398 : vector<2x32xf32>
    %cst_75 = arith.constant 1.000000e+00 : f32
    %400 = vector.broadcast %cst_75 : f32 to vector<2x32xf32>
    %401 = arith.addf %400, %399 : vector<2x32xf32>
    %402 = arith.divf %400, %401 : vector<2x32xf32>
    %403 = arith.mulf %394, %349 : vector<2x32xf32>
    %404 = arith.mulf %388, %396 : vector<2x32xf32>
    %405 = arith.addf %403, %404 : vector<2x32xf32>
    %406 = math.tanh %405 : vector<2x32xf32>
    %407 = arith.mulf %402, %406 : vector<2x32xf32>
    %408 = vector.extract_strided_slice %5 {offsets = [14, 0], sizes = [2, 128], strides = [1, 1]} : vector<16x256xf32> to vector<2x128xf32>
    %cst_76 = arith.constant dense<0.000000e+00> : vector<2x128xf32>
    %409 = tpu.matmul %382, %6, %cst_76 {dimension_numbers = #tpu.dot_dimension_numbers<[1], [0], [0], [1], [0, 0, 1, 1], [], []>} : vector<2x32xf32>, vector<32x128xf32>, vector<2x128xf32> -> vector<2x128xf32>
    %410 = arith.addf %408, %409 : vector<2x128xf32>
    %411 = vector.extract_strided_slice %5 {offsets = [0, 128], sizes = [2, 128], strides = [1, 1]} : vector<16x256xf32> to vector<2x128xf32>
    %cst_77 = arith.constant dense<0.000000e+00> : vector<2x128xf32>
    %412 = tpu.matmul %407, %7, %cst_77 {dimension_numbers = #tpu.dot_dimension_numbers<[1], [0], [0], [1], [0, 0, 1, 1], [], []>} : vector<2x32xf32>, vector<32x128xf32>, vector<2x128xf32> -> vector<2x128xf32>
    %413 = arith.addf %411, %412 : vector<2x128xf32>
    %414 = vector.extract_strided_slice %410 {offsets = [0, 0], sizes = [2, 32], strides = [1, 1]} : vector<2x128xf32> to vector<2x32xf32>
    %415 = arith.negf %414 : vector<2x32xf32>
    %416 = math.exp %415 : vector<2x32xf32>
    %cst_78 = arith.constant 1.000000e+00 : f32
    %417 = vector.broadcast %cst_78 : f32 to vector<2x32xf32>
    %418 = arith.addf %417, %416 : vector<2x32xf32>
    %419 = arith.divf %417, %418 : vector<2x32xf32>
    %420 = vector.extract_strided_slice %410 {offsets = [0, 32], sizes = [2, 32], strides = [1, 1]} : vector<2x128xf32> to vector<2x32xf32>
    %421 = arith.negf %420 : vector<2x32xf32>
    %422 = math.exp %421 : vector<2x32xf32>
    %cst_79 = arith.constant 1.000000e+00 : f32
    %423 = vector.broadcast %cst_79 : f32 to vector<2x32xf32>
    %424 = arith.addf %423, %422 : vector<2x32xf32>
    %425 = arith.divf %423, %424 : vector<2x32xf32>
    %426 = vector.extract_strided_slice %410 {offsets = [0, 64], sizes = [2, 32], strides = [1, 1]} : vector<2x128xf32> to vector<2x32xf32>
    %427 = math.tanh %426 : vector<2x32xf32>
    %428 = vector.extract_strided_slice %410 {offsets = [0, 96], sizes = [2, 32], strides = [1, 1]} : vector<2x128xf32> to vector<2x32xf32>
    %429 = arith.negf %428 : vector<2x32xf32>
    %430 = math.exp %429 : vector<2x32xf32>
    %cst_80 = arith.constant 1.000000e+00 : f32
    %431 = vector.broadcast %cst_80 : f32 to vector<2x32xf32>
    %432 = arith.addf %431, %430 : vector<2x32xf32>
    %433 = arith.divf %431, %432 : vector<2x32xf32>
    %434 = arith.mulf %425, %380 : vector<2x32xf32>
    %435 = arith.mulf %419, %427 : vector<2x32xf32>
    %436 = arith.addf %434, %435 : vector<2x32xf32>
    %437 = math.tanh %436 : vector<2x32xf32>
    %438 = arith.mulf %433, %437 : vector<2x32xf32>
    %439 = vector.extract_strided_slice %413 {offsets = [0, 0], sizes = [2, 32], strides = [1, 1]} : vector<2x128xf32> to vector<2x32xf32>
    %440 = arith.negf %439 : vector<2x32xf32>
    %441 = math.exp %440 : vector<2x32xf32>
    %cst_81 = arith.constant 1.000000e+00 : f32
    %442 = vector.broadcast %cst_81 : f32 to vector<2x32xf32>
    %443 = arith.addf %442, %441 : vector<2x32xf32>
    %444 = arith.divf %442, %443 : vector<2x32xf32>
    %445 = vector.extract_strided_slice %413 {offsets = [0, 32], sizes = [2, 32], strides = [1, 1]} : vector<2x128xf32> to vector<2x32xf32>
    %446 = arith.negf %445 : vector<2x32xf32>
    %447 = math.exp %446 : vector<2x32xf32>
    %cst_82 = arith.constant 1.000000e+00 : f32
    %448 = vector.broadcast %cst_82 : f32 to vector<2x32xf32>
    %449 = arith.addf %448, %447 : vector<2x32xf32>
    %450 = arith.divf %448, %449 : vector<2x32xf32>
    %451 = vector.extract_strided_slice %413 {offsets = [0, 64], sizes = [2, 32], strides = [1, 1]} : vector<2x128xf32> to vector<2x32xf32>
    %452 = math.tanh %451 : vector<2x32xf32>
    %453 = vector.extract_strided_slice %413 {offsets = [0, 96], sizes = [2, 32], strides = [1, 1]} : vector<2x128xf32> to vector<2x32xf32>
    %454 = arith.negf %453 : vector<2x32xf32>
    %455 = math.exp %454 : vector<2x32xf32>
    %cst_83 = arith.constant 1.000000e+00 : f32
    %456 = vector.broadcast %cst_83 : f32 to vector<2x32xf32>
    %457 = arith.addf %456, %455 : vector<2x32xf32>
    %458 = arith.divf %456, %457 : vector<2x32xf32>
    %459 = arith.mulf %450, %405 : vector<2x32xf32>
    %460 = arith.mulf %444, %452 : vector<2x32xf32>
    %461 = arith.addf %459, %460 : vector<2x32xf32>
    %462 = math.tanh %461 : vector<2x32xf32>
    %463 = arith.mulf %458, %462 : vector<2x32xf32>
    %464 = tpu.concatenate %46, %102, %158, %214, %270, %326, %382, %438 in 0 : vector<2x32xf32>, vector<2x32xf32>, vector<2x32xf32>, vector<2x32xf32>, vector<2x32xf32>, vector<2x32xf32>, vector<2x32xf32>, vector<2x32xf32> -> vector<16x32xf32>
    %465 = tpu.concatenate %463, %407, %351, %295, %239, %183, %127, %71 in 0 : vector<2x32xf32>, vector<2x32xf32>, vector<2x32xf32>, vector<2x32xf32>, vector<2x32xf32>, vector<2x32xf32>, vector<2x32xf32>, vector<2x32xf32> -> vector<16x32xf32>
    %c0_84 = arith.constant 0 : index
    %c0_85 = arith.constant 0 : index
    %466 = vector.load %arg7[%c0_84, %c0_85] : memref<64x8xf32, #tpu.memory_space<vmem>>, vector<64x8xf32>
    %467 = vector.extract_strided_slice %466 {offsets = [0, 0], sizes = [32, 8], strides = [1, 1]} : vector<64x8xf32> to vector<32x8xf32>
    %cst_86 = arith.constant dense<0.000000e+00> : vector<16x8xf32>
    %468 = tpu.matmul %464, %467, %cst_86 {dimension_numbers = #tpu.dot_dimension_numbers<[1], [0], [0], [1], [0, 0, 1, 1], [], []>} : vector<16x32xf32>, vector<32x8xf32>, vector<16x8xf32> -> vector<16x8xf32>
    %469 = vector.extract_strided_slice %466 {offsets = [32, 0], sizes = [32, 8], strides = [1, 1]} : vector<64x8xf32> to vector<32x8xf32>
    %cst_87 = arith.constant dense<0.000000e+00> : vector<16x8xf32>
    %470 = tpu.matmul %465, %469, %cst_87 {dimension_numbers = #tpu.dot_dimension_numbers<[1], [0], [0], [1], [0, 0, 1, 1], [], []>} : vector<16x32xf32>, vector<32x8xf32>, vector<16x8xf32> -> vector<16x8xf32>
    %471 = arith.addf %468, %470 : vector<16x8xf32>
    %c0_88 = arith.constant 0 : index
    %c0_89 = arith.constant 0 : index
    %472 = vector.load %arg8[%c0_88, %c0_89] : memref<1x8xf32, #tpu.memory_space<vmem>>, vector<1x8xf32>
    %473 = vector.broadcast %472 : vector<1x8xf32> to vector<16x8xf32>
    %474 = arith.addf %471, %473 : vector<16x8xf32>
    %c0_90 = arith.constant 0 : index
    %c0_91 = arith.constant 0 : index
    %475 = vector.load %arg9[%c0_90, %c0_91] : memref<8x8xf32, #tpu.memory_space<vmem>>, vector<8x8xf32>
    %476 = tpu.iota {dimensions = array<i32: 1>} : vector<2x8xi32>
    %477 = tpu.iota {dimensions = array<i32: 2>} : vector<2x8x8xi32>
    %478 = vector.shape_cast %475 : vector<8x8xf32> to vector<1x8x8xf32>
    %479 = vector.shape_cast %478 : vector<1x8x8xf32> to vector<1x8x8xf32>
    %480 = vector.broadcast %479 : vector<1x8x8xf32> to vector<2x8x8xf32>
    %c6_i32 = arith.constant 6 : i32
    %481 = vector.broadcast %c6_i32 : i32 to vector<2x8xi32>
    %482 = arith.cmpi eq, %476, %481 : vector<2x8xi32>
    %cst_92 = arith.constant 0.000000e+00 : f32
    %cst_93 = arith.constant -1.000000e+04 : f32
    %483 = vector.broadcast %cst_92 : f32 to vector<2x8xf32>
    %484 = vector.broadcast %cst_93 : f32 to vector<2x8xf32>
    %485 = arith.select %482, %483, %484 : vector<2x8xi1>, vector<2x8xf32>
    %486 = vector.shape_cast %485 : vector<2x8xf32> to vector<2x1x8xf32>
    %487 = vector.shape_cast %486 : vector<2x1x8xf32> to vector<2x1x8xf32>
    %488 = vector.broadcast %487 : vector<2x1x8xf32> to vector<2x8x8xf32>
    %489 = arith.addf %488, %480 : vector<2x8x8xf32>
    %cst_94 = arith.constant dense<0xFF800000> : vector<2x8xf32>
    %490 = vector.multi_reduction <maximumf>, %489, %cst_94 [2] : vector<2x8x8xf32> to vector<2x8xf32>
    %491 = vector.extract_strided_slice %474 {offsets = [0, 0], sizes = [2, 8], strides = [1, 1]} : vector<16x8xf32> to vector<2x8xf32>
    %492 = arith.addf %490, %491 : vector<2x8xf32>
    %493 = vector.shape_cast %492 : vector<2x8xf32> to vector<2x1x8xf32>
    %494 = vector.shape_cast %493 : vector<2x1x8xf32> to vector<2x1x8xf32>
    %495 = vector.broadcast %494 : vector<2x1x8xf32> to vector<2x8x8xf32>
    %496 = arith.addf %495, %480 : vector<2x8x8xf32>
    %cst_95 = arith.constant dense<0xFF800000> : vector<2x8xf32>
    %497 = vector.multi_reduction <maximumf>, %496, %cst_95 [2] : vector<2x8x8xf32> to vector<2x8xf32>
    %cst_96 = arith.constant dense<0xFF800000> : vector<2x8xf32>
    %498 = vector.multi_reduction <maximumf>, %496, %cst_96 [2] : vector<2x8x8xf32> to vector<2x8xf32>
    %499 = vector.shape_cast %498 : vector<2x8xf32> to vector<2x8x1xf32>
    %500 = vector.broadcast %499 : vector<2x8x1xf32> to vector<2x8x8xf32>
    %501 = arith.cmpf oeq, %496, %500 : vector<2x8x8xf32>
    %c8_i32 = arith.constant 8 : i32
    %502 = vector.broadcast %c8_i32 : i32 to vector<2x8x8xi32>
    %503 = arith.select %501, %477, %502 : vector<2x8x8xi1>, vector<2x8x8xi32>
    %cst_97 = arith.constant dense<2147483647> : vector<2x8xi32>
    %504 = vector.multi_reduction <minsi>, %503, %cst_97 [2] : vector<2x8x8xi32> to vector<2x8xi32>
    %505 = vector.extract_strided_slice %474 {offsets = [2, 0], sizes = [2, 8], strides = [1, 1]} : vector<16x8xf32> to vector<2x8xf32>
    %506 = arith.addf %497, %505 : vector<2x8xf32>
    %507 = vector.shape_cast %506 : vector<2x8xf32> to vector<2x1x8xf32>
    %508 = vector.shape_cast %507 : vector<2x1x8xf32> to vector<2x1x8xf32>
    %509 = vector.broadcast %508 : vector<2x1x8xf32> to vector<2x8x8xf32>
    %510 = arith.addf %509, %480 : vector<2x8x8xf32>
    %cst_98 = arith.constant dense<0xFF800000> : vector<2x8xf32>
    %511 = vector.multi_reduction <maximumf>, %510, %cst_98 [2] : vector<2x8x8xf32> to vector<2x8xf32>
    %cst_99 = arith.constant dense<0xFF800000> : vector<2x8xf32>
    %512 = vector.multi_reduction <maximumf>, %510, %cst_99 [2] : vector<2x8x8xf32> to vector<2x8xf32>
    %513 = vector.shape_cast %512 : vector<2x8xf32> to vector<2x8x1xf32>
    %514 = vector.broadcast %513 : vector<2x8x1xf32> to vector<2x8x8xf32>
    %515 = arith.cmpf oeq, %510, %514 : vector<2x8x8xf32>
    %c8_i32_100 = arith.constant 8 : i32
    %516 = vector.broadcast %c8_i32_100 : i32 to vector<2x8x8xi32>
    %517 = arith.select %515, %477, %516 : vector<2x8x8xi1>, vector<2x8x8xi32>
    %cst_101 = arith.constant dense<2147483647> : vector<2x8xi32>
    %518 = vector.multi_reduction <minsi>, %517, %cst_101 [2] : vector<2x8x8xi32> to vector<2x8xi32>
    %519 = vector.extract_strided_slice %474 {offsets = [4, 0], sizes = [2, 8], strides = [1, 1]} : vector<16x8xf32> to vector<2x8xf32>
    %520 = arith.addf %511, %519 : vector<2x8xf32>
    %521 = vector.shape_cast %520 : vector<2x8xf32> to vector<2x1x8xf32>
    %522 = vector.shape_cast %521 : vector<2x1x8xf32> to vector<2x1x8xf32>
    %523 = vector.broadcast %522 : vector<2x1x8xf32> to vector<2x8x8xf32>
    %524 = arith.addf %523, %480 : vector<2x8x8xf32>
    %cst_102 = arith.constant dense<0xFF800000> : vector<2x8xf32>
    %525 = vector.multi_reduction <maximumf>, %524, %cst_102 [2] : vector<2x8x8xf32> to vector<2x8xf32>
    %cst_103 = arith.constant dense<0xFF800000> : vector<2x8xf32>
    %526 = vector.multi_reduction <maximumf>, %524, %cst_103 [2] : vector<2x8x8xf32> to vector<2x8xf32>
    %527 = vector.shape_cast %526 : vector<2x8xf32> to vector<2x8x1xf32>
    %528 = vector.broadcast %527 : vector<2x8x1xf32> to vector<2x8x8xf32>
    %529 = arith.cmpf oeq, %524, %528 : vector<2x8x8xf32>
    %c8_i32_104 = arith.constant 8 : i32
    %530 = vector.broadcast %c8_i32_104 : i32 to vector<2x8x8xi32>
    %531 = arith.select %529, %477, %530 : vector<2x8x8xi1>, vector<2x8x8xi32>
    %cst_105 = arith.constant dense<2147483647> : vector<2x8xi32>
    %532 = vector.multi_reduction <minsi>, %531, %cst_105 [2] : vector<2x8x8xi32> to vector<2x8xi32>
    %533 = vector.extract_strided_slice %474 {offsets = [6, 0], sizes = [2, 8], strides = [1, 1]} : vector<16x8xf32> to vector<2x8xf32>
    %534 = arith.addf %525, %533 : vector<2x8xf32>
    %535 = vector.shape_cast %534 : vector<2x8xf32> to vector<2x1x8xf32>
    %536 = vector.shape_cast %535 : vector<2x1x8xf32> to vector<2x1x8xf32>
    %537 = vector.broadcast %536 : vector<2x1x8xf32> to vector<2x8x8xf32>
    %538 = arith.addf %537, %480 : vector<2x8x8xf32>
    %cst_106 = arith.constant dense<0xFF800000> : vector<2x8xf32>
    %539 = vector.multi_reduction <maximumf>, %538, %cst_106 [2] : vector<2x8x8xf32> to vector<2x8xf32>
    %cst_107 = arith.constant dense<0xFF800000> : vector<2x8xf32>
    %540 = vector.multi_reduction <maximumf>, %538, %cst_107 [2] : vector<2x8x8xf32> to vector<2x8xf32>
    %541 = vector.shape_cast %540 : vector<2x8xf32> to vector<2x8x1xf32>
    %542 = vector.broadcast %541 : vector<2x8x1xf32> to vector<2x8x8xf32>
    %543 = arith.cmpf oeq, %538, %542 : vector<2x8x8xf32>
    %c8_i32_108 = arith.constant 8 : i32
    %544 = vector.broadcast %c8_i32_108 : i32 to vector<2x8x8xi32>
    %545 = arith.select %543, %477, %544 : vector<2x8x8xi1>, vector<2x8x8xi32>
    %cst_109 = arith.constant dense<2147483647> : vector<2x8xi32>
    %546 = vector.multi_reduction <minsi>, %545, %cst_109 [2] : vector<2x8x8xi32> to vector<2x8xi32>
    %547 = vector.extract_strided_slice %474 {offsets = [8, 0], sizes = [2, 8], strides = [1, 1]} : vector<16x8xf32> to vector<2x8xf32>
    %548 = arith.addf %539, %547 : vector<2x8xf32>
    %549 = vector.shape_cast %548 : vector<2x8xf32> to vector<2x1x8xf32>
    %550 = vector.shape_cast %549 : vector<2x1x8xf32> to vector<2x1x8xf32>
    %551 = vector.broadcast %550 : vector<2x1x8xf32> to vector<2x8x8xf32>
    %552 = arith.addf %551, %480 : vector<2x8x8xf32>
    %cst_110 = arith.constant dense<0xFF800000> : vector<2x8xf32>
    %553 = vector.multi_reduction <maximumf>, %552, %cst_110 [2] : vector<2x8x8xf32> to vector<2x8xf32>
    %cst_111 = arith.constant dense<0xFF800000> : vector<2x8xf32>
    %554 = vector.multi_reduction <maximumf>, %552, %cst_111 [2] : vector<2x8x8xf32> to vector<2x8xf32>
    %555 = vector.shape_cast %554 : vector<2x8xf32> to vector<2x8x1xf32>
    %556 = vector.broadcast %555 : vector<2x8x1xf32> to vector<2x8x8xf32>
    %557 = arith.cmpf oeq, %552, %556 : vector<2x8x8xf32>
    %c8_i32_112 = arith.constant 8 : i32
    %558 = vector.broadcast %c8_i32_112 : i32 to vector<2x8x8xi32>
    %559 = arith.select %557, %477, %558 : vector<2x8x8xi1>, vector<2x8x8xi32>
    %cst_113 = arith.constant dense<2147483647> : vector<2x8xi32>
    %560 = vector.multi_reduction <minsi>, %559, %cst_113 [2] : vector<2x8x8xi32> to vector<2x8xi32>
    %561 = vector.extract_strided_slice %474 {offsets = [10, 0], sizes = [2, 8], strides = [1, 1]} : vector<16x8xf32> to vector<2x8xf32>
    %562 = arith.addf %553, %561 : vector<2x8xf32>
    %563 = vector.shape_cast %562 : vector<2x8xf32> to vector<2x1x8xf32>
    %564 = vector.shape_cast %563 : vector<2x1x8xf32> to vector<2x1x8xf32>
    %565 = vector.broadcast %564 : vector<2x1x8xf32> to vector<2x8x8xf32>
    %566 = arith.addf %565, %480 : vector<2x8x8xf32>
    %cst_114 = arith.constant dense<0xFF800000> : vector<2x8xf32>
    %567 = vector.multi_reduction <maximumf>, %566, %cst_114 [2] : vector<2x8x8xf32> to vector<2x8xf32>
    %cst_115 = arith.constant dense<0xFF800000> : vector<2x8xf32>
    %568 = vector.multi_reduction <maximumf>, %566, %cst_115 [2] : vector<2x8x8xf32> to vector<2x8xf32>
    %569 = vector.shape_cast %568 : vector<2x8xf32> to vector<2x8x1xf32>
    %570 = vector.broadcast %569 : vector<2x8x1xf32> to vector<2x8x8xf32>
    %571 = arith.cmpf oeq, %566, %570 : vector<2x8x8xf32>
    %c8_i32_116 = arith.constant 8 : i32
    %572 = vector.broadcast %c8_i32_116 : i32 to vector<2x8x8xi32>
    %573 = arith.select %571, %477, %572 : vector<2x8x8xi1>, vector<2x8x8xi32>
    %cst_117 = arith.constant dense<2147483647> : vector<2x8xi32>
    %574 = vector.multi_reduction <minsi>, %573, %cst_117 [2] : vector<2x8x8xi32> to vector<2x8xi32>
    %575 = vector.extract_strided_slice %474 {offsets = [12, 0], sizes = [2, 8], strides = [1, 1]} : vector<16x8xf32> to vector<2x8xf32>
    %576 = arith.addf %567, %575 : vector<2x8xf32>
    %577 = vector.shape_cast %576 : vector<2x8xf32> to vector<2x1x8xf32>
    %578 = vector.shape_cast %577 : vector<2x1x8xf32> to vector<2x1x8xf32>
    %579 = vector.broadcast %578 : vector<2x1x8xf32> to vector<2x8x8xf32>
    %580 = arith.addf %579, %480 : vector<2x8x8xf32>
    %cst_118 = arith.constant dense<0xFF800000> : vector<2x8xf32>
    %581 = vector.multi_reduction <maximumf>, %580, %cst_118 [2] : vector<2x8x8xf32> to vector<2x8xf32>
    %cst_119 = arith.constant dense<0xFF800000> : vector<2x8xf32>
    %582 = vector.multi_reduction <maximumf>, %580, %cst_119 [2] : vector<2x8x8xf32> to vector<2x8xf32>
    %583 = vector.shape_cast %582 : vector<2x8xf32> to vector<2x8x1xf32>
    %584 = vector.broadcast %583 : vector<2x8x1xf32> to vector<2x8x8xf32>
    %585 = arith.cmpf oeq, %580, %584 : vector<2x8x8xf32>
    %c8_i32_120 = arith.constant 8 : i32
    %586 = vector.broadcast %c8_i32_120 : i32 to vector<2x8x8xi32>
    %587 = arith.select %585, %477, %586 : vector<2x8x8xi1>, vector<2x8x8xi32>
    %cst_121 = arith.constant dense<2147483647> : vector<2x8xi32>
    %588 = vector.multi_reduction <minsi>, %587, %cst_121 [2] : vector<2x8x8xi32> to vector<2x8xi32>
    %589 = vector.extract_strided_slice %474 {offsets = [14, 0], sizes = [2, 8], strides = [1, 1]} : vector<16x8xf32> to vector<2x8xf32>
    %590 = arith.addf %581, %589 : vector<2x8xf32>
    %591 = vector.extract_strided_slice %475 {offsets = [7, 0], sizes = [1, 8], strides = [1, 1]} : vector<8x8xf32> to vector<1x8xf32>
    %592 = vector.broadcast %591 : vector<1x8xf32> to vector<2x8xf32>
    %593 = arith.addf %590, %592 : vector<2x8xf32>
    %cst_122 = arith.constant dense<0xFF800000> : vector<2xf32>
    %594 = vector.multi_reduction <maximumf>, %593, %cst_122 [1] : vector<2x8xf32> to vector<2xf32>
    %595 = vector.shape_cast %594 : vector<2xf32> to vector<2x1xf32>
    %596 = vector.broadcast %595 : vector<2x1xf32> to vector<2x8xf32>
    %597 = arith.cmpf oeq, %593, %596 : vector<2x8xf32>
    %c8_i32_123 = arith.constant 8 : i32
    %598 = vector.broadcast %c8_i32_123 : i32 to vector<2x8xi32>
    %599 = arith.select %597, %476, %598 : vector<2x8xi1>, vector<2x8xi32>
    %cst_124 = arith.constant dense<2147483647> : vector<2xi32>
    %600 = vector.multi_reduction <minsi>, %599, %cst_124 [1] : vector<2x8xi32> to vector<2xi32>
    %601 = vector.shape_cast %600 : vector<2xi32> to vector<2x1xi32>
    %c0_125 = arith.constant 0 : index
    %c0_126 = arith.constant 0 : index
    %602 = vector.load %arg10[%c0_125, %c0_126] : memref<2x1xf32, #tpu.memory_space<vmem>>, vector<2x1xf32>
    tpu.vector_store %arg10[%c0_125, %c0_126], %595 {strides = array<i32>} : memref<2x1xf32, #tpu.memory_space<vmem>>, vector<2x1xf32>,
    %603 = vector.broadcast %601 : vector<2x1xi32> to vector<2x8xi32>
    %604 = arith.cmpi eq, %476, %603 : vector<2x8xi32>
    %c0_i32 = arith.constant 0 : i32
    %605 = vector.broadcast %c0_i32 : i32 to vector<2x8xi32>
    %606 = arith.select %604, %588, %605 : vector<2x8xi1>, vector<2x8xi32>
    %cst_127 = arith.constant dense<0> : vector<2xi32>
    %607 = vector.multi_reduction <add>, %606, %cst_127 [1] : vector<2x8xi32> to vector<2xi32>
    %608 = vector.shape_cast %607 : vector<2xi32> to vector<2x1xi32>
    %609 = vector.broadcast %608 : vector<2x1xi32> to vector<2x8xi32>
    %610 = arith.cmpi eq, %476, %609 : vector<2x8xi32>
    %c0_i32_128 = arith.constant 0 : i32
    %611 = vector.broadcast %c0_i32_128 : i32 to vector<2x8xi32>
    %612 = arith.select %610, %574, %611 : vector<2x8xi1>, vector<2x8xi32>
    %cst_129 = arith.constant dense<0> : vector<2xi32>
    %613 = vector.multi_reduction <add>, %612, %cst_129 [1] : vector<2x8xi32> to vector<2xi32>
    %614 = vector.shape_cast %613 : vector<2xi32> to vector<2x1xi32>
    %615 = vector.broadcast %614 : vector<2x1xi32> to vector<2x8xi32>
    %616 = arith.cmpi eq, %476, %615 : vector<2x8xi32>
    %c0_i32_130 = arith.constant 0 : i32
    %617 = vector.broadcast %c0_i32_130 : i32 to vector<2x8xi32>
    %618 = arith.select %616, %560, %617 : vector<2x8xi1>, vector<2x8xi32>
    %cst_131 = arith.constant dense<0> : vector<2xi32>
    %619 = vector.multi_reduction <add>, %618, %cst_131 [1] : vector<2x8xi32> to vector<2xi32>
    %620 = vector.shape_cast %619 : vector<2xi32> to vector<2x1xi32>
    %621 = vector.broadcast %620 : vector<2x1xi32> to vector<2x8xi32>
    %622 = arith.cmpi eq, %476, %621 : vector<2x8xi32>
    %c0_i32_132 = arith.constant 0 : i32
    %623 = vector.broadcast %c0_i32_132 : i32 to vector<2x8xi32>
    %624 = arith.select %622, %546, %623 : vector<2x8xi1>, vector<2x8xi32>
    %cst_133 = arith.constant dense<0> : vector<2xi32>
    %625 = vector.multi_reduction <add>, %624, %cst_133 [1] : vector<2x8xi32> to vector<2xi32>
    %626 = vector.shape_cast %625 : vector<2xi32> to vector<2x1xi32>
    %627 = vector.broadcast %626 : vector<2x1xi32> to vector<2x8xi32>
    %628 = arith.cmpi eq, %476, %627 : vector<2x8xi32>
    %c0_i32_134 = arith.constant 0 : i32
    %629 = vector.broadcast %c0_i32_134 : i32 to vector<2x8xi32>
    %630 = arith.select %628, %532, %629 : vector<2x8xi1>, vector<2x8xi32>
    %cst_135 = arith.constant dense<0> : vector<2xi32>
    %631 = vector.multi_reduction <add>, %630, %cst_135 [1] : vector<2x8xi32> to vector<2xi32>
    %632 = vector.shape_cast %631 : vector<2xi32> to vector<2x1xi32>
    %633 = vector.broadcast %632 : vector<2x1xi32> to vector<2x8xi32>
    %634 = arith.cmpi eq, %476, %633 : vector<2x8xi32>
    %c0_i32_136 = arith.constant 0 : i32
    %635 = vector.broadcast %c0_i32_136 : i32 to vector<2x8xi32>
    %636 = arith.select %634, %518, %635 : vector<2x8xi1>, vector<2x8xi32>
    %cst_137 = arith.constant dense<0> : vector<2xi32>
    %637 = vector.multi_reduction <add>, %636, %cst_137 [1] : vector<2x8xi32> to vector<2xi32>
    %638 = vector.shape_cast %637 : vector<2xi32> to vector<2x1xi32>
    %639 = vector.broadcast %638 : vector<2x1xi32> to vector<2x8xi32>
    %640 = arith.cmpi eq, %476, %639 : vector<2x8xi32>
    %c0_i32_138 = arith.constant 0 : i32
    %641 = vector.broadcast %c0_i32_138 : i32 to vector<2x8xi32>
    %642 = arith.select %640, %504, %641 : vector<2x8xi1>, vector<2x8xi32>
    %cst_139 = arith.constant dense<0> : vector<2xi32>
    %643 = vector.multi_reduction <add>, %642, %cst_139 [1] : vector<2x8xi32> to vector<2xi32>
    %644 = vector.shape_cast %643 : vector<2xi32> to vector<2x1xi32>
    %645 = tpu.concatenate %644, %638, %632, %626, %620, %614, %608, %601 in 1 : vector<2x1xi32>, vector<2x1xi32>, vector<2x1xi32>, vector<2x1xi32>, vector<2x1xi32>, vector<2x1xi32>, vector<2x1xi32>, vector<2x1xi32> -> vector<2x8xi32>
    %c0_140 = arith.constant 0 : index
    %c0_141 = arith.constant 0 : index
    %646 = vector.load %arg11[%c0_140, %c0_141] : memref<2x8xi32, #tpu.memory_space<vmem>>, vector<2x8xi32>
    tpu.vector_store %arg11[%c0_140, %c0_141], %645 {strides = array<i32>} : memref<2x8xi32, #tpu.memory_space<vmem>>, vector<2x8xi32>,
    return
  }
}

</mosaic_0001>

<bundles_post_ra>
// kernel: bilstm_crf_forward.1
= control target key start
LH: loop header
LB: loop body
LE: loop exit
PB: predicated region body
PF: predicated region fallthrough
CT: control target
= control target key end

     0   :  { %v6311_v7 = vmov 0.0|0.0   ;;  %vm6312_vm0 = vmmov 0   ;;  %v6313_v8 = vmov 0.0   ;;  %vm175_vm1 = vcmask 261120   ;;  %s6314_s19 = smov 32   ;;  %s8677_s0 = inlined_call_operand.vmem [shape: f32[16,128], index: 0, kind: input, shape index: {}]   ;;  %s8678_s1 = inlined_call_operand.vmem [shape: f32[128,256], index: 1, kind: input, shape index: {}]   ;;  %s8679_s2 = inlined_call_operand.vmem [shape: f32[32,128], index: 2, kind: input, shape index: {}]   ;;  %s8680_s3 = inlined_call_operand.vmem [shape: f32[32,128], index: 3, kind: input, shape index: {}]   ;;  %s8681_s4 = inlined_call_operand.vmem [shape: f32[1,256], index: 4, kind: input, shape index: {}]   ;;  %s8682_s5 = inlined_call_operand.vmem [shape: f32[2,2,32], index: 5, kind: input, shape index: {}]   ;;  %s8683_s6 = inlined_call_operand.vmem [shape: f32[2,2,32], index: 6, kind: input, shape index: {}]   ;;  %s8684_s7 = inlined_call_operand.vmem [shape: f32[64,8], index: 7, kind: input, shape index: {}]   ;;  %s8685_s8 = inlined_call_operand.vmem [shape: f32[1,8], index: 8, kind: input, shape index: {}]   ;;  %s8686_s9 = inlined_call_operand.vmem [shape: f32[8,8], index: 9, kind: input, shape index: {}]   ;;  %s8687_s10 = inlined_call_operand.vmem [shape: f32[2,1], index: 10, kind: output, shape index: {0}]   ;;  %s8688_s11 = inlined_call_operand.hbm [shape: s32[2,8], index: 11, kind: output, shape index: {1}]  }
   0x1   :  { %v41_v0 = vld [vmem:[%s8678_s1 + $0x8] sm:$0xff]  ;;  %v43_v1 = vld [vmem:[%s8678_s1 + $0x18] sm:$0xff]  ;;  %v40_v2 = vld [vmem:[%s8678_s1] sm:$0xff]  ;;  %6034 = vmatprep.subr.bf16.mxu1 %v6311_v7  ;;  %5812 = vmatprep.mubr.msk.f32.mxu1 %vm6312_vm0, %v6313_v8 }
   0x2   :  { %v6002_v3 = vpack.c.bf16 %v43_v1, %v41_v0  ;;  %v42_v4 = vld [vmem:[%s8678_s1 + $0x10] sm:$0xff]  ;;  %v45_v5 = vld [vmem:[%s8678_s1 + $0x28] sm:$0xff]  ;;  %v47_v6 = vld [vmem:[%s8678_s1 + $0x38] sm:$0xff]  ;;  %148 = vmatprep.mubr.f32.mxu0 %v6313_v8 }
   0x3   :  { %v6004_v9 = vpack.c.bf16 %v42_v4, %v40_v2  ;;  %v6006_v10 = vpack.c.bf16 %v47_v6, %v45_v5  ;;  %v44_v11 = vld [vmem:[%s8678_s1 + $0x20] sm:$0xff]  ;;  %v46_v12 = vld [vmem:[%s8678_s1 + $0x30] sm:$0xff]  ;;  %v49_v13 = vld [vmem:[%s8678_s1 + $0x48] sm:$0xff] }
   0x4   :  { %6003 = vmatprep.subr.bf16.mxu0 %v6002_v3  ;;  %v51_v14 = vld [vmem:[%s8678_s1 + $0x58] sm:$0xff]  ;;  %v6008_v15 = vpack.c.bf16 %v46_v12, %v44_v11  ;;  %v48_v17 = vld [vmem:[%s8678_s1 + $0x40] sm:$0xff]  ;;  %v50_v18 = vld [vmem:[%s8678_s1 + $0x50] sm:$0xff] }
   0x5   :  { %6005 = vmatpush1.bf16.msra.mxu0 %v6004_v9  ;;  %v6010_v16 = vpack.c.bf16 %v51_v14, %v49_v13  ;;  %v53_v19 = vld [vmem:[%s8678_s1 + $0x68] sm:$0xff]  ;;  %v55_v20 = vld [vmem:[%s8678_s1 + $0x78] sm:$0xff]  ;;  %v6012_v21 = vpack.c.bf16 %v50_v18, %v48_v17  ;;  %v161_v22 = vld [vmem:[%s8679_s2] sm:$0xff] }
   0x6   :  { %6007 = vmatprep.subr.bf16.mxu0 %v6006_v10  ;;  %v162_v23 = vld [vmem:[%s8679_s2 + $0x8] sm:$0xff]  ;;  %v6014_v24 = vpack.c.bf16 %v55_v20, %v53_v19  ;;  %v52_v25 = vld [vmem:[%s8678_s1 + $0x60] sm:$0xff]  ;;  %v54_v26 = vld [vmem:[%s8678_s1 + $0x70] sm:$0xff] }
   0x7   :  { %v57_v27 = vld [vmem:[%s8678_s1 + $0x88] sm:$0xff]  ;;  %v6441_v28 = vpack.c.bf16 %v162_v23, %v161_v22  ;;  %v59_v29 = vld [vmem:[%s8678_s1 + $0x98] sm:$0xff]  ;;  %v163_v30 = vld [vmem:[%s8679_s2 + $0x10] sm:$0xff]  ;;  %v6016_v33 = vpack.c.bf16 %v54_v26, %v52_v25 }
   0x8   :  { %v164_v31 = vld [vmem:[%s8679_s2 + $0x18] sm:$0xff]  ;;  %v165_v34 = vld [vmem:[%s8680_s3] sm:$0xff]  ;;  %v166_v35 = vld [vmem:[%s8680_s3 + $0x8] sm:$0xff]  ;;  %v6018_v36 = vpack.c.bf16 %v59_v29, %v57_v27 }
   0x9   :  { %6009 = vmatpush1.bf16.msra.mxu0 %v6008_v15  ;;  %6036 = vmatpush3.bf16.msra.mxu1 %v6441_v28  ;;  %v6453_v32 = vpack.c.bf16 %v164_v31, %v163_v30  ;;  %v56_v37 = vld [vmem:[%s8678_s1 + $0x80] sm:$0xff]  ;;  %v58_v38 = vld [vmem:[%s8678_s1 + $0x90] sm:$0xff]  ;;  %v61_v39 = vld [vmem:[%s8678_s1 + $0xa8] sm:$0xff]  ;;  %v6481_v43 = vpack.c.bf16 %v166_v35, %v165_v34 }
   0xa   :  { %6011 = vmatprep.subr.bf16.mxu0 %v6010_v16  ;;  %6037 = vmatprep.subr.bf16.mxu1 %v6311_v7  ;;  %v63_v40 = vld [vmem:[%s8678_s1 + $0xb8] sm:$0xff]  ;;  %v170_v41 = vld [vmem:[%s8683_s6] sm:$0x3] }
   0xb   :  { %v169_v42 = vld [vmem:[%s8682_s5] sm:$0x3]  ;;  %335 = vrot.lane.b32.xlu1 %v170_v41, %s6314_s19 }
   0xd   :  { %6013 = vmatpush1.bf16.msra.mxu0 %v6012_v21  ;;  %6039 = vmatpush3.bf16.msra.mxu1 %v6453_v32 }
   0xe   :  { %6015 = vmatprep.subr.bf16.mxu0 %v6014_v24 }
   0xf   :  { %17 = vsyncpa [#allocation3], 0  ;;  %v6020_v44 = vpack.c.bf16 %v58_v38, %v56_v37  ;;  %6040 = vmatprep.subr.bf16.mxu1 %v6311_v7  ;;  %v167_v45 = vld [vmem:[%s8680_s3 + $0x10] sm:$0xff]  ;;  %v168_v46 = vld [vmem:[%s8680_s3 + $0x18] sm:$0xff]  ;;  %v6022_v47 = vpack.c.bf16 %v63_v40, %v61_v39  ;;  %v74_v5 = vlaneseq  ;;  %vm1870_vm2 = vcmask 1041408  }
  0x10   :  { %v60_v48 = vld [vmem:[%s8678_s1 + $0xa0] sm:$0xff]  ;;  %v62_v49 = vld [vmem:[%s8678_s1 + $0xb0] sm:$0xff]  ;;  %v65_v50 = vld [vmem:[%s8678_s1 + $0xc8] sm:$0xff]  ;;  %5813 = vmatmul.mubr.msk.f32.vlgmr.msra.gmra.mrb[0].mxu1 %vm175_vm1, %v169_v42  ;;  %v6505_v52 = vpack.c.bf16 %v168_v46, %v167_v45  ;;  %vm1872_vm3 = vcmask 1043456   ;;  %vm1874_vm4 = vcmask 1045504   ;;  %vm2112_vm6 = vcmask 64512  }
  0x11   :  { %6017 = vmatpush1.bf16.msra.mxu0 %v6016_v33  ;;  %v67_v51 = vld [vmem:[%s8678_s1 + $0xd8] sm:$0xff]  ;;  %6042 = vmatpush3.bf16.msra.mxu1 %v6481_v43  ;;  %v6024_v53 = vpack.c.bf16 %v62_v49, %v60_v48  ;;  %v64_v55 = vld [vmem:[%s8678_s1 + $0xc0] sm:$0xff]  ;;  %v66_v56 = vld [vmem:[%s8678_s1 + $0xd0] sm:$0xff]  ;;  %v6555_v6 = vshrl.u32 %v74_v5, 7  ;;  %vm2347_vm7 = vcmask 1041409   ;;  %vm2349_vm8 = vcmask 1042434  }
  0x12   :  { %6019 = vmatprep.subr.bf16.mxu0 %v6018_v36  ;;  %5823 = vmatprep.mubr.msk.f32.mxu1 %vm6312_vm0, %v6313_v8  ;;  %v6026_v54 = vpack.c.bf16 %v67_v51, %v65_v50  ;;  %v69_v57 = vld [vmem:[%s8678_s1 + $0xe8] sm:$0xff]  ;;  %v71_v58 = vld [vmem:[%s8678_s1 + $0xf8] sm:$0xff]  ;;  %v5673_v59 = vld [vmem:[%s8682_s5 + $0x2] sm:$0x3]  ;;  %v6028_v60 = vpack.c.bf16 %v66_v56, %v64_v55  ;;  %vm2351_vm9 = vcmask 1043459   ;;  %vm2353_vm10 = vcmask 1044484  }
  0x13   :  { %6043 = vmatprep.subr.bf16.mxu1 %v6311_v7  ;;  %v6030_v61 = vpack.c.bf16 %v71_v58, %v69_v57  ;;  %v68_v62 = vld [vmem:[%s8678_s1 + $0xe0] sm:$0xff]  ;;  %v70_v63 = vld [vmem:[%s8678_s1 + $0xf0] sm:$0xff]  ;;  %v39_v2 = vld [vmem:[%s8677_s0 + $0x8] sm:$0xff]  ;;  %v6558_v11 = vsub.s32 0, %v6555_v6  ;;  %v6564_v13 = vsub.s32 1, %v6555_v6  ;;  %vm2355_vm11 = vcmask 1045509  }
  0x14   :  { %v6032_v0 = vpack.c.bf16 %v70_v63, %v68_v62  ;;  %v38_v1 = vld [vmem:[%s8677_s0] sm:$0xff]  ;;  %vm2357_vm12 = vcmask 1046534   ;;  %vm2359_vm13 = vcmask 1047559  }
  0x15   :  { %6021 = vmatpush1.bf16.msra.mxu0 %v6020_v44  ;;  %6045 = vmatpush3.bf16.msra.mxu1 %v6505_v52  ;;  %v72_v12 = vld [vmem:[%s8681_s4] sm:$0x3]  ;;  %s6315_s4 = smov 64   ;;  %v5674_v29 = vld [vmem:[%s8683_s6 + $0x2] sm:$0x3] }
  0x16   :  { %6023 = vmatprep.subr.bf16.mxu0 %v6022_v47  ;;  %6046 = vmatprep.subr.bf16.mxu1 %v6311_v7  ;;  %v77_v14 = vrot.slane %v72_v12, %v6558_v11  ;;  %v81_v15 = vrot.slane %v72_v12, %v6564_v13  ;;  %v363_v31 = vrot.slane %v5674_v29, 2 }
  0x18   :  { %5824 = vmatmul.mubr.msk.f32.vlgmr.msra.gmra.mrb[2].mxu1 %vm175_vm1, %v5673_v59 }
  0x19   :  { %6025 = vmatpush1.bf16.msra.mxu0 %v6024_v53  ;;  %6048 = vmatpush3.bf16.msra.mxu1 %v6441_v28 }
  0x1a   :  { %6027 = vmatprep.subr.bf16.mxu0 %v6026_v54  ;;  %5834 = vmatprep.mubr.msk.f32.mxu1 %vm6312_vm0, %v6313_v8 }
  0x1b   :  { %6049 = vmatprep.subr.bf16.mxu1 %v6311_v7 }
  0x1d   :  { %6029 = vmatpush1.bf16.msra.mxu0 %v6028_v60  ;;  %6051 = vmatpush3.bf16.msra.mxu1 %v6453_v32 }
  0x1e   :  { %6031 = vmatprep.subr.bf16.mxu0 %v6030_v61  ;;  %6052 = vmatprep.subr.bf16.mxu1 %v6311_v7 }
  0x21   :  { %6033 = vmatpush1.bf16.msra.mxu0 %v6032_v0 }
  0x22   :  { %6070 = vmatprep.subr.bf16.mxu0 %v6311_v7 }
  0x24   :  { %149 = vmatmul.mubr.f32.vlgmr.msra.gmra.mrb[0].mxu0 %v38_v1 }
  0x25   :  { %154 = vmatprep.mubr.f32.mxu0 %v6313_v8  ;;  %6072 = vmatpush3.bf16.msra.mxu0 %v6441_v28 }
  0x26   :  { %6073 = vmatprep.subr.bf16.mxu0 %v6311_v7 }
  0x28   :  { %155 = vmatmul.mubr.f32.gmra.mrb[2].mxu0 %v39_v2 }
  0x29   :  { %6075 = vmatpush3.bf16.msra.mxu0 %v6453_v32  ;;  %5878 = vmatprep.mubr.msk.f32.mxu0 %vm6312_vm0, %v6313_v8 }
  0x2a   :  { %6082 = vmatprep.subr.bf16.mxu0 %v6311_v7 }
  0x7d   :  { %v336_v46 = vpop.permute.xlu1 %335 }
  0xe3   :  { %v245_v3 = vpop.f32.mrb[0].mxu1 }
  0xe4   :  { %v5814_v4 = vpop.f32.mrb[1].mxu1 }
  0xeb   :  { %v319_v9 = vpop.f32.mrb[2].mxu1 }
  0xec   :  { %v5825_v10 = vpop.f32.mrb[3].mxu1  ;;  %v324_v22 = vrot.slane %v319_v9, 2 }
  0xf7   :  { %v150_v16 = vpop.f32.mrb[0].mxu0 }
  0xf8   :  { %v6568_v17 = vadd.f32 %v150_v16, %v77_v14  ;;  %v152_v18 = vpop.f32.mrb[1].mxu0 }
  0xf9   :  { %v6570_v19 = vadd.f32 %v152_v18, %v81_v15 }
  0xfa   :  { %v249_v20 = vadd.f32 %v245_v3, %v6568_v17 }
  0xfb   :  { %v156_v21 = vpop.f32.mrb[2].mxu0 }
  0xfc   :  { %v6573_v23 = vadd.f32 %v156_v21, %v77_v14  ;;  %v158_v24 = vpop.f32.mrb[3].mxu0  ;;  %6159 = vtanh.f32 %v249_v20  ;;  %v5677_v33 = vmul.f32 -1.442695, %v249_v20 }
  0xfd   :  { %v6575_v25 = vadd.f32 %v158_v24, %v81_v15 }
  0xff   :  { %v326_v26 = vadd.f32 %v324_v22, %v6575_v25 }
 0x101   :  { %6161 = vtanh.f32 %v326_v26  ;;  %v5678_v34 = vmul.f32 -1.442695, %v326_v26 }
 0x102   :  { %6163 = vpow2.f32 %v5677_v33 }
 0x103   :  { %6165 = vpow2.f32 %v5678_v34 }
 0x106   :  { %v6160_v27 = vpop.eup %6159 }
 0x107   :  { %340 = vrot.lane.b32.xlu0 %v6160_v27, %s6315_s4 }
 0x10b   :  { %v6162_v30 = vpop.eup %6161 }
 0x10c   :  { %369 = vrot.lane.b32.xlu0 %v6162_v30, %s6315_s4  ;;  %v6164_v35 = vpop.eup %6163 }
 0x10d   :  { %v330_v36 = vadd.f32 1.0, %v6164_v35  ;;  %v6166_v37 = vpop.eup %6165 }
 0x10e   :  { %v358_v38 = vadd.f32 1.0, %v6166_v37 }
 0x10f   :  { %6167 = vrcp.f32 %v330_v36 }
 0x110   :  { %364 = vrot.lane.b32.xlu0 %v363_v31, %s6314_s19  ;;  %6169 = vrcp.f32 %v358_v38 }
 0x119   :  { %v6168_v39 = vpop.eup %6167 }
 0x11a   :  { %v6170_v42 = vpop.eup %6169  ;;  %v338_v47 = vmul.f32 %v6168_v39, %v336_v46 }
 0x179   :  { %v341_v40 = vpop.permute.xlu0 %340 }
 0x17a   :  { %v343_v41 = vmul.f32 %v6168_v39, %v341_v40 }
 0x17c   :  { %345 = vrot.lane.b32.xlu1 %v343_v41, %s6314_s19 }
 0x17e   :  { %v370_v44 = vpop.permute.xlu0 %369 }
 0x17f   :  { %v372_v45 = vmul.f32 %v6170_v42, %v370_v44 }
 0x181   :  { %374 = vrot.lane.b32.xlu1 %v372_v45, %s6314_s19 }
 0x182   :  { %v365_v49 = vpop.permute.xlu0 %364 }
 0x183   :  { %v367_v51 = vmul.f32 %v6170_v42, %v365_v49 }
 0x1ee   :  { %v346_v48 = vpop.permute.xlu1 %345 }
 0x1ef   :  { %v6586_v50 = vadd.f32 %v346_v48, %v338_v47 }
 0x1f1   :  { %6171 = vtanh.f32 %v6586_v50  ;;  %v551_v34 = vrot.slane %v6586_v50, 6 }
 0x1f3   :  { %v375_v53 = vpop.permute.xlu1 %374 }
 0x1f4   :  { %v6589_v54 = vadd.f32 %v375_v53, %v367_v51 }
 0x1f6   :  { %6173 = vtanh.f32 %v6589_v54  ;;  %v578_v38 = vrot.slane %v6589_v54, 2 }
 0x1fb   :  { %v6172_v55 = vpop.eup %6171 }
 0x1fc   :  { %351 = vrot.lane.b32.xlu0 %v6172_v55, %s6315_s4 }
 0x200   :  { %v6174_v56 = vpop.eup %6173 }
 0x201   :  { %380 = vrot.lane.b32.xlu1 %v6174_v56, %s6315_s4 }
 0x26e   :  { %v352_v57 = vpop.permute.xlu0 %351 }
 0x26f   :  { %v6594_v58 = vmul.f32 %v6168_v39, %v352_v57 }
 0x271   :  { %385 = vrot.lane.b32.xlu0 %v6594_v58, %s6314_s19 }
 0x273   :  { %v381_v59 = vpop.permute.xlu1 %380 }
 0x274   :  { %v6598_v60 = vmul.f32 %v6170_v42, %v381_v59 }
 0x276   :  { %v464_v61 = vrot.slane %v6598_v60, 6 }
 0x278   :  { %465 = vrot.lane.b32.xlu1 %v464_v61, %s6314_s19 }
 0x2e3   :  { %v386_v62 = vpop.permute.xlu0 %385 }
 0x2e4   :  { %5835 = vmatmul.mubr.msk.f32.vlgmr.msra.gmra.mrb[4].mxu1 %vm175_vm1, %v386_v62 }
 0x2e5   :  { %6054 = vmatpush3.bf16.msra.mxu1 %v6481_v43  ;;  %5845 = vmatprep.mubr.msk.f32.mxu1 %vm6312_vm0, %v6313_v8 }
 0x2e6   :  { %6055 = vmatprep.subr.bf16.mxu1 %v6311_v7 }
 0x2e9   :  { %6057 = vmatpush3.bf16.msra.mxu1 %v6505_v52 }
 0x2ea   :  { %v466_v63 = vpop.permute.xlu1 %465  ;;  %6058 = vmatprep.subr.bf16.mxu1 %v6311_v7 }
 0x2ec   :  { %5846 = vmatmul.mubr.msk.f32.vlgmr.msra.gmra.mrb[6].mxu1 %vm175_vm1, %v466_v63 }
 0x2ed   :  { %6060 = vmatpush3.bf16.msra.mxu1 %v6441_v28  ;;  %5856 = vmatprep.mubr.msk.f32.mxu1 %vm6312_vm0, %v6313_v8 }
 0x2ee   :  { %6061 = vmatprep.subr.bf16.mxu1 %v6311_v7 }
 0x2f1   :  { %6063 = vmatpush3.bf16.msra.mxu1 %v6453_v32 }
 0x2f2   :  { %6064 = vmatprep.subr.bf16.mxu1 %v6311_v7 }
 0x3b7   :  { %v455_v0 = vpop.f32.mrb[4].mxu1 }
 0x3b8   :  { %v460_v1 = vrot.slane %v455_v0, 6  ;;  %v5836_v2 = vpop.f32.mrb[5].mxu1 }
 0x3ba   :  { %v462_v3 = vadd.f32 %v460_v1, %v6568_v17 }
 0x3bc   :  { %6175 = vtanh.f32 %v462_v3  ;;  %v5681_v16 = vmul.f32 -1.442695, %v462_v3 }
 0x3bf   :  { %v535_v4 = vpop.f32.mrb[6].mxu1 }
 0x3c0   :  { %v540_v9 = vrot.slane %v535_v4, 4  ;;  %v5847_v10 = vpop.f32.mrb[7].mxu1 }
 0x3c2   :  { %v542_v12 = vadd.f32 %v540_v9, %v6575_v25 }
 0x3c4   :  { %6177 = vtanh.f32 %v542_v12  ;;  %v5682_v18 = vmul.f32 -1.442695, %v542_v12 }
 0x3c5   :  { %6179 = vpow2.f32 %v5681_v16 }
 0x3c6   :  { %v6176_v14 = vpop.eup %6175  ;;  %6181 = vpow2.f32 %v5682_v18 }
 0x3c7   :  { %555 = vrot.lane.b32.xlu0 %v6176_v14, %s6315_s4 }
 0x3ce   :  { %v6178_v15 = vpop.eup %6177 }
 0x3cf   :  { %582 = vrot.lane.b32.xlu1 %v6178_v15, %s6315_s4  ;;  %v6180_v20 = vpop.eup %6179 }
 0x3d0   :  { %v546_v21 = vadd.f32 1.0, %v6180_v20  ;;  %v6182_v22 = vpop.eup %6181 }
 0x3d1   :  { %v573_v24 = vadd.f32 1.0, %v6182_v22 }
 0x3d2   :  { %6183 = vrcp.f32 %v546_v21 }
 0x3d3   :  { %6185 = vrcp.f32 %v573_v24 }
 0x3dc   :  { %v6184_v26 = vpop.eup %6183 }
 0x3dd   :  { %v6186_v30 = vpop.eup %6185  ;;  %v553_v35 = vmul.f32 %v6184_v26, %v551_v34 }
 0x3de   :  { %v580_v39 = vmul.f32 %v6186_v30, %v578_v38 }
 0x439   :  { %v556_v27 = vpop.permute.xlu0 %555 }
 0x43a   :  { %v558_v29 = vmul.f32 %v6184_v26, %v556_v27 }
 0x43c   :  { %560 = vrot.lane.b32.xlu0 %v558_v29, %s6314_s19 }
 0x441   :  { %v583_v31 = vpop.permute.xlu1 %582 }
 0x442   :  { %v585_v33 = vmul.f32 %v6186_v30, %v583_v31 }
 0x444   :  { %587 = vrot.lane.b32.xlu1 %v585_v33, %s6314_s19 }
 0x4ae   :  { %v561_v36 = vpop.permute.xlu0 %560 }
 0x4af   :  { %v6623_v37 = vadd.f32 %v561_v36, %v553_v35 }
 0x4b1   :  { %6187 = vtanh.f32 %v6623_v37  ;;  %v765_v22 = vrot.slane %v6623_v37, 6 }
 0x4b6   :  { %v588_v40 = vpop.permute.xlu1 %587 }
 0x4b7   :  { %v6627_v41 = vadd.f32 %v588_v40, %v580_v39 }
 0x4b9   :  { %6189 = vtanh.f32 %v6627_v41  ;;  %v792_v29 = vrot.slane %v6627_v41, 2 }
 0x4bb   :  { %v6188_v42 = vpop.eup %6187 }
 0x4bc   :  { %566 = vrot.lane.b32.xlu0 %v6188_v42, %s6315_s4 }
 0x4c3   :  { %v6190_v44 = vpop.eup %6189 }
 0x4c4   :  { %593 = vrot.lane.b32.xlu1 %v6190_v44, %s6315_s4 }
 0x52e   :  { %v567_v45 = vpop.permute.xlu0 %566 }
 0x52f   :  { %v6632_v46 = vmul.f32 %v6184_v26, %v567_v45 }
 0x531   :  { %v598_v47 = vrot.slane %v6632_v46, 2  ;;  %v1871_v38 = vsel %vm1870_vm2, %v6594_v58, %v6632_v46 }
 0x533   :  { %599 = vrot.lane.b32.xlu0 %v598_v47, %s6314_s19 }
 0x536   :  { %v594_v48 = vpop.permute.xlu1 %593 }
 0x537   :  { %v6636_v49 = vmul.f32 %v6186_v30, %v594_v48 }
 0x539   :  { %v678_v50 = vrot.slane %v6636_v49, 4 }
 0x53b   :  { %679 = vrot.lane.b32.xlu1 %v678_v50, %s6314_s19 }
 0x5a5   :  { %v600_v51 = vpop.permute.xlu0 %599 }
 0x5a6   :  { %5857 = vmatmul.mubr.msk.f32.vlgmr.msra.gmra.mrb[8].mxu1 %vm175_vm1, %v600_v51 }
 0x5a7   :  { %6066 = vmatpush3.bf16.msra.mxu1 %v6481_v43  ;;  %5867 = vmatprep.mubr.msk.f32.mxu1 %vm6312_vm0, %v6313_v8 }
 0x5a8   :  { %6067 = vmatprep.subr.bf16.mxu1 %v6311_v7 }
 0x5ab   :  { %6069 = vmatpush3.bf16.msra.mxu1 %v6505_v52 }
 0x5ac   :  { %6076 = vmatprep.subr.bf16.mxu1 %v6311_v7 }
 0x5ad   :  { %v680_v53 = vpop.permute.xlu1 %679 }
 0x5ae   :  { %5868 = vmatmul.mubr.msk.f32.vlgmr.msra.gmra.mrb[10].mxu1 %vm175_vm1, %v680_v53 }
 0x5af   :  { %6078 = vmatpush3.bf16.msra.mxu1 %v6481_v43  ;;  %5889 = vmatprep.mubr.msk.f32.mxu1 %vm6312_vm0, %v6313_v8 }
 0x5b0   :  { %6079 = vmatprep.subr.bf16.mxu1 %v6311_v7 }
 0x5b3   :  { %6081 = vmatpush3.bf16.msra.mxu1 %v6505_v52 }
 0x5b4   :  { %6088 = vmatprep.subr.bf16.mxu1 %v6311_v7 }
 0x679   :  { %v669_v54 = vpop.f32.mrb[8].mxu1 }
 0x67a   :  { %v674_v55 = vrot.slane %v669_v54, 4  ;;  %v5858_v56 = vpop.f32.mrb[9].mxu1 }
 0x67c   :  { %v676_v57 = vadd.f32 %v674_v55, %v6568_v17 }
 0x67e   :  { %6191 = vtanh.f32 %v676_v57  ;;  %v5685_v2 = vmul.f32 -1.442695, %v676_v57 }
 0x681   :  { %v749_v59 = vpop.f32.mrb[10].mxu1 }
 0x682   :  { %v754_v61 = vrot.slane %v749_v59, 6  ;;  %v5869_v62 = vpop.f32.mrb[11].mxu1 }
 0x684   :  { %v756_v63 = vadd.f32 %v754_v61, %v6575_v25 }
 0x686   :  { %6193 = vtanh.f32 %v756_v63  ;;  %v5686_v3 = vmul.f32 -1.442695, %v756_v63 }
 0x687   :  { %6195 = vpow2.f32 %v5685_v2 }
 0x688   :  { %v6192_v0 = vpop.eup %6191  ;;  %6197 = vpow2.f32 %v5686_v3 }
 0x689   :  { %769 = vrot.lane.b32.xlu1 %v6192_v0, %s6315_s4 }
 0x690   :  { %v6194_v1 = vpop.eup %6193 }
 0x691   :  { %796 = vrot.lane.b32.xlu0 %v6194_v1, %s6315_s4  ;;  %v6196_v4 = vpop.eup %6195 }
 0x692   :  { %v760_v9 = vadd.f32 1.0, %v6196_v4  ;;  %v6198_v10 = vpop.eup %6197 }
 0x693   :  { %v787_v12 = vadd.f32 1.0, %v6198_v10 }
 0x694   :  { %6199 = vrcp.f32 %v760_v9 }
 0x695   :  { %6201 = vrcp.f32 %v787_v12 }
 0x69e   :  { %v6200_v14 = vpop.eup %6199 }
 0x69f   :  { %v6202_v18 = vpop.eup %6201  ;;  %v767_v24 = vmul.f32 %v6200_v14, %v765_v22 }
 0x6a0   :  { %v794_v30 = vmul.f32 %v6202_v18, %v792_v29 }
 0x6fb   :  { %v770_v15 = vpop.permute.xlu1 %769 }
 0x6fc   :  { %v772_v16 = vmul.f32 %v6200_v14, %v770_v15 }
 0x6fe   :  { %774 = vrot.lane.b32.xlu1 %v772_v16, %s6314_s19 }
 0x703   :  { %v797_v20 = vpop.permute.xlu0 %796 }
 0x704   :  { %v799_v21 = vmul.f32 %v6202_v18, %v797_v20 }
 0x706   :  { %801 = vrot.lane.b32.xlu0 %v799_v21, %s6314_s19 }
 0x770   :  { %v775_v26 = vpop.permute.xlu1 %774 }
 0x771   :  { %v6661_v27 = vadd.f32 %v775_v26, %v767_v24 }
 0x773   :  { %6203 = vtanh.f32 %v6661_v27  ;;  %v976_v9 = vrot.slane %v6661_v27, 6 }
 0x778   :  { %v802_v31 = vpop.permute.xlu0 %801 }
 0x779   :  { %v6665_v33 = vadd.f32 %v802_v31, %v794_v30 }
 0x77b   :  { %6205 = vtanh.f32 %v6665_v33  ;;  %v1003_v15 = vrot.slane %v6665_v33, 2 }
 0x77d   :  { %v6204_v34 = vpop.eup %6203 }
 0x77e   :  { %780 = vrot.lane.b32.xlu1 %v6204_v34, %s6315_s4 }
 0x785   :  { %v6206_v35 = vpop.eup %6205 }
 0x786   :  { %807 = vrot.lane.b32.xlu0 %v6206_v35, %s6315_s4 }
 0x7f0   :  { %v781_v36 = vpop.permute.xlu1 %780 }
 0x7f1   :  { %v783_v37 = vmul.f32 %v6200_v14, %v781_v36 }
 0x7f3   :  { %v812_v39 = vrot.slane %v783_v37, 4  ;;  %v6674_v40 = vsel %vm1872_vm3, %v1871_v38, %v783_v37 }
 0x7f5   :  { %813 = vrot.lane.b32.xlu1 %v812_v39, %s6314_s19 }
 0x7f8   :  { %v808_v41 = vpop.permute.xlu0 %807 }
 0x7f9   :  { %v6677_v42 = vmul.f32 %v6202_v18, %v808_v41 }
 0x7fb   :  { %v892_v44 = vrot.slane %v6677_v42, 2 }
 0x7fd   :  { %893 = vrot.lane.b32.xlu0 %v892_v44, %s6314_s19 }
 0x867   :  { %v814_v45 = vpop.permute.xlu1 %813 }
 0x868   :  { %5879 = vmatmul.mubr.msk.f32.vlgmr.msra.gmra.mrb[4].mxu0 %vm175_vm1, %v814_v45 }
 0x869   :  { %6084 = vmatpush3.bf16.msra.mxu0 %v6441_v28  ;;  %5900 = vmatprep.mubr.msk.f32.mxu0 %vm6312_vm0, %v6313_v8 }
 0x86a   :  { %6085 = vmatprep.subr.bf16.mxu0 %v6311_v7 }
 0x86d   :  { %6087 = vmatpush3.bf16.msra.mxu0 %v6453_v32 }
 0x86e   :  { %6094 = vmatprep.subr.bf16.mxu0 %v6311_v7 }
 0x86f   :  { %v894_v58 = vpop.permute.xlu0 %893 }
 0x870   :  { %5890 = vmatmul.mubr.msk.f32.vlgmr.msra.gmra.mrb[12].mxu1 %vm175_vm1, %v894_v58 }
 0x871   :  { %6090 = vmatpush3.bf16.msra.mxu1 %v6481_v43  ;;  %5911 = vmatprep.mubr.msk.f32.mxu1 %vm6312_vm0, %v6313_v8 }
 0x872   :  { %6091 = vmatprep.subr.bf16.mxu1 %v6311_v7 }
 0x875   :  { %6093 = vmatpush3.bf16.msra.mxu1 %v6505_v52 }
 0x876   :  { %6100 = vmatprep.subr.bf16.mxu1 %v6311_v7 }
 0x93b   :  { %v883_v46 = vpop.f32.mrb[4].mxu0 }
 0x93c   :  { %v888_v47 = vrot.slane %v883_v46, 2  ;;  %v5880_v48 = vpop.f32.mrb[5].mxu0 }
 0x93e   :  { %v890_v50 = vadd.f32 %v888_v47, %v6568_v17 }
 0x940   :  { %6207 = vtanh.f32 %v890_v50  ;;  %v5689_v57 = vmul.f32 -1.442695, %v890_v50 }
 0x943   :  { %v963_v51 = vpop.f32.mrb[12].mxu1 }
 0x944   :  { %v967_v53 = vadd.f32 %v963_v51, %v6575_v25  ;;  %v5891_v54 = vpop.f32.mrb[13].mxu1 }
 0x946   :  { %6209 = vtanh.f32 %v967_v53  ;;  %v5690_v59 = vmul.f32 -1.442695, %v967_v53 }
 0x947   :  { %6211 = vpow2.f32 %v5689_v57 }
 0x948   :  { %6213 = vpow2.f32 %v5690_v59 }
 0x94a   :  { %v6208_v55 = vpop.eup %6207 }
 0x94b   :  { %980 = vrot.lane.b32.xlu1 %v6208_v55, %s6315_s4 }
 0x950   :  { %v6210_v56 = vpop.eup %6209 }
 0x951   :  { %1007 = vrot.lane.b32.xlu0 %v6210_v56, %s6315_s4  ;;  %v6212_v61 = vpop.eup %6211 }
 0x952   :  { %v971_v62 = vadd.f32 1.0, %v6212_v61  ;;  %v6214_v63 = vpop.eup %6213 }
 0x953   :  { %v998_v17 = vadd.f32 1.0, %v6214_v63 }
 0x954   :  { %6215 = vrcp.f32 %v971_v62 }
 0x955   :  { %6217 = vrcp.f32 %v998_v17 }
 0x95e   :  { %v6216_v0 = vpop.eup %6215 }
 0x95f   :  { %v6218_v2 = vpop.eup %6217  ;;  %v978_v10 = vmul.f32 %v6216_v0, %v976_v9 }
 0x960   :  { %v1005_v16 = vmul.f32 %v6218_v2, %v1003_v15 }
 0x9bd   :  { %v981_v25 = vpop.permute.xlu1 %980 }
 0x9be   :  { %v983_v1 = vmul.f32 %v6216_v0, %v981_v25 }
 0x9c0   :  { %985 = vrot.lane.b32.xlu1 %v983_v1, %s6314_s19 }
 0x9c3   :  { %v1008_v3 = vpop.permute.xlu0 %1007 }
 0x9c4   :  { %v1010_v4 = vmul.f32 %v6218_v2, %v1008_v3 }
 0x9c6   :  { %1012 = vrot.lane.b32.xlu0 %v1010_v4, %s6314_s19 }
 0xa32   :  { %v986_v12 = vpop.permute.xlu1 %985 }
 0xa33   :  { %v6702_v14 = vadd.f32 %v986_v12, %v978_v10 }
 0xa35   :  { %6219 = vtanh.f32 %v6702_v14  ;;  %v1186_v61 = vrot.slane %v6702_v14, 6 }
 0xa38   :  { %v1013_v18 = vpop.permute.xlu0 %1012 }
 0xa39   :  { %v6706_v20 = vadd.f32 %v1013_v18, %v1005_v16 }
 0xa3b   :  { %6221 = vtanh.f32 %v6706_v20 }
 0xa3f   :  { %v6220_v21 = vpop.eup %6219 }
 0xa40   :  { %991 = vrot.lane.b32.xlu1 %v6220_v21, %s6315_s4 }
 0xa45   :  { %v6222_v22 = vpop.eup %6221 }
 0xa46   :  { %1018 = vrot.lane.b32.xlu0 %v6222_v22, %s6315_s4 }
 0xab2   :  { %v992_v24 = vpop.permute.xlu1 %991 }
 0xab3   :  { %v994_v26 = vmul.f32 %v6216_v0, %v992_v24  ;;  %v1213_v0 = vrot.slane %v6706_v20, 2 }
 0xab5   :  { %v1023_v27 = vrot.slane %v994_v26, 6  ;;  %v6713_v29 = vsel %vm1874_vm4, %v6674_v40, %v994_v26 }
 0xab7   :  { %1024 = vrot.lane.b32.xlu1 %v1023_v27, %s6314_s19 }
 0xab8   :  { %v1019_v30 = vpop.permute.xlu0 %1018 }
 0xab9   :  { %v6716_v31 = vmul.f32 %v6218_v2, %v1019_v30 }
 0xabb   :  { %1100 = vrot.lane.b32.xlu0 %v6716_v31, %s6314_s19 }
 0xb29   :  { %v1025_v33 = vpop.permute.xlu1 %1024 }
 0xb2a   :  { %5901 = vmatmul.mubr.msk.f32.vlgmr.msra.gmra.mrb[6].mxu0 %vm175_vm1, %v1025_v33 }
 0xb2b   :  { %6096 = vmatpush3.bf16.msra.mxu0 %v6441_v28  ;;  %5922 = vmatprep.mubr.msk.f32.mxu0 %vm6312_vm0, %v6313_v8 }
 0xb2c   :  { %6097 = vmatprep.subr.bf16.mxu0 %v6311_v7 }
 0xb2d   :  { %v1101_v34 = vpop.permute.xlu0 %1100 }
 0xb2e   :  { %5912 = vmatmul.mubr.msk.f32.vlgmr.msra.gmra.mrb[14].mxu1 %vm175_vm1, %v1101_v34 }
 0xb2f   :  { %6099 = vmatpush3.bf16.msra.mxu0 %v6453_v32  ;;  %6102 = vmatpush3.bf16.msra.mxu1 %v6481_v43 }
 0xb30   :  { %6103 = vmatprep.subr.bf16.mxu1 %v6311_v7  ;;  %5933 = vmatprep.mubr.msk.f32.mxu1 %vm6312_vm0, %v6313_v8 }
 0xb31   :  { %6106 = vmatprep.subr.bf16.mxu0 %v6311_v7 }
 0xb33   :  { %6105 = vmatpush3.bf16.msra.mxu1 %v6505_v52 }
 0xb34   :  { %6112 = vmatprep.subr.bf16.mxu1 %v6311_v7 }
 0xbfd   :  { %v1094_v35 = vpop.f32.mrb[6].mxu0 }
 0xbfe   :  { %v1098_v36 = vadd.f32 %v1094_v35, %v6573_v23  ;;  %v5902_v37 = vpop.f32.mrb[7].mxu0 }
 0xc00   :  { %6223 = vtanh.f32 %v1098_v36  ;;  %v5693_v58 = vmul.f32 -1.442695, %v1098_v36 }
 0xc01   :  { %v1170_v38 = vpop.f32.mrb[14].mxu1 }
 0xc02   :  { %v1175_v39 = vrot.slane %v1170_v38, 2  ;;  %v5913_v40 = vpop.f32.mrb[15].mxu1 }
 0xc04   :  { %v1177_v41 = vadd.f32 %v1175_v39, %v6570_v19 }
 0xc06   :  { %6225 = vtanh.f32 %v1177_v41  ;;  %v5694_v46 = vmul.f32 -1.442695, %v1177_v41 }
 0xc07   :  { %6227 = vpow2.f32 %v5693_v58 }
 0xc08   :  { %6229 = vpow2.f32 %v5694_v46 }
 0xc0a   :  { %v6224_v44 = vpop.eup %6223 }
 0xc0b   :  { %1190 = vrot.lane.b32.xlu1 %v6224_v44, %s6315_s4 }
 0xc10   :  { %v6226_v45 = vpop.eup %6225 }
 0xc11   :  { %1217 = vrot.lane.b32.xlu0 %v6226_v45, %s6315_s4  ;;  %v6228_v47 = vpop.eup %6227 }
 0xc12   :  { %v1181_v48 = vadd.f32 1.0, %v6228_v47  ;;  %v6230_v50 = vpop.eup %6229 }
 0xc13   :  { %v1208_v51 = vadd.f32 1.0, %v6230_v50 }
 0xc14   :  { %6231 = vrcp.f32 %v1181_v48 }
 0xc15   :  { %6233 = vrcp.f32 %v1208_v51 }
 0xc1e   :  { %v6232_v53 = vpop.eup %6231 }
 0xc1f   :  { %v6234_v56 = vpop.eup %6233  ;;  %v1188_v62 = vmul.f32 %v6232_v53, %v1186_v61 }
 0xc20   :  { %v1215_v25 = vmul.f32 %v6234_v56, %v1213_v0 }
 0xc7d   :  { %v1191_v54 = vpop.permute.xlu1 %1190 }
 0xc7e   :  { %v1193_v55 = vmul.f32 %v6232_v53, %v1191_v54 }
 0xc80   :  { %1195 = vrot.lane.b32.xlu1 %v1193_v55, %s6314_s19 }
 0xc83   :  { %v1218_v57 = vpop.permute.xlu0 %1217 }
 0xc84   :  { %v1220_v59 = vmul.f32 %v6234_v56, %v1218_v57 }
 0xc86   :  { %1222 = vrot.lane.b32.xlu0 %v1220_v59, %s6314_s19 }
 0xcf2   :  { %v1196_v63 = vpop.permute.xlu1 %1195 }
 0xcf3   :  { %v6741_v17 = vadd.f32 %v1196_v63, %v1188_v62 }
 0xcf5   :  { %6235 = vtanh.f32 %v6741_v17  ;;  %v1399_v50 = vrot.slane %v6741_v17, 6 }
 0xcf8   :  { %v1223_v1 = vpop.permute.xlu0 %1222 }
 0xcf9   :  { %v6745_v2 = vadd.f32 %v1223_v1, %v1215_v25 }
 0xcfb   :  { %6237 = vtanh.f32 %v6745_v2  ;;  %v1426_v55 = vrot.slane %v6745_v2, 2 }
 0xcff   :  { %v6236_v3 = vpop.eup %6235 }
 0xd00   :  { %1201 = vrot.lane.b32.xlu1 %v6236_v3, %s6315_s4 }
 0xd05   :  { %v6238_v4 = vpop.eup %6237 }
 0xd06   :  { %1228 = vrot.lane.b32.xlu0 %v6238_v4, %s6315_s4 }
 0xd72   :  { %v1202_v9 = vpop.permute.xlu1 %1201 }
 0xd73   :  { %v6750_v10 = vmul.f32 %v6232_v53, %v1202_v9 }
 0xd75   :  { %1233 = vrot.lane.b32.xlu1 %v6750_v10, %s6314_s19 }
 0xd78   :  { %v1229_v12 = vpop.permute.xlu0 %1228 }
 0xd79   :  { %v6754_v14 = vmul.f32 %v6234_v56, %v1229_v12 }
 0xd7b   :  { %v1312_v15 = vrot.slane %v6754_v14, 6 }
 0xd7d   :  { %1313 = vrot.lane.b32.xlu0 %v1312_v15, %s6314_s19 }
 0xde7   :  { %v1234_v16 = vpop.permute.xlu1 %1233 }
 0xde8   :  { %5923 = vmatmul.mubr.msk.f32.vlgmr.msra.gmra.mrb[8].mxu0 %vm175_vm1, %v1234_v16 }
 0xde9   :  { %6108 = vmatpush3.bf16.msra.mxu0 %v6441_v28  ;;  %5944 = vmatprep.mubr.msk.f32.mxu0 %vm6312_vm0, %v6313_v8 }
 0xdea   :  { %6109 = vmatprep.subr.bf16.mxu0 %v6311_v7 }
 0xded   :  { %6111 = vmatpush3.bf16.msra.mxu0 %v6453_v32 }
 0xdee   :  { %6118 = vmatprep.subr.bf16.mxu0 %v6311_v7 }
 0xdef   :  { %v1314_v18 = vpop.permute.xlu0 %1313 }
 0xdf0   :  { %5934 = vmatmul.mubr.msk.f32.vlgmr.msra.gmra.mrb[16].mxu1 %vm175_vm1, %v1314_v18 }
 0xdf1   :  { %6114 = vmatpush3.bf16.msra.mxu1 %v6481_v43  ;;  %5955 = vmatprep.mubr.msk.f32.mxu1 %vm6312_vm0, %v6313_v8 }
 0xdf2   :  { %6115 = vmatprep.subr.bf16.mxu1 %v6311_v7 }
 0xdf5   :  { %6117 = vmatpush3.bf16.msra.mxu1 %v6505_v52 }
 0xdf6   :  { %6124 = vmatprep.subr.bf16.mxu1 %v6311_v7 }
 0xebb   :  { %v1303_v20 = vpop.f32.mrb[8].mxu0 }
 0xebc   :  { %v1308_v21 = vrot.slane %v1303_v20, 6  ;;  %v5924_v22 = vpop.f32.mrb[9].mxu0 }
 0xebe   :  { %v1310_v24 = vadd.f32 %v1308_v21, %v6573_v23 }
 0xec0   :  { %6239 = vtanh.f32 %v1310_v24  ;;  %v5697_v36 = vmul.f32 -1.442695, %v1310_v24 }
 0xec3   :  { %v1383_v26 = vpop.f32.mrb[16].mxu1 }
 0xec4   :  { %v1388_v27 = vrot.slane %v1383_v26, 4  ;;  %v5935_v30 = vpop.f32.mrb[17].mxu1 }
 0xec6   :  { %v1390_v33 = vadd.f32 %v1388_v27, %v6570_v19 }
 0xec8   :  { %6241 = vtanh.f32 %v1390_v33  ;;  %v5698_v37 = vmul.f32 -1.442695, %v1390_v33 }
 0xec9   :  { %6243 = vpow2.f32 %v5697_v36 }
 0xeca   :  { %v6240_v34 = vpop.eup %6239  ;;  %6245 = vpow2.f32 %v5698_v37 }
 0xecb   :  { %1403 = vrot.lane.b32.xlu1 %v6240_v34, %s6315_s4 }
 0xed2   :  { %v6242_v35 = vpop.eup %6241 }
 0xed3   :  { %1430 = vrot.lane.b32.xlu0 %v6242_v35, %s6315_s4  ;;  %v6244_v38 = vpop.eup %6243 }
 0xed4   :  { %v1394_v39 = vadd.f32 1.0, %v6244_v38  ;;  %v6246_v40 = vpop.eup %6245 }
 0xed5   :  { %v1421_v41 = vadd.f32 1.0, %v6246_v40 }
 0xed6   :  { %6247 = vrcp.f32 %v1394_v39 }
 0xed7   :  { %6249 = vrcp.f32 %v1421_v41 }
 0xee0   :  { %v6248_v44 = vpop.eup %6247 }
 0xee1   :  { %v6250_v46 = vpop.eup %6249  ;;  %v1401_v51 = vmul.f32 %v6248_v44, %v1399_v50 }
 0xee2   :  { %v1428_v56 = vmul.f32 %v6250_v46, %v1426_v55 }
 0xf3d   :  { %v1404_v45 = vpop.permute.xlu1 %1403 }
 0xf3e   :  { %v1406_v58 = vmul.f32 %v6248_v44, %v1404_v45 }
 0xf40   :  { %1408 = vrot.lane.b32.xlu1 %v1406_v58, %s6314_s19 }
 0xf45   :  { %v1431_v47 = vpop.permute.xlu0 %1430 }
 0xf46   :  { %v1433_v48 = vmul.f32 %v6250_v46, %v1431_v47 }
 0xf48   :  { %1435 = vrot.lane.b32.xlu0 %v1433_v48, %s6314_s19 }
 0xfb2   :  { %v1409_v53 = vpop.permute.xlu1 %1408 }
 0xfb3   :  { %v6779_v54 = vadd.f32 %v1409_v53, %v1401_v51 }
 0xfb5   :  { %6251 = vtanh.f32 %v6779_v54  ;;  %v1613_v37 = vrot.slane %v6779_v54, 6 }
 0xfba   :  { %v1436_v57 = vpop.permute.xlu0 %1435 }
 0xfbb   :  { %v6783_v59 = vadd.f32 %v1436_v57, %v1428_v56 }
 0xfbd   :  { %6253 = vtanh.f32 %v6783_v59  ;;  %v1640_v41 = vrot.slane %v6783_v59, 2 }
 0xfbf   :  { %v6252_v61 = vpop.eup %6251 }
 0xfc0   :  { %1414 = vrot.lane.b32.xlu1 %v6252_v61, %s6315_s4 }
 0xfc7   :  { %v6254_v62 = vpop.eup %6253 }
 0xfc8   :  { %1441 = vrot.lane.b32.xlu0 %v6254_v62, %s6315_s4 }
0x1032   :  { %v1415_v63 = vpop.permute.xlu1 %1414 }
0x1033   :  { %v6788_v17 = vmul.f32 %v6248_v44, %v1415_v63 }
0x1035   :  { %v1446_v0 = vrot.slane %v6788_v17, 2  ;;  %v1876_v51 = vsel %vm1870_vm2, %v6750_v10, %v6788_v17 }
0x1037   :  { %1447 = vrot.lane.b32.xlu1 %v1446_v0, %s6314_s19 }
0x103a   :  { %v1442_v25 = vpop.permute.xlu0 %1441 }
0x103b   :  { %v6792_v1 = vmul.f32 %v6250_v46, %v1442_v25 }
0x103d   :  { %v1526_v2 = vrot.slane %v6792_v1, 4 }
0x103f   :  { %1527 = vrot.lane.b32.xlu0 %v1526_v2, %s6314_s19 }
0x10a9   :  { %v1448_v3 = vpop.permute.xlu1 %1447 }
0x10aa   :  { %5945 = vmatmul.mubr.msk.f32.vlgmr.msra.gmra.mrb[10].mxu0 %vm175_vm1, %v1448_v3 }
0x10ab   :  { %6120 = vmatpush3.bf16.msra.mxu0 %v6441_v28  ;;  %5966 = vmatprep.mubr.msk.f32.mxu0 %vm6312_vm0, %v6313_v8 }
0x10ac   :  { %6121 = vmatprep.subr.bf16.mxu0 %v6311_v7 }
0x10af   :  { %6123 = vmatpush3.bf16.msra.mxu0 %v6453_v32 }
0x10b1   :  { %v1528_v4 = vpop.permute.xlu0 %1527 }
0x10b2   :  { %5956 = vmatmul.mubr.msk.f32.vlgmr.msra.gmra.mrb[18].mxu1 %vm175_vm1, %v1528_v4 }
0x10b3   :  { %6126 = vmatpush3.bf16.msra.mxu1 %v6481_v43  ;;  %5977 = vmatprep.mubr.msk.f32.mxu1 %vm6312_vm0, %v6313_v8 }
0x10b4   :  { %6127 = vmatprep.subr.bf16.mxu1 %v6311_v7 }
0x10b7   :  { %6129 = vmatpush3.bf16.msra.mxu1 %v6505_v52 }
0x117d   :  { %v1517_v28 = vpop.f32.mrb[10].mxu0 }
0x117e   :  { %v1522_v9 = vrot.slane %v1517_v28, 4  ;;  %v5946_v12 = vpop.f32.mrb[11].mxu0 }
0x1180   :  { %v1524_v15 = vadd.f32 %v1522_v9, %v6573_v23 }
0x1182   :  { %6255 = vtanh.f32 %v1524_v15  ;;  %v5701_v7 = vmul.f32 -1.442695, %v1524_v15 }
0x1185   :  { %v1597_v16 = vpop.f32.mrb[18].mxu1 }
0x1186   :  { %v1602_v32 = vrot.slane %v1597_v16, 6  ;;  %v5957_v18 = vpop.f32.mrb[19].mxu1 }
0x1188   :  { %v1604_v20 = vadd.f32 %v1602_v32, %v6570_v19 }
0x118a   :  { %6257 = vtanh.f32 %v1604_v20  ;;  %v5702_v52 = vmul.f32 -1.442695, %v1604_v20 }
0x118b   :  { %6259 = vpow2.f32 %v5701_v7 }
0x118c   :  { %v6256_v43 = vpop.eup %6255  ;;  %6261 = vpow2.f32 %v5702_v52 }
0x118d   :  { %1617 = vrot.lane.b32.xlu1 %v6256_v43, %s6315_s4 }
0x1194   :  { %v6258_v8 = vpop.eup %6257 }
0x1195   :  { %1644 = vrot.lane.b32.xlu0 %v6258_v8, %s6315_s4  ;;  %v6260_v21 = vpop.eup %6259 }
0x1196   :  { %v1608_v22 = vadd.f32 1.0, %v6260_v21  ;;  %v6262_v24 = vpop.eup %6261 }
0x1197   :  { %v1635_v26 = vadd.f32 1.0, %v6262_v24 }
0x1198   :  { %6263 = vrcp.f32 %v1608_v22 }
0x1199   :  { %6265 = vrcp.f32 %v1635_v26 }
0x11a2   :  { %v6264_v27 = vpop.eup %6263 }
0x11a3   :  { %v6266_v34 = vpop.eup %6265  ;;  %v1615_v38 = vmul.f32 %v6264_v27, %v1613_v37  ;;  %v1890_v37 = vld [vmem:[%s8684_s7 + $0x28] sm:$0xff] }
0x11a4   :  { %v1642_v44 = vmul.f32 %v6266_v34, %v1640_v41  ;;  %v1886_v41 = vld [vmem:[%s8684_s7 + $0x8] sm:$0xff] }
0x11ff   :  { %v1618_v30 = vpop.permute.xlu1 %1617 }
0x1200   :  { %v1620_v33 = vmul.f32 %v6264_v27, %v1618_v30 }
0x1202   :  { %1622 = vrot.lane.b32.xlu1 %v1620_v33, %s6314_s19  ;;  %v1882_v33 = vsel %vm1870_vm2, %v6716_v31, %v6677_v42  ;;  %v1892_v31 = vld [vmem:[%s8684_s7 + $0x38] sm:$0xff] }
0x1207   :  { %v1645_v35 = vpop.permute.xlu0 %1644 }
0x1208   :  { %v1647_v36 = vmul.f32 %v6266_v34, %v1645_v35  ;;  %v1883_v35 = vsel %vm1872_vm3, %v1882_v33, %v6636_v49  ;;  %v1891_v49 = vld [vmem:[%s8684_s7 + $0x30] sm:$0xff]  ;;  %v6921_v33 = vsub.s32 5, %v6555_v6 }
0x120a   :  { %1649 = vrot.lane.b32.xlu0 %v1647_v36, %s6314_s19  ;;  %v1889_v36 = vld [vmem:[%s8684_s7 + $0x20] sm:$0xff] }
0x1274   :  { %v1623_v39 = vpop.permute.xlu1 %1622 }
0x1275   :  { %v1625_v40 = vadd.f32 %v1623_v39, %v1615_v38  ;;  %v1884_v38 = vsel %vm1874_vm4, %v1883_v35, %v6598_v60  ;;  %v6130_v39 = vpack.c.bf16 %v1890_v37, %v1889_v36  ;;  %v1885_v60 = vld [vmem:[%s8684_s7] sm:$0xff]  ;;  %v6929_v37 = vsub.s32 7, %v6555_v6 }
0x1277   :  { %6267 = vtanh.f32 %v1625_v40  ;;  %v1824_v7 = vrot.slane %v1625_v40, 6  ;;  %6131 = vmatprep.subr.bf16.mxu0 %v6130_v39  ;;  %v6134_v40 = vpack.c.bf16 %v1892_v31, %v1891_v49 }
0x127c   :  { %v1650_v45 = vpop.permute.xlu0 %1649 }
0x127d   :  { %v1652_v58 = vadd.f32 %v1650_v45, %v1642_v44  ;;  %v6138_v44 = vpack.c.bf16 %v1886_v41, %v1885_v60 }
0x127f   :  { %6269 = vtanh.f32 %v1652_v58  ;;  %v1851_v24 = vrot.slane %v1652_v58, 2 }
0x1281   :  { %v6268_v46 = vpop.eup %6267 }
0x1282   :  { %1628 = vrot.lane.b32.xlu1 %v6268_v46, %s6315_s4 }
0x1289   :  { %v6270_v47 = vpop.eup %6269 }
0x128a   :  { %1655 = vrot.lane.b32.xlu0 %v6270_v47, %s6315_s4 }
0x12f4   :  { %v1629_v48 = vpop.permute.xlu1 %1628 }
0x12f5   :  { %v1631_v50 = vmul.f32 %v6264_v27, %v1629_v48 }
0x12f7   :  { %v1660_v53 = vrot.slane %v1631_v50, 4  ;;  %v6822_v54 = vsel %vm1872_vm3, %v1876_v51, %v1631_v50  ;;  %v6869_v50 = vand.u32 127, %v74_v5  ;;  %v6317_v5 = vmov -10000.0  }
0x12f9   :  { %1661 = vrot.lane.b32.xlu1 %v1660_v53, %s6314_s19  ;;  %v6316_v53 = vmov 1966171168   ;;  %vm2075_vm5 = vcmp.eq.s32.totalorder %v6869_v50, 6 }
0x12fc   :  { %v1656_v55 = vpop.permute.xlu0 %1655 }
0x12fd   :  { %v6825_v56 = vmul.f32 %v6266_v34, %v1656_v55  ;;  %v2079_v55 = vunpack.c.l.s4 %v6316_v53 }
0x12ff   :  { %v1740_v57 = vrot.slane %v6825_v56, 2 }
0x1301   :  { %1741 = vrot.lane.b32.xlu0 %v1740_v57, %s6314_s19 }
0x136b   :  { %v1662_v59 = vpop.permute.xlu1 %1661 }
0x136c   :  { %5967 = vmatmul.mubr.msk.f32.vlgmr.msra.gmra.mrb[12].mxu0 %vm175_vm1, %v1662_v59 }
0x136d   :  { %6133 = vmatpush3.bf16.msra.mxu0 %v6130_v39 }
0x136e   :  { %6135 = vmatprep.subr.bf16.mxu0 %v6134_v40 }
0x1371   :  { %6137 = vmatpush3.bf16.msra.mxu0 %v6134_v40 }
0x1372   :  { %6139 = vmatprep.subr.bf16.mxu0 %v6138_v44 }
0x1373   :  { %v1742_v61 = vpop.permute.xlu0 %1741 }
0x1374   :  { %5978 = vmatmul.mubr.msk.f32.vlgmr.msra.gmra.mrb[20].mxu1 %vm175_vm1, %v1742_v61 }
0x143f   :  { %v1731_v10 = vpop.f32.mrb[12].mxu0 }
0x1440   :  { %v1736_v62 = vrot.slane %v1731_v10, 2  ;;  %v5968_v63 = vpop.f32.mrb[13].mxu0  ;;  %v2076_v10 = vsel %vm2075_vm5, 0.0, %v6317_v5 }
0x1442   :  { %v1738_v17 = vadd.f32 %v1736_v62, %v6573_v23 }
0x1444   :  { %6271 = vtanh.f32 %v1738_v17  ;;  %v5705_v28 = vmul.f32 -1.442695, %v1738_v17 }
0x1447   :  { %v1811_v0 = vpop.f32.mrb[20].mxu1 }
0x1448   :  { %v1815_v25 = vadd.f32 %v1811_v0, %v6570_v19  ;;  %v5979_v2 = vpop.f32.mrb[21].mxu1 }
0x144a   :  { %6273 = vtanh.f32 %v1815_v25  ;;  %v5706_v9 = vmul.f32 -1.442695, %v1815_v25 }
0x144b   :  { %6275 = vpow2.f32 %v5705_v28 }
0x144c   :  { %6277 = vpow2.f32 %v5706_v9  ;;  %v1887_v9 = vld [vmem:[%s8684_s7 + $0x10] sm:$0xff] }
0x144e   :  { %v6272_v3 = vpop.eup %6271 }
0x144f   :  { %1828 = vrot.lane.b32.xlu1 %v6272_v3, %s6315_s4 }
0x1454   :  { %v6274_v4 = vpop.eup %6273 }
0x1455   :  { %1855 = vrot.lane.b32.xlu0 %v6274_v4, %s6315_s4  ;;  %v6276_v12 = vpop.eup %6275 }
0x1456   :  { %v1819_v15 = vadd.f32 1.0, %v6276_v12  ;;  %v6278_v16 = vpop.eup %6277  ;;  %v1888_v12 = vld [vmem:[%s8684_s7 + $0x18] sm:$0xff] }
0x1457   :  { %v1846_v23 = vadd.f32 1.0, %v6278_v16  ;;  %v6142_v16 = vpack.c.bf16 %v1888_v12, %v1887_v9 }
0x1458   :  { %6279 = vrcp.f32 %v1819_v15 }
0x1459   :  { %6281 = vrcp.f32 %v1846_v23 }
0x1462   :  { %v6280_v32 = vpop.eup %6279 }
0x1463   :  { %v6282_v20 = vpop.eup %6281  ;;  %v1826_v52 = vmul.f32 %v6280_v32, %v1824_v7  ;;  %v6318_v7 = vmov 0  }
0x1464   :  { %v1853_v26 = vmul.f32 %v6282_v20, %v1851_v24  ;;  %6158 = vset.pattern.permute.xlu1 %v6318_v7  ;;  %6157 = vset.pattern.permute.xlu0 %v6318_v7 }
0x14c1   :  { %v1829_v19 = vpop.permute.xlu1 %1828 }
0x14c2   :  { %v1831_v18 = vmul.f32 %v6280_v32, %v1829_v19 }
0x14c4   :  { %1833 = vrot.lane.b32.xlu1 %v1831_v18, %s6314_s19  ;;  %v6902_v18 = vsub.s32 3, %v6555_v6 }
0x14c7   :  { %v1856_v43 = vpop.permute.xlu0 %1855 }
0x14c8   :  { %v1858_v8 = vmul.f32 %v6282_v20, %v1856_v43 }
0x14ca   :  { %1860 = vrot.lane.b32.xlu0 %v1858_v8, %s6314_s19 }
0x1536   :  { %v1834_v21 = vpop.permute.xlu1 %1833 }
0x1537   :  { %v1836_v22 = vadd.f32 %v1834_v21, %v1826_v52  ;;  %v5711_v52 = vld [vmem:[%s8685_s8] ss:$0 sm:$0xff] }
0x1539   :  { %6283 = vtanh.f32 %v1836_v22 }
0x153c   :  { %v1861_v27 = vpop.permute.xlu0 %1860 }
0x153d   :  { %v1863_v30 = vadd.f32 %v1861_v27, %v1853_v26 }
0x153f   :  { %6285 = vtanh.f32 %v1863_v30 }
0x1543   :  { %v6284_v34 = vpop.eup %6283 }
0x1544   :  { %1839 = vrot.lane.b32.xlu1 %v6284_v34, %s6315_s4  ;;  %v6924_v34 = vsub.s32 4, %v6555_v6 }
0x1548   :  { %1897 = vrot.lane.b32.xlu1 %v1884_v38, %s6314_s19  ;;  %v6932_v38 = vsub.s32 6, %v6555_v6 }
0x1549   :  { %v6286_v42 = vpop.eup %6285 }
0x154a   :  { %1866 = vrot.lane.b32.xlu0 %v6286_v42, %s6315_s4 }
0x15b6   :  { %v1840_v45 = vpop.permute.xlu1 %1839 }
0x15b7   :  { %v1842_v58 = vmul.f32 %v6280_v32, %v1840_v45 }
0x15b9   :  { %v1878_v46 = vsel %vm1874_vm4, %v6822_v54, %v1842_v58  ;;  %v2080_v54 = vunpack.c.0.s8 %v2079_v55 }
0x15ba   :  { %1982 = vrot.lane.b32.xlu1 %v1878_v46, %s6314_s19  ;;  %v1898_v23 = vpop.permute.xlu1 %1897 }
0x15bb   :  { %v2083_v61 = vsub.s32 %v2080_v54, %v6555_v6 }
0x15bc   :  { %v1867_v47 = vpop.permute.xlu0 %1866 }
0x15bd   :  { %v1869_v48 = vmul.f32 %v6282_v20, %v1867_v47  ;;  %v6905_v20 = vsub.s32 2, %v6555_v6 }
0x15bf   :  { %v1879_v51 = vsel %vm1870_vm2, %v1869_v48, %v6825_v56  ;;  %v2084_v56 = vrot.slane %v2076_v10, %v2083_v61 }
0x15c0   :  { %v1880_v57 = vsel %vm1872_vm3, %v1879_v51, %v6792_v1 }
0x15c1   :  { %v1881_v59 = vsel %vm1874_vm4, %v1880_v57, %v6754_v14  ;;  %v2085_v62 = vcombine.high %v2084_v56, %v2084_v56  ;;  %v2072_v14 = vld [vmem:[%s8686_s9] sm:$0xff]  ;;  %v2092_v17 = vrot.slane %v2084_v56, %v2083_v61 }
0x15c2   :  { %1895 = vrot.lane.b32.xlu0 %v1881_v59, %s6314_s19  ;;  %v2149_v4 = vrot.slane %v2072_v14, %v6564_v13  ;;  %v2142_v28 = vrot.slane %v2072_v14, %v6558_v11  ;;  %v2163_v43 = vrot.slane %v2072_v14, %v6902_v18  ;;  %v2156_v8 = vrot.slane %v2072_v14, %v6905_v20 }
0x15c3   :  { %v2099_v63 = vrot.slane %v2085_v62, %v2083_v61  ;;  %v2103_v25 = vrot.slane %v2092_v17, %v6558_v11  ;;  %v2177_v35 = vrot.slane %v2072_v14, %v6921_v33  ;;  %v2170_v36 = vrot.slane %v2072_v14, %v6924_v34 }
0x15c4   :  { %v6935_v39 = vrot.slane %v2072_v14, %v6929_v37  ;;  %v2184_v42 = vrot.slane %v2072_v14, %v6932_v38 }
0x15c5   :  { %v2107_v1 = vrot.slane %v2099_v63, %v6558_v11  ;;  %v2110_v3 = vadd.f32 %v2103_v25, %v2072_v14 }
0x15c6   :  { %1980 = vrot.lane.b32.xlu0 %v6713_v29, %s6314_s19 }
0x15c7   :  { %v2111_v0 = vadd.f32 %v2107_v1, %v2072_v14  ;;  %v2113_v29 = vsel %vm2112_vm6, %v2110_v3, -inf }
0x15c9   :  { %v2116_v2 = vsel %vm2112_vm6, %v2111_v0, -inf }
0x15de   :  { %2117 = vmax.xlane.f32.xlu1 %v2116_v2 }
0x15e5   :  { %2114 = vmax.xlane.f32.xlu0 %v2113_v29 }
0x15ef   :  { %2151 = vbcast.lane.b32.xlu1 %v2149_v4, 256 }
0x15f3   :  { %2165 = vbcast.lane.b32.xlu1 %v2163_v43, 256  ;;  %v7021_v43 = vsub.s32 %v6869_v50, %v6555_v6 }
0x15fb   :  { %2144 = vbcast.lane.b32.xlu0 %v2142_v28, 256 }
0x15ff   :  { %2158 = vbcast.lane.b32.xlu0 %v2156_v8, 256 }
0x162c   :  { %v1983_v19 = vpop.permute.xlu1 %1982 }
0x1634   :  { %v1896_v15 = vpop.permute.xlu0 %1895 }
0x1635   :  { %5988 = vmatprep.mubr.msk.f32.mxu0 %vm175_vm1, %v1896_v15 }
0x1636   :  { %5989 = vmatmul.mubr.msk.f32.vlgmr.msra.gmra.mrb[14].mxu0 %vm175_vm1, %v1898_v23 }
0x1637   :  { %6141 = vmatpush3.bf16.msra.mxu0 %v6138_v44 }
0x1638   :  { %v1981_v32 = vpop.permute.xlu0 %1980  ;;  %6143 = vmatprep.subr.bf16.mxu0 %v6142_v16 }
0x1639   :  { %5999 = vmatprep.mubr.msk.f32.mxu0 %vm175_vm1, %v1981_v32 }
0x163b   :  { %6145 = vmatpush3.bf16.msra.mxu0 %v6142_v16 }
0x163e   :  { %6000 = vmatmul.mubr.msk.f32.vlgmr.msra.gmra.mrb[14].mxu0 %vm175_vm1, %v1983_v19 }
0x166b   :  { %v2118_v49 = vpop.xlane.xlu1 %2117 }
0x166f   :  { %v6939_v40 = vpop.permute.xlu1 %2151 }
0x1672   :  { %v2115_v31 = vpop.xlane.xlu0 %2114 }
0x1673   :  { %v6943_v41 = vpop.permute.xlu1 %2165 }
0x1676   :  { %v6941_v60 = vpop.permute.xlu0 %2144 }
0x167a   :  { %v6945_v44 = vpop.permute.xlu0 %2158 }
0x1711   :  { %v6001_v21 = vpop.f32.mrb[14].mxu0 }
0x1712   :  { %v6912_v22 = vadd.f32 %v6001_v21, %v5711_v52  ;;  %v2054_v24 = vpop.f32.mrb[15].mxu0 }
0x1713   :  { %v6914_v26 = vadd.f32 %v5711_v52, %v2054_v24 }
0x1715   :  { %v2130_v27 = vrot.slane %v6914_v26, %v6564_v13  ;;  %v2123_v30 = vrot.slane %v6914_v26, %v6558_v11 }
0x1717   :  { %2132 = vbcast.lane.b32.xlu1 %v2130_v27, 256  ;;  %2125 = vbcast.lane.b32.xlu0 %v2123_v30, 256 }
0x171b   :  { %2179 = vbcast.lane.b32.xlu1 %v2177_v35, 256  ;;  %2172 = vbcast.lane.b32.xlu0 %v2170_v36, 256 }
0x171f   :  { %2193 = vbcast.lane.b32.xlu1 %v6935_v39, 256  ;;  %2186 = vbcast.lane.b32.xlu0 %v2184_v42, 256 }
0x1789   :  { %v2133_v45 = vpop.permute.xlu1 %2132  ;;  %v2126_v58 = vpop.permute.xlu0 %2125 }
0x178a   :  { %v2136_v46 = vadd.f32 %v2126_v58, %v2115_v31  ;;  %v2137_v47 = vadd.f32 %v2133_v45, %v2118_v49 }
0x178c   :  { %v6948_v48 = vadd.f32 %v6939_v40, %v2136_v46  ;;  %v6951_v51 = vadd.f32 %v6941_v60, %v2136_v46  ;;  %v6956_v53 = vadd.f32 %v6941_v60, %v2137_v47  ;;  %v6959_v55 = vadd.f32 %v6939_v40, %v2137_v47 }
0x178d   :  { %v6964_v57 = vadd.f32 %v6945_v44, %v2136_v46  ;;  %v6967_v59 = vadd.f32 %v6945_v44, %v2137_v47  ;;  %v6972_v54 = vadd.f32 %v6943_v41, %v2136_v46  ;;  %v6975_v61 = vadd.f32 %v6943_v41, %v2137_v47  ;;  %v6977_v5 = vpop.permute.xlu0 %2172  ;;  %v6987_v62 = vpop.permute.xlu1 %2179 }
0x178e   :  { %8794 = vst [vmem:[#allocation5_spill] sm:$0xff] %v6948_v48  ;;  %8795 = vst [vmem:[#allocation6_spill] sm:$0xff] %v6951_v51  ;;  %2239 = vperm.xlu1 %6158, %v6948_v48   ;;  %2236 = vperm.xlu0 %6157, %v6951_v51   ;;  %v6982_v10 = vadd.f32 %v6977_v5, %v2137_v47  ;;  %v6985_v56 = vadd.f32 %v6977_v5, %v2136_v46 }
0x178f   :  { %8796 = vst [vmem:[#allocation7_spill] sm:$0xff] %v6956_v53  ;;  %8797 = vst [vmem:[#allocation8_spill] sm:$0xff] %v6959_v55  ;;  %v6992_v63 = vadd.f32 %v6987_v62, %v2137_v47  ;;  %v6995_v1 = vadd.f32 %v6987_v62, %v2136_v46 }
0x1790   :  { %8798 = vst [vmem:[#allocation9_spill] sm:$0xff] %v6964_v57  ;;  %8799 = vst [vmem:[#allocation10_spill] sm:$0xff] %v6967_v59 }
0x1791   :  { %8800 = vst [vmem:[#allocation11_spill] sm:$0xff] %v6972_v54  ;;  %8801 = vst [vmem:[#allocation12_spill] sm:$0xff] %v6975_v61  ;;  %v6997_v14 = vpop.permute.xlu0 %2186  ;;  %v7007_v25 = vpop.permute.xlu1 %2193 }
0x1792   :  { %2260 = vperm.xlu1 %6158, %v6956_v53   ;;  %2263 = vperm.xlu0 %6157, %v6959_v55   ;;  %8802 = vst [vmem:[#allocation13_spill] sm:$0xff] %v6982_v10  ;;  %8803 = vst [vmem:[#allocation14_spill] sm:$0xff] %v6985_v56  ;;  %v7002_v17 = vadd.f32 %v6997_v14, %v2137_v47  ;;  %v7005_v0 = vadd.f32 %v6997_v14, %v2136_v46 }
0x1793   :  { %8804 = vst [vmem:[#allocation15_spill] sm:$0xff] %v6992_v63  ;;  %8805 = vst [vmem:[#allocation16_spill] sm:$0xff] %v6995_v1  ;;  %v7012_v2 = vadd.f32 %v7007_v25, %v2137_v47  ;;  %v7015_v3 = vadd.f32 %v7007_v25, %v2136_v46 }
0x1794   :  { %8806 = vst [vmem:[#allocation17_spill] sm:$0xff] %v7002_v17  ;;  %8807 = vst [vmem:[#allocation18_spill] sm:$0xff] %v7005_v0 }
0x1795   :  { %8808 = vst [vmem:[#allocation19_spill] sm:$0xff] %v7012_v2  ;;  %8809 = vst [vmem:[#allocation20_spill] sm:$0xff] %v7015_v3 }
0x1796   :  { %2242 = vperm.xlu1 %6158, %v6964_v57   ;;  %2266 = vperm.xlu0 %6157, %v6967_v59  }
0x179a   :  { %2245 = vperm.xlu1 %6158, %v6972_v54   ;;  %2269 = vperm.xlu0 %6157, %v6975_v61  }
0x179e   :  { %2272 = vperm.xlu0 %6157, %v6982_v10   ;;  %2248 = vperm.xlu1 %6158, %v6985_v56  }
0x17a2   :  { %2275 = vperm.xlu0 %6157, %v6992_v63   ;;  %2251 = vperm.xlu1 %6158, %v6995_v1  }
0x17a6   :  { %2278 = vperm.xlu0 %6157, %v7002_v17   ;;  %2254 = vperm.xlu1 %6158, %v7005_v0  }
0x17aa   :  { %2281 = vperm.xlu0 %6157, %v7012_v2   ;;  %2257 = vperm.xlu1 %6158, %v7015_v3  }
0x180d   :  { %v2240_v29 = vpop.permute.xlu1 %2239  ;;  %v2237_v4 = vpop.permute.xlu0 %2236 }
0x180e   :  { %v2290_v52 = vrot.slane %v2240_v29, %v7021_v43  ;;  %v2286_v21 = vrot.slane %v2237_v4, %v7021_v43 }
0x1810   :  { %v2348_v58 = vsel %vm2347_vm7, %v2290_v52, %v2286_v21 }
0x1811   :  { %v2261_v28 = vpop.permute.xlu1 %2260  ;;  %v2264_v9 = vpop.permute.xlu0 %2263 }
0x1812   :  { %v2318_v24 = vrot.slane %v2261_v28, %v7021_v43  ;;  %v2322_v27 = vrot.slane %v2264_v9, %v7021_v43 }
0x1814   :  { %v2361_v46 = vsel %vm2347_vm7, %v2322_v27, %v2318_v24 }
0x1815   :  { %v2243_v12 = vpop.permute.xlu1 %2242  ;;  %v2267_v15 = vpop.permute.xlu0 %2266 }
0x1816   :  { %v2294_v30 = vrot.slane %v2243_v12, %v7021_v43  ;;  %v2326_v35 = vrot.slane %v2267_v15, %v7021_v43 }
0x1818   :  { %v2350_v4 = vsel %vm2349_vm8, %v2294_v30, %v2348_v58  ;;  %v2362_v28 = vsel %vm2349_vm8, %v2326_v35, %v2361_v46 }
0x1819   :  { %v2246_v16 = vpop.permute.xlu1 %2245  ;;  %v2270_v23 = vpop.permute.xlu0 %2269 }
0x181a   :  { %v2298_v6 = vrot.slane %v2246_v16, %v7021_v43  ;;  %v2330_v36 = vrot.slane %v2270_v23, %v7021_v43 }
0x181c   :  { %v2352_v15 = vsel %vm2351_vm9, %v2298_v6, %v2350_v4  ;;  %v2363_v16 = vsel %vm2351_vm9, %v2330_v36, %v2362_v28 }
0x181d   :  { %v2249_v32 = vpop.permute.xlu1 %2248  ;;  %v2273_v19 = vpop.permute.xlu0 %2272 }
0x181e   :  { %v2302_v42 = vrot.slane %v2249_v32, %v7021_v43  ;;  %v2334_v49 = vrot.slane %v2273_v19, %v7021_v43 }
0x1820   :  { %v2354_v23 = vsel %vm2353_vm10, %v2302_v42, %v2352_v15  ;;  %v2364_v32 = vsel %vm2353_vm10, %v2334_v49, %v2363_v16  ;;  %v2659_v49 = vrot.slane %v6914_v26, %v6902_v18 }
0x1821   :  { %v2252_v8 = vpop.permute.xlu1 %2251  ;;  %v2276_v7 = vpop.permute.xlu0 %2275 }
0x1822   :  { %v2306_v47 = vrot.slane %v2252_v8, %v7021_v43  ;;  %v2338_v29 = vrot.slane %v2276_v7, %v7021_v43 }
0x1824   :  { %v2356_v21 = vsel %vm2355_vm11, %v2306_v47, %v2354_v23  ;;  %v2365_v24 = vsel %vm2355_vm11, %v2338_v29, %v2364_v32 }
0x1825   :  { %v2255_v31 = vpop.permute.xlu1 %2254  ;;  %v2279_v45 = vpop.permute.xlu0 %2278 }
0x1826   :  { %v2310_v9 = vrot.slane %v2255_v31, %v7021_v43  ;;  %v2342_v12 = vrot.slane %v2279_v45, %v7021_v43  ;;  %v2652_v31 = vrot.slane %v6914_v26, %v6905_v20 }
0x1828   :  { %v2358_v27 = vsel %vm2357_vm12, %v2310_v9, %v2356_v21  ;;  %v2366_v30 = vsel %vm2357_vm12, %v2342_v12, %v2365_v24 }
0x1829   :  { %v2258_v19 = vpop.permute.xlu1 %2257  ;;  %v2282_v8 = vpop.permute.xlu0 %2281 }
0x182a   :  { %v2314_v7 = vrot.slane %v2258_v19, %v7021_v43  ;;  %v2346_v52 = vrot.slane %v2282_v8, %v7021_v43 }
0x182c   :  { %v2360_v35 = vsel %vm2359_vm13, %v2314_v7, %v2358_v27  ;;  %v2367_v6 = vsel %vm2359_vm13, %v2346_v52, %v2366_v30 }
0x182d   :  { %v2370_v36 = vsel %vm2112_vm6, %v2360_v35, -inf  ;;  %v2373_v42 = vsel %vm2112_vm6, %v2367_v6, -inf }
0x182e   :  { %2371 = vmax.xlane.f32.xlu1 %v2370_v36  ;;  %2374 = vmax.xlane.f32.xlu0 %v2373_v42 }
0x183f   :  { %2661 = vbcast.lane.b32.xlu1 %v2659_v49, 256 }
0x1844   :  { %2654 = vbcast.lane.b32.xlu0 %v2652_v31, 256 }
0x18bb   :  { %v7059_v45 = vpop.xlane.xlu1 %2371  ;;  %v7061_v58 = vpop.xlane.xlu0 %2374 }
0x18bc   :  { %8810 = vst [vmem:[#allocation21_spill] sm:$0xff] %v7059_v45  ;;  %8811 = vst [vmem:[#allocation22_spill] sm:$0xff] %v7061_v58 }
0x18bf   :  { %v2662_v46 = vpop.permute.xlu1 %2661  ;;  %v2655_v47 = vpop.permute.xlu0 %2654 }
0x18c0   :  { %v2665_v29 = vadd.f32 %v2655_v47, %v7059_v45  ;;  %v2666_v4 = vadd.f32 %v2662_v46, %v7061_v58 }
0x18c2   :  { %v7066_v28 = vadd.f32 %v2665_v29, %v6939_v40  ;;  %v7069_v9 = vadd.f32 %v2665_v29, %v6941_v60  ;;  %v7074_v12 = vadd.f32 %v2666_v4, %v6939_v40  ;;  %v7077_v15 = vadd.f32 %v2666_v4, %v6941_v60 }
0x18c3   :  { %v7082_v16 = vadd.f32 %v2666_v4, %v6945_v44  ;;  %v7085_v23 = vadd.f32 %v2665_v29, %v6945_v44  ;;  %v7090_v32 = vadd.f32 %v2666_v4, %v6943_v41  ;;  %v7093_v19 = vadd.f32 %v2665_v29, %v6943_v41 }
0x18c4   :  { %8812 = vst [vmem:[#allocation23_spill] sm:$0xff] %v7066_v28  ;;  %8813 = vst [vmem:[#allocation24_spill] sm:$0xff] %v7069_v9  ;;  %2703 = vperm.xlu0 %6157, %v7066_v28   ;;  %2700 = vperm.xlu1 %6158, %v7069_v9   ;;  %v7098_v8 = vadd.f32 %v2666_v4, %v6977_v5  ;;  %v7101_v7 = vadd.f32 %v2665_v29, %v6977_v5 }
0x18c5   :  { %8814 = vst [vmem:[#allocation25_spill] sm:$0xff] %v7074_v12  ;;  %8815 = vst [vmem:[#allocation26_spill] sm:$0xff] %v7077_v15  ;;  %v7106_v52 = vadd.f32 %v2666_v4, %v6987_v62  ;;  %v7109_v21 = vadd.f32 %v2665_v29, %v6987_v62  ;;  %v7114_v24 = vadd.f32 %v2666_v4, %v6997_v14 }
0x18c6   :  { %8816 = vst [vmem:[#allocation27_spill] sm:$0xff] %v7082_v16  ;;  %8817 = vst [vmem:[#allocation28_spill] sm:$0xff] %v7085_v23  ;;  %v7117_v27 = vadd.f32 %v2665_v29, %v6997_v14  ;;  %v7122_v30 = vadd.f32 %v2666_v4, %v7007_v25  ;;  %v7125_v35 = vadd.f32 %v2665_v29, %v7007_v25 }
0x18c7   :  { %8818 = vst [vmem:[#allocation29_spill] sm:$0xff] %v7090_v32  ;;  %8819 = vst [vmem:[#allocation30_spill] sm:$0xff] %v7093_v19 }
0x18c8   :  { %2727 = vperm.xlu0 %6157, %v7074_v12   ;;  %2724 = vperm.xlu1 %6158, %v7077_v15   ;;  %8820 = vst [vmem:[#allocation31_spill] sm:$0xff] %v7098_v8  ;;  %8821 = vst [vmem:[#allocation32_spill] sm:$0xff] %v7101_v7 }
0x18c9   :  { %8822 = vst [vmem:[#allocation33_spill] sm:$0xff] %v7106_v52  ;;  %8823 = vst [vmem:[#allocation34_spill] sm:$0xff] %v7109_v21 }
0x18ca   :  { %8824 = vst [vmem:[#allocation35_spill] sm:$0xff] %v7114_v24  ;;  %8825 = vst [vmem:[#allocation36_spill] sm:$0xff] %v7117_v27 }
0x18cb   :  { %8826 = vst [vmem:[#allocation37_spill] sm:$0xff] %v7122_v30  ;;  %8827 = vst [vmem:[#allocation38_spill] sm:$0xff] %v7125_v35 }
0x18cc   :  { %2730 = vperm.xlu0 %6157, %v7082_v16   ;;  %2706 = vperm.xlu1 %6158, %v7085_v23  }
0x18d0   :  { %2733 = vperm.xlu0 %6157, %v7090_v32   ;;  %2709 = vperm.xlu1 %6158, %v7093_v19  }
0x18d4   :  { %2736 = vperm.xlu0 %6157, %v7098_v8   ;;  %2712 = vperm.xlu1 %6158, %v7101_v7  }
0x18d8   :  { %2739 = vperm.xlu0 %6157, %v7106_v52   ;;  %2715 = vperm.xlu1 %6158, %v7109_v21  }
0x18dc   :  { %2742 = vperm.xlu0 %6157, %v7114_v24   ;;  %2718 = vperm.xlu1 %6158, %v7117_v27  }
0x18e0   :  { %2745 = vperm.xlu0 %6157, %v7122_v30   ;;  %2721 = vperm.xlu1 %6158, %v7125_v35  }
0x1943   :  { %v2704_v6 = vpop.permute.xlu0 %2703  ;;  %v2701_v36 = vpop.permute.xlu1 %2700 }
0x1944   :  { %v2754_v54 = vrot.slane %v2704_v6, %v7021_v43  ;;  %v2750_v29 = vrot.slane %v2701_v36, %v7021_v43 }
0x1946   :  { %v2811_v36 = vsel %vm2347_vm7, %v2754_v54, %v2750_v29 }
0x1947   :  { %v2728_v42 = vpop.permute.xlu0 %2727  ;;  %v2725_v49 = vpop.permute.xlu1 %2724 }
0x1948   :  { %v2786_v57 = vrot.slane %v2728_v42, %v7021_v43  ;;  %v2782_v51 = vrot.slane %v2725_v49, %v7021_v43 }
0x194a   :  { %v2818_v42 = vsel %vm2347_vm7, %v2786_v57, %v2782_v51 }
0x194b   :  { %v2731_v31 = vpop.permute.xlu0 %2730  ;;  %v2707_v46 = vpop.permute.xlu1 %2706 }
0x194c   :  { %v2790_v35 = vrot.slane %v2731_v31, %v7021_v43  ;;  %v2758_v27 = vrot.slane %v2707_v46, %v7021_v43 }
0x194e   :  { %v2819_v46 = vsel %vm2349_vm8, %v2790_v35, %v2818_v42 }
0x194f   :  { %v2734_v47 = vpop.permute.xlu0 %2733  ;;  %v2710_v3 = vpop.permute.xlu1 %2709 }
0x1950   :  { %v2794_v21 = vrot.slane %v2734_v47, %v7021_v43  ;;  %v2762_v7 = vrot.slane %v2710_v3, %v7021_v43  ;;  %v2812_v47 = vsel %vm2349_vm8, %v2758_v27, %v2811_v36  ;;  %v3106_v36 = vrot.slane %v6914_v26, %v6924_v34 }
0x1952   :  { %v2813_v17 = vsel %vm2351_vm9, %v2762_v7, %v2812_v47 }
0x1953   :  { %v2737_v0 = vpop.permute.xlu0 %2736  ;;  %v2713_v1 = vpop.permute.xlu1 %2712 }
0x1954   :  { %v2798_v19 = vrot.slane %v2737_v0, %v7021_v43  ;;  %v2766_v23 = vrot.slane %v2713_v1, %v7021_v43  ;;  %v2820_v1 = vsel %vm2351_vm9, %v2794_v21, %v2819_v46 }
0x1956   :  { %v2821_v54 = vsel %vm2353_vm10, %v2798_v19, %v2820_v1  ;;  %v2814_v51 = vsel %vm2353_vm10, %v2766_v23, %v2813_v17 }
0x1957   :  { %v2740_v56 = vpop.permute.xlu0 %2739  ;;  %v2716_v4 = vpop.permute.xlu1 %2715 }
0x1958   :  { %v2802_v49 = vrot.slane %v2740_v56, %v7021_v43  ;;  %v2770_v31 = vrot.slane %v2716_v4, %v7021_v43 }
0x195a   :  { %v2822_v4 = vsel %vm2355_vm11, %v2802_v49, %v2821_v54  ;;  %v2815_v35 = vsel %vm2355_vm11, %v2770_v31, %v2814_v51 }
0x195b   :  { %v2743_v2 = vpop.permute.xlu0 %2742  ;;  %v2719_v6 = vpop.permute.xlu1 %2718 }
0x195c   :  { %v2806_v3 = vrot.slane %v2743_v2, %v7021_v43  ;;  %v2774_v0 = vrot.slane %v2719_v6, %v7021_v43  ;;  %v3113_v6 = vrot.slane %v6914_v26, %v6921_v33 }
0x195e   :  { %v2823_v29 = vsel %vm2357_vm12, %v2806_v3, %v2822_v4  ;;  %v2816_v21 = vsel %vm2357_vm12, %v2774_v0, %v2815_v35 }
0x195f   :  { %v2746_v57 = vpop.permute.xlu0 %2745  ;;  %v2722_v56 = vpop.permute.xlu1 %2721 }
0x1960   :  { %v2810_v27 = vrot.slane %v2746_v57, %v7021_v43  ;;  %v2778_v2 = vrot.slane %v2722_v56, %v7021_v43 }
0x1962   :  { %v2824_v7 = vsel %vm2359_vm13, %v2810_v27, %v2823_v29  ;;  %v2817_v19 = vsel %vm2359_vm13, %v2778_v2, %v2816_v21 }
0x1963   :  { %v2830_v17 = vsel %vm2112_vm6, %v2824_v7, -inf  ;;  %v2827_v23 = vsel %vm2112_vm6, %v2817_v19, -inf }
0x1964   :  { %2831 = vmax.xlane.f32.xlu0 %v2830_v17  ;;  %2828 = vmax.xlane.f32.xlu1 %v2827_v23 }
0x1975   :  { %3115 = vbcast.lane.b32.xlu1 %v3113_v6, 256 }
0x197a   :  { %3108 = vbcast.lane.b32.xlu0 %v3106_v36, 256 }
0x19f1   :  { %v7165_v42 = vpop.xlane.xlu0 %2831  ;;  %v7167_v49 = vpop.xlane.xlu1 %2828 }
0x19f2   :  { %8828 = vst [vmem:[#allocation39_spill] sm:$0xff] %v7165_v42  ;;  %8829 = vst [vmem:[#allocation40_spill] sm:$0xff] %v7167_v49 }
0x19f5   :  { %v3109_v31 = vpop.permute.xlu0 %3108  ;;  %v3116_v46 = vpop.permute.xlu1 %3115 }
0x19f6   :  { %v3119_v47 = vadd.f32 %v3109_v31, %v7167_v49  ;;  %v3120_v3 = vadd.f32 %v3116_v46, %v7165_v42 }
0x19f8   :  { %v7172_v0 = vadd.f32 %v3119_v47, %v6939_v40  ;;  %v7175_v1 = vadd.f32 %v3119_v47, %v6941_v60  ;;  %v7180_v54 = vadd.f32 %v3120_v3, %v6939_v40  ;;  %v7183_v51 = vadd.f32 %v3120_v3, %v6941_v60 }
0x19f9   :  { %v7188_v57 = vadd.f32 %v3120_v3, %v6945_v44  ;;  %v7191_v56 = vadd.f32 %v3119_v47, %v6945_v44  ;;  %v7196_v4 = vadd.f32 %v3120_v3, %v6943_v41  ;;  %v7199_v35 = vadd.f32 %v3119_v47, %v6943_v41 }
0x19fa   :  { %8830 = vst [vmem:[#allocation41_spill] sm:$0xff] %v7172_v0  ;;  %8831 = vst [vmem:[#allocation42_spill] sm:$0xff] %v7175_v1  ;;  %3157 = vperm.xlu0 %6157, %v7172_v0   ;;  %3154 = vperm.xlu1 %6158, %v7175_v1   ;;  %v7204_v27 = vadd.f32 %v3120_v3, %v6977_v5  ;;  %v7207_v2 = vadd.f32 %v3119_v47, %v6977_v5 }
0x19fb   :  { %8832 = vst [vmem:[#allocation43_spill] sm:$0xff] %v7180_v54  ;;  %8833 = vst [vmem:[#allocation44_spill] sm:$0xff] %v7183_v51  ;;  %v7212_v29 = vadd.f32 %v3120_v3, %v6987_v62  ;;  %v7215_v21 = vadd.f32 %v3119_v47, %v6987_v62  ;;  %v7220_v7 = vadd.f32 %v3120_v3, %v6997_v14 }
0x19fc   :  { %8834 = vst [vmem:[#allocation45_spill] sm:$0xff] %v7188_v57  ;;  %8835 = vst [vmem:[#allocation46_spill] sm:$0xff] %v7191_v56  ;;  %v7223_v19 = vadd.f32 %v3119_v47, %v6997_v14  ;;  %v7228_v17 = vadd.f32 %v3120_v3, %v7007_v25  ;;  %v7231_v23 = vadd.f32 %v3119_v47, %v7007_v25 }
0x19fd   :  { %8836 = vst [vmem:[#allocation47_spill] sm:$0xff] %v7196_v4  ;;  %8837 = vst [vmem:[#allocation48_spill] sm:$0xff] %v7199_v35 }
0x19fe   :  { %3181 = vperm.xlu0 %6157, %v7180_v54   ;;  %3178 = vperm.xlu1 %6158, %v7183_v51   ;;  %8838 = vst [vmem:[#allocation49_spill] sm:$0xff] %v7204_v27  ;;  %8839 = vst [vmem:[#allocation50_spill] sm:$0xff] %v7207_v2 }
0x19ff   :  { %8840 = vst [vmem:[#allocation51_spill] sm:$0xff] %v7212_v29  ;;  %8841 = vst [vmem:[#allocation52_spill] sm:$0xff] %v7215_v21 }
0x1a00   :  { %8842 = vst [vmem:[#allocation53_spill] sm:$0xff] %v7220_v7  ;;  %8843 = vst [vmem:[#allocation54_spill] sm:$0xff] %v7223_v19 }
0x1a01   :  { %8844 = vst [vmem:[#allocation55_spill] sm:$0xff] %v7228_v17  ;;  %8845 = vst [vmem:[#allocation56_spill] sm:$0xff] %v7231_v23 }
0x1a02   :  { %3184 = vperm.xlu0 %6157, %v7188_v57   ;;  %3160 = vperm.xlu1 %6158, %v7191_v56  }
0x1a06   :  { %3187 = vperm.xlu0 %6157, %v7196_v4   ;;  %3163 = vperm.xlu1 %6158, %v7199_v35  }
0x1a0a   :  { %3190 = vperm.xlu0 %6157, %v7204_v27   ;;  %3166 = vperm.xlu1 %6158, %v7207_v2  }
0x1a0e   :  { %3193 = vperm.xlu0 %6157, %v7212_v29   ;;  %3169 = vperm.xlu1 %6158, %v7215_v21  }
0x1a12   :  { %3196 = vperm.xlu0 %6157, %v7220_v7   ;;  %3172 = vperm.xlu1 %6158, %v7223_v19  }
0x1a16   :  { %3199 = vperm.xlu0 %6157, %v7228_v17   ;;  %3175 = vperm.xlu1 %6158, %v7231_v23  }
0x1a79   :  { %v3158_v6 = vpop.permute.xlu0 %3157  ;;  %v3155_v36 = vpop.permute.xlu1 %3154 }
0x1a7a   :  { %v3208_v48 = vrot.slane %v3158_v6, %v7021_v43  ;;  %v3204_v47 = vrot.slane %v3155_v36, %v7021_v43 }
0x1a7c   :  { %v3265_v36 = vsel %vm2347_vm7, %v3208_v48, %v3204_v47 }
0x1a7d   :  { %v3182_v31 = vpop.permute.xlu0 %3181  ;;  %v3179_v46 = vpop.permute.xlu1 %3178 }
0x1a7e   :  { %v3240_v45 = vrot.slane %v3182_v31, %v7021_v43  ;;  %v3236_v9 = vrot.slane %v3179_v46, %v7021_v43 }
0x1a80   :  { %v3272_v31 = vsel %vm2347_vm7, %v3240_v45, %v3236_v9 }
0x1a81   :  { %v3185_v63 = vpop.permute.xlu0 %3184  ;;  %v3161_v10 = vpop.permute.xlu1 %3160 }
0x1a82   :  { %v3244_v30 = vrot.slane %v3185_v63, %v7021_v43  ;;  %v3212_v24 = vrot.slane %v3161_v10, %v7021_v43 }
0x1a84   :  { %v3273_v10 = vsel %vm2349_vm8, %v3244_v30, %v3272_v31 }
0x1a85   :  { %v3188_v61 = vpop.permute.xlu0 %3187  ;;  %v3164_v59 = vpop.permute.xlu1 %3163 }
0x1a86   :  { %v3248_v52 = vrot.slane %v3188_v61, %v7021_v43  ;;  %v3216_v8 = vrot.slane %v3164_v59, %v7021_v43  ;;  %v3266_v61 = vsel %vm2349_vm8, %v3212_v24, %v3265_v36  ;;  %v3560_v36 = vrot.slane %v6914_v26, %v6932_v38 }
0x1a88   :  { %v3267_v12 = vsel %vm2351_vm9, %v3216_v8, %v3266_v61 }
0x1a89   :  { %v3191_v55 = vpop.permute.xlu0 %3190  ;;  %v3167_v53 = vpop.permute.xlu1 %3166 }
0x1a8a   :  { %v3252_v23 = vrot.slane %v3191_v55, %v7021_v43  ;;  %v3220_v32 = vrot.slane %v3167_v53, %v7021_v43  ;;  %v3274_v53 = vsel %vm2351_vm9, %v3248_v52, %v3273_v10 }
0x1a8c   :  { %v3275_v48 = vsel %vm2353_vm10, %v3252_v23, %v3274_v53  ;;  %v3268_v45 = vsel %vm2353_vm10, %v3220_v32, %v3267_v12 }
0x1a8d   :  { %v3194_v58 = vpop.permute.xlu0 %3193  ;;  %v3170_v3 = vpop.permute.xlu1 %3169 }
0x1a8e   :  { %v3256_v46 = vrot.slane %v3194_v58, %v7021_v43  ;;  %v3224_v63 = vrot.slane %v3170_v3, %v7021_v43 }
0x1a90   :  { %v3276_v3 = vsel %vm2355_vm11, %v3256_v46, %v3275_v48  ;;  %v3269_v30 = vsel %vm2355_vm11, %v3224_v63, %v3268_v45 }
0x1a91   :  { %v3197_v16 = vpop.permute.xlu0 %3196  ;;  %v3173_v6 = vpop.permute.xlu1 %3172 }
0x1a92   :  { %v3260_v59 = vrot.slane %v3197_v16, %v7021_v43  ;;  %v3228_v55 = vrot.slane %v3173_v6, %v7021_v43  ;;  %v3567_v6 = vrot.slane %v6914_v26, %v6929_v37 }
0x1a94   :  { %v3277_v47 = vsel %vm2357_vm12, %v3260_v59, %v3276_v3  ;;  %v3270_v52 = vsel %vm2357_vm12, %v3228_v55, %v3269_v30 }
0x1a95   :  { %v3200_v9 = vpop.permute.xlu0 %3199  ;;  %v3176_v58 = vpop.permute.xlu1 %3175 }
0x1a96   :  { %v3264_v24 = vrot.slane %v3200_v9, %v7021_v43  ;;  %v3232_v16 = vrot.slane %v3176_v58, %v7021_v43 }
0x1a98   :  { %v3278_v8 = vsel %vm2359_vm13, %v3264_v24, %v3277_v47  ;;  %v3271_v23 = vsel %vm2359_vm13, %v3232_v16, %v3270_v52 }
0x1a99   :  { %v3284_v12 = vsel %vm2112_vm6, %v3278_v8, -inf  ;;  %v3281_v32 = vsel %vm2112_vm6, %v3271_v23, -inf }
0x1a9a   :  { %3285 = vmax.xlane.f32.xlu0 %v3284_v12  ;;  %3282 = vmax.xlane.f32.xlu1 %v3281_v32 }
0x1aab   :  { %3569 = vbcast.lane.b32.xlu1 %v3567_v6, 256 }
0x1ab0   :  { %3562 = vbcast.lane.b32.xlu0 %v3560_v36, 256 }
0x1b27   :  { %v7271_v31 = vpop.xlane.xlu0 %3285  ;;  %v7273_v46 = vpop.xlane.xlu1 %3282 }
0x1b28   :  { %8846 = vst [vmem:[#allocation57_spill] sm:$0xff] %v7271_v31  ;;  %8847 = vst [vmem:[#allocation58_spill] sm:$0xff] %v7273_v46 }
0x1b2b   :  { %v3563_v63 = vpop.permute.xlu0 %3562  ;;  %v3570_v10 = vpop.permute.xlu1 %3569 }
0x1b2c   :  { %v3573_v61 = vadd.f32 %v3563_v63, %v7273_v46  ;;  %v3574_v59 = vadd.f32 %v3570_v10, %v7271_v31 }
0x1b2e   :  { %v7278_v55 = vadd.f32 %v3573_v61, %v6939_v40  ;;  %v7281_v53 = vadd.f32 %v3573_v61, %v6941_v60  ;;  %v7286_v26 = vadd.f32 %v3574_v59, %v6939_v40  ;;  %v7289_v48 = vadd.f32 %v3574_v59, %v6941_v60 }
0x1b2f   :  { %v7294_v45 = vadd.f32 %v3574_v59, %v6945_v44  ;;  %v7297_v9 = vadd.f32 %v3573_v61, %v6945_v44  ;;  %v7302_v58 = vadd.f32 %v3574_v59, %v6943_v41  ;;  %v7305_v3 = vadd.f32 %v3573_v61, %v6943_v41 }
0x1b30   :  { %8848 = vst [vmem:[#allocation59_spill] sm:$0xff] %v7278_v55  ;;  %8849 = vst [vmem:[#allocation60_spill] sm:$0xff] %v7281_v53  ;;  %3611 = vperm.xlu0 %6157, %v7278_v55   ;;  %3608 = vperm.xlu1 %6158, %v7281_v53   ;;  %v7310_v30 = vadd.f32 %v3574_v59, %v6977_v5  ;;  %v7313_v24 = vadd.f32 %v3573_v61, %v6977_v5 }
0x1b31   :  { %8850 = vst [vmem:[#allocation61_spill] sm:$0xff] %v7286_v26  ;;  %8851 = vst [vmem:[#allocation62_spill] sm:$0xff] %v7289_v48  ;;  %v7318_v16 = vadd.f32 %v3574_v59, %v6987_v62  ;;  %v7321_v47 = vadd.f32 %v3573_v61, %v6987_v62  ;;  %v7326_v52 = vadd.f32 %v3574_v59, %v6997_v14 }
0x1b32   :  { %8852 = vst [vmem:[#allocation63_spill] sm:$0xff] %v7294_v45  ;;  %8853 = vst [vmem:[#allocation64_spill] sm:$0xff] %v7297_v9  ;;  %v7329_v8 = vadd.f32 %v3573_v61, %v6997_v14  ;;  %v7334_v23 = vadd.f32 %v3574_v59, %v7007_v25  ;;  %v7337_v12 = vadd.f32 %v3573_v61, %v7007_v25 }
0x1b33   :  { %8854 = vst [vmem:[#allocation65_spill] sm:$0xff] %v7302_v58  ;;  %8855 = vst [vmem:[#allocation66_spill] sm:$0xff] %v7305_v3 }
0x1b34   :  { %3635 = vperm.xlu0 %6157, %v7286_v26   ;;  %3632 = vperm.xlu1 %6158, %v7289_v48   ;;  %8856 = vst [vmem:[#allocation67_spill] sm:$0xff] %v7310_v30  ;;  %8857 = vst [vmem:[#allocation68_spill] sm:$0xff] %v7313_v24 }
0x1b35   :  { %8858 = vst [vmem:[#allocation69_spill] sm:$0xff] %v7318_v16  ;;  %8859 = vst [vmem:[#allocation70_spill] sm:$0xff] %v7321_v47 }
0x1b36   :  { %8860 = vst [vmem:[#allocation71_spill] sm:$0xff] %v7326_v52  ;;  %8861 = vst [vmem:[#allocation72_spill] sm:$0xff] %v7329_v8 }
0x1b37   :  { %8862 = vst [vmem:[#allocation73_spill] sm:$0xff] %v7334_v23  ;;  %8863 = vst [vmem:[#allocation74_spill] sm:$0xff] %v7337_v12 }
0x1b38   :  { %3638 = vperm.xlu0 %6157, %v7294_v45   ;;  %3614 = vperm.xlu1 %6158, %v7297_v9  }
0x1b3c   :  { %3641 = vperm.xlu0 %6157, %v7302_v58   ;;  %3617 = vperm.xlu1 %6158, %v7305_v3  }
0x1b40   :  { %3644 = vperm.xlu0 %6157, %v7310_v30   ;;  %3620 = vperm.xlu1 %6158, %v7313_v24  }
0x1b44   :  { %3647 = vperm.xlu0 %6157, %v7318_v16   ;;  %3623 = vperm.xlu1 %6158, %v7321_v47  }
0x1b48   :  { %3650 = vperm.xlu0 %6157, %v7326_v52   ;;  %3626 = vperm.xlu1 %6158, %v7329_v8  }
0x1b4c   :  { %3653 = vperm.xlu0 %6157, %v7334_v23   ;;  %3629 = vperm.xlu1 %6158, %v7337_v12  }
0x1baf   :  { %v3612_v32 = vpop.permute.xlu0 %3611  ;;  %v3609_v6 = vpop.permute.xlu1 %3608 }
0x1bb0   :  { %v3662_v7 = vrot.slane %v3612_v32, %v7021_v43  ;;  %v3658_v61 = vrot.slane %v3609_v6, %v7021_v43 }
0x1bb2   :  { %v3719_v6 = vsel %vm2347_vm7, %v3662_v7, %v3658_v61 }
0x1bb3   :  { %v3636_v36 = vpop.permute.xlu0 %3635  ;;  %v3633_v63 = vpop.permute.xlu1 %3632 }
0x1bb4   :  { %v3694_v29 = vrot.slane %v3636_v36, %v7021_v43  ;;  %v3690_v27 = vrot.slane %v3633_v63, %v7021_v43 }
0x1bb6   :  { %v3726_v36 = vsel %vm2347_vm7, %v3694_v29, %v3690_v27 }
0x1bb7   :  { %v3639_v10 = vpop.permute.xlu0 %3638  ;;  %v3615_v15 = vpop.permute.xlu1 %3614 }
0x1bb8   :  { %v3698_v4 = vrot.slane %v3639_v10, %v7021_v43  ;;  %v3666_v57 = vrot.slane %v3615_v15, %v7021_v43 }
0x1bba   :  { %v3727_v15 = vsel %vm2349_vm8, %v3698_v4, %v3726_v36 }
0x1bbb   :  { %v3642_v42 = vpop.permute.xlu0 %3641  ;;  %v3618_v28 = vpop.permute.xlu1 %3617 }
0x1bbc   :  { %v3702_v54 = vrot.slane %v3642_v42, %v7021_v43  ;;  %v3670_v51 = vrot.slane %v3618_v28, %v7021_v43  ;;  %v3720_v42 = vsel %vm2349_vm8, %v3666_v57, %v3719_v6  ;;  %v4015_v6 = vrot.slane %v6912_v22, %v6558_v11 }
0x1bbe   :  { %v3721_v2 = vsel %vm2351_vm9, %v3670_v51, %v3720_v42 }
0x1bbf   :  { %v3645_v49 = vpop.permute.xlu0 %3644  ;;  %v3621_v19 = vpop.permute.xlu1 %3620 }
0x1bc0   :  { %v3706_v31 = vrot.slane %v3645_v49, %v7021_v43  ;;  %v3674_v0 = vrot.slane %v3621_v19, %v7021_v43  ;;  %v3728_v19 = vsel %vm2351_vm9, %v3702_v54, %v3727_v15 }
0x1bc2   :  { %v3729_v7 = vsel %vm2353_vm10, %v3706_v31, %v3728_v19  ;;  %v3722_v27 = vsel %vm2353_vm10, %v3674_v0, %v3721_v2 }
0x1bc3   :  { %v3648_v17 = vpop.permute.xlu0 %3647  ;;  %v3624_v59 = vpop.permute.xlu1 %3623 }
0x1bc4   :  { %v3710_v63 = vrot.slane %v3648_v17, %v7021_v43  ;;  %v3678_v10 = vrot.slane %v3624_v59, %v7021_v43 }
0x1bc6   :  { %v3730_v59 = vsel %vm2355_vm11, %v3710_v63, %v3729_v7  ;;  %v3723_v4 = vsel %vm2355_vm11, %v3678_v10, %v3722_v27 }
0x1bc7   :  { %v3651_v21 = vpop.permute.xlu0 %3650  ;;  %v3627_v32 = vpop.permute.xlu1 %3626 }
0x1bc8   :  { %v3714_v28 = vrot.slane %v3651_v21, %v7021_v43  ;;  %v3682_v49 = vrot.slane %v3627_v32, %v7021_v43  ;;  %v4022_v32 = vrot.slane %v6912_v22, %v6564_v13 }
0x1bca   :  { %v3731_v61 = vsel %vm2357_vm12, %v3714_v28, %v3730_v59  ;;  %v3724_v54 = vsel %vm2357_vm12, %v3682_v49, %v3723_v4 }
0x1bcb   :  { %v3654_v29 = vpop.permute.xlu0 %3653  ;;  %v3630_v17 = vpop.permute.xlu1 %3629 }
0x1bcc   :  { %v3718_v57 = vrot.slane %v3654_v29, %v7021_v43  ;;  %v3686_v21 = vrot.slane %v3630_v17, %v7021_v43 }
0x1bce   :  { %v3732_v51 = vsel %vm2359_vm13, %v3718_v57, %v3731_v61  ;;  %v3725_v31 = vsel %vm2359_vm13, %v3686_v21, %v3724_v54 }
0x1bcf   :  { %v3738_v0 = vsel %vm2112_vm6, %v3732_v51, -inf  ;;  %v3735_v2 = vsel %vm2112_vm6, %v3725_v31, -inf }
0x1bd0   :  { %3739 = vmax.xlane.f32.xlu0 %v3738_v0  ;;  %3736 = vmax.xlane.f32.xlu1 %v3735_v2 }
0x1be1   :  { %4024 = vbcast.lane.b32.xlu1 %v4022_v32, 256 }
0x1be6   :  { %4017 = vbcast.lane.b32.xlu0 %v4015_v6, 256 }
0x1c5d   :  { %v7377_v36 = vpop.xlane.xlu0 %3739  ;;  %v7379_v63 = vpop.xlane.xlu1 %3736 }
0x1c5e   :  { %8864 = vst [vmem:[#allocation75_spill] sm:$0xff] %v7377_v36  ;;  %8865 = vst [vmem:[#allocation76_spill] sm:$0xff] %v7379_v63 }
0x1c61   :  { %v4018_v10 = vpop.permute.xlu0 %4017  ;;  %v4025_v15 = vpop.permute.xlu1 %4024 }
0x1c62   :  { %v4028_v42 = vadd.f32 %v4018_v10, %v7379_v63  ;;  %v4029_v28 = vadd.f32 %v4025_v15, %v7377_v36 }
0x1c64   :  { %v7384_v49 = vadd.f32 %v4028_v42, %v6939_v40  ;;  %v7387_v19 = vadd.f32 %v4028_v42, %v6941_v60  ;;  %v7392_v7 = vadd.f32 %v4029_v28, %v6939_v40  ;;  %v7395_v27 = vadd.f32 %v4029_v28, %v6941_v60 }
0x1c65   :  { %v7400_v29 = vadd.f32 %v4029_v28, %v6945_v44  ;;  %v7403_v17 = vadd.f32 %v4028_v42, %v6945_v44  ;;  %v7408_v59 = vadd.f32 %v4029_v28, %v6943_v41  ;;  %v7411_v4 = vadd.f32 %v4028_v42, %v6943_v41 }
0x1c66   :  { %8866 = vst [vmem:[#allocation77_spill] sm:$0xff] %v7384_v49  ;;  %8867 = vst [vmem:[#allocation78_spill] sm:$0xff] %v7387_v19  ;;  %4066 = vperm.xlu0 %6157, %v7384_v49   ;;  %4063 = vperm.xlu1 %6158, %v7387_v19   ;;  %v7416_v57 = vadd.f32 %v4029_v28, %v6977_v5  ;;  %v7419_v21 = vadd.f32 %v4028_v42, %v6977_v5 }
0x1c67   :  { %8868 = vst [vmem:[#allocation79_spill] sm:$0xff] %v7392_v7  ;;  %8869 = vst [vmem:[#allocation80_spill] sm:$0xff] %v7395_v27  ;;  %v7424_v61 = vadd.f32 %v4029_v28, %v6987_v62  ;;  %v7427_v54 = vadd.f32 %v4028_v42, %v6987_v62  ;;  %v7432_v51 = vadd.f32 %v4029_v28, %v6997_v14 }
0x1c68   :  { %8870 = vst [vmem:[#allocation81_spill] sm:$0xff] %v7400_v29  ;;  %8871 = vst [vmem:[#allocation82_spill] sm:$0xff] %v7403_v17  ;;  %v7435_v31 = vadd.f32 %v4028_v42, %v6997_v14  ;;  %v7440_v0 = vadd.f32 %v4029_v28, %v7007_v25  ;;  %v7443_v2 = vadd.f32 %v4028_v42, %v7007_v25 }
0x1c69   :  { %8872 = vst [vmem:[#allocation83_spill] sm:$0xff] %v7408_v59  ;;  %8873 = vst [vmem:[#allocation84_spill] sm:$0xff] %v7411_v4 }
0x1c6a   :  { %4090 = vperm.xlu0 %6157, %v7392_v7   ;;  %4087 = vperm.xlu1 %6158, %v7395_v27   ;;  %8874 = vst [vmem:[#allocation85_spill] sm:$0xff] %v7416_v57  ;;  %8875 = vst [vmem:[#allocation86_spill] sm:$0xff] %v7419_v21 }
0x1c6b   :  { %8876 = vst [vmem:[#allocation87_spill] sm:$0xff] %v7424_v61  ;;  %8877 = vst [vmem:[#allocation88_spill] sm:$0xff] %v7427_v54 }
0x1c6c   :  { %8878 = vst [vmem:[#allocation89_spill] sm:$0xff] %v7432_v51  ;;  %8879 = vst [vmem:[#allocation90_spill] sm:$0xff] %v7435_v31 }
0x1c6d   :  { %8880 = vst [vmem:[#allocation91_spill] sm:$0xff] %v7440_v0  ;;  %8881 = vst [vmem:[#allocation92_spill] sm:$0xff] %v7443_v2 }
0x1c6e   :  { %4093 = vperm.xlu0 %6157, %v7400_v29   ;;  %4069 = vperm.xlu1 %6158, %v7403_v17  }
0x1c72   :  { %4096 = vperm.xlu0 %6157, %v7408_v59   ;;  %4072 = vperm.xlu1 %6158, %v7411_v4  }
0x1c76   :  { %4099 = vperm.xlu0 %6157, %v7416_v57   ;;  %4075 = vperm.xlu1 %6158, %v7419_v21  }
0x1c7a   :  { %4102 = vperm.xlu0 %6157, %v7424_v61   ;;  %4078 = vperm.xlu1 %6158, %v7427_v54  }
0x1c7e   :  { %4105 = vperm.xlu0 %6157, %v7432_v51   ;;  %4081 = vperm.xlu1 %6158, %v7435_v31  }
0x1c82   :  { %4108 = vperm.xlu0 %6157, %v7440_v0   ;;  %4084 = vperm.xlu1 %6158, %v7443_v2  }
0x1ce5   :  { %v4067_v32 = vpop.permute.xlu0 %4066  ;;  %v4064_v6 = vpop.permute.xlu1 %4063 }
0x1ce6   :  { %v4117_v30 = vrot.slane %v4067_v32, %v7021_v43  ;;  %v4113_v42 = vrot.slane %v4064_v6, %v7021_v43 }
0x1ce8   :  { %v4174_v6 = vsel %vm2347_vm7, %v4117_v30, %v4113_v42 }
0x1ce9   :  { %v4091_v10 = vpop.permute.xlu0 %4090  ;;  %v4088_v15 = vpop.permute.xlu1 %4087 }
0x1cea   :  { %v4149_v58 = vrot.slane %v4091_v10, %v7021_v43  ;;  %v4145_v45 = vrot.slane %v4088_v15, %v7021_v43 }
0x1cec   :  { %v4181_v10 = vsel %vm2347_vm7, %v4149_v58, %v4145_v45 }
0x1ced   :  { %v4094_v35 = vpop.permute.xlu0 %4093  ;;  %v4070_v56 = vpop.permute.xlu1 %4069 }
0x1cee   :  { %v4153_v26 = vrot.slane %v4094_v35, %v7021_v43  ;;  %v4121_v48 = vrot.slane %v4070_v56, %v7021_v43 }
0x1cf0   :  { %v4182_v56 = vsel %vm2349_vm8, %v4153_v26, %v4181_v10 }
0x1cf1   :  { %v4097_v1 = vpop.permute.xlu0 %4096  ;;  %v4073_v46 = vpop.permute.xlu1 %4072 }
0x1cf2   :  { %v4157_v36 = vrot.slane %v4097_v1, %v7021_v43  ;;  %v4125_v55 = vrot.slane %v4073_v46, %v7021_v43  ;;  %v4175_v1 = vsel %vm2349_vm8, %v4121_v48, %v4174_v6  ;;  %v4469_v6 = vrot.slane %v6912_v22, %v6905_v20 }
0x1cf4   :  { %v4176_v24 = vsel %vm2351_vm9, %v4125_v55, %v4175_v1 }
0x1cf5   :  { %v4100_v23 = vpop.permute.xlu0 %4099  ;;  %v4076_v52 = vpop.permute.xlu1 %4075 }
0x1cf6   :  { %v4161_v12 = vrot.slane %v4100_v23, %v7021_v43  ;;  %v4129_v8 = vrot.slane %v4076_v52, %v7021_v43  ;;  %v4183_v52 = vsel %vm2351_vm9, %v4157_v36, %v4182_v56 }
0x1cf8   :  { %v4184_v30 = vsel %vm2353_vm10, %v4161_v12, %v4183_v52  ;;  %v4177_v45 = vsel %vm2353_vm10, %v4129_v8, %v4176_v24 }
0x1cf9   :  { %v4103_v16 = vpop.permute.xlu0 %4102  ;;  %v4079_v28 = vpop.permute.xlu1 %4078 }
0x1cfa   :  { %v4165_v15 = vrot.slane %v4103_v16, %v7021_v43  ;;  %v4133_v35 = vrot.slane %v4079_v28, %v7021_v43 }
0x1cfc   :  { %v4185_v28 = vsel %vm2355_vm11, %v4165_v15, %v4184_v30  ;;  %v4178_v26 = vsel %vm2355_vm11, %v4133_v35, %v4177_v45 }
0x1cfd   :  { %v4106_v47 = vpop.permute.xlu0 %4105  ;;  %v4082_v32 = vpop.permute.xlu1 %4081 }
0x1cfe   :  { %v4169_v46 = vrot.slane %v4106_v47, %v7021_v43  ;;  %v4137_v23 = vrot.slane %v4082_v32, %v7021_v43  ;;  %v4476_v32 = vrot.slane %v6912_v22, %v6902_v18 }
0x1d00   :  { %v4186_v42 = vsel %vm2357_vm12, %v4169_v46, %v4185_v28  ;;  %v4179_v36 = vsel %vm2357_vm12, %v4137_v23, %v4178_v26 }
0x1d01   :  { %v4109_v58 = vpop.permute.xlu0 %4108  ;;  %v4085_v16 = vpop.permute.xlu1 %4084 }
0x1d02   :  { %v4173_v48 = vrot.slane %v4109_v58, %v7021_v43  ;;  %v4141_v47 = vrot.slane %v4085_v16, %v7021_v43 }
0x1d04   :  { %v4187_v55 = vsel %vm2359_vm13, %v4173_v48, %v4186_v42  ;;  %v4180_v12 = vsel %vm2359_vm13, %v4141_v47, %v4179_v36 }
0x1d05   :  { %v4193_v24 = vsel %vm2112_vm6, %v4187_v55, -inf  ;;  %v4190_v8 = vsel %vm2112_vm6, %v4180_v12, -inf }
0x1d06   :  { %4194 = vmax.xlane.f32.xlu0 %v4193_v24  ;;  %4191 = vmax.xlane.f32.xlu1 %v4190_v8 }
0x1d17   :  { %4478 = vbcast.lane.b32.xlu1 %v4476_v32, 256 }
0x1d1c   :  { %4471 = vbcast.lane.b32.xlu0 %v4469_v6, 256 }
0x1d93   :  { %v7483_v10 = vpop.xlane.xlu0 %4194  ;;  %v7485_v15 = vpop.xlane.xlu1 %4191 }
0x1d94   :  { %8882 = vst [vmem:[#allocation93_spill] sm:$0xff] %v7483_v10  ;;  %8883 = vst [vmem:[#allocation94_spill] sm:$0xff] %v7485_v15 }
0x1d97   :  { %v4472_v35 = vpop.permute.xlu0 %4471  ;;  %v4479_v56 = vpop.permute.xlu1 %4478 }
0x1d98   :  { %v4482_v1 = vadd.f32 %v4472_v35, %v7485_v15  ;;  %v4483_v46 = vadd.f32 %v4479_v56, %v7483_v10 }
0x1d9a   :  { %v7490_v23 = vadd.f32 %v4482_v1, %v6939_v40  ;;  %v7493_v52 = vadd.f32 %v4482_v1, %v6941_v60  ;;  %v7498_v30 = vadd.f32 %v4483_v46, %v6939_v40  ;;  %v7501_v45 = vadd.f32 %v4483_v46, %v6941_v60 }
0x1d9b   :  { %v7506_v58 = vadd.f32 %v4483_v46, %v6945_v44  ;;  %v7509_v16 = vadd.f32 %v4482_v1, %v6945_v44  ;;  %v7514_v28 = vadd.f32 %v4483_v46, %v6943_v41  ;;  %v7517_v26 = vadd.f32 %v4482_v1, %v6943_v41 }
0x1d9c   :  { %4520 = vperm.xlu0 %6157, %v7490_v23   ;;  %4517 = vperm.xlu1 %6158, %v7493_v52   ;;  %v7522_v48 = vadd.f32 %v4483_v46, %v6977_v5  ;;  %v7525_v47 = vadd.f32 %v4482_v1, %v6977_v5  ;;  %v7530_v42 = vadd.f32 %v4483_v46, %v6987_v62 }
0x1d9d   :  { %8884 = vst [vmem:[#allocation95_spill] sm:$0xff] %v7514_v28  ;;  %v7533_v36 = vadd.f32 %v4482_v1, %v6987_v62  ;;  %v7538_v55 = vadd.f32 %v4483_v46, %v6997_v14  ;;  %v7541_v12 = vadd.f32 %v4482_v1, %v6997_v14  ;;  %v7546_v24 = vadd.f32 %v4483_v46, %v7007_v25 }
0x1d9e   :  { %8885 = vst [vmem:[#allocation96_spill] sm:$0xff] %v7522_v48  ;;  %8886 = vst [vmem:[#allocation97_spill] sm:$0xff] %v7530_v42  ;;  %v7549_v8 = vadd.f32 %v4482_v1, %v7007_v25 }
0x1d9f   :  { %8887 = vst [vmem:[#allocation98_spill] sm:$0xff] %v7538_v55  ;;  %8888 = vst [vmem:[#allocation99_spill] sm:$0xff] %v7546_v24 }
0x1da0   :  { %4544 = vperm.xlu0 %6157, %v7498_v30   ;;  %4541 = vperm.xlu1 %6158, %v7501_v45  }
0x1da4   :  { %4547 = vperm.xlu0 %6157, %v7506_v58   ;;  %4523 = vperm.xlu1 %6158, %v7509_v16  }
0x1da8   :  { %4550 = vperm.xlu0 %6157, %v7514_v28   ;;  %4526 = vperm.xlu1 %6158, %v7517_v26  }
0x1dac   :  { %4553 = vperm.xlu0 %6157, %v7522_v48   ;;  %4529 = vperm.xlu1 %6158, %v7525_v47  }
0x1db0   :  { %4556 = vperm.xlu0 %6157, %v7530_v42   ;;  %4532 = vperm.xlu1 %6158, %v7533_v36  }
0x1db4   :  { %4559 = vperm.xlu0 %6157, %v7538_v55   ;;  %4535 = vperm.xlu1 %6158, %v7541_v12  }
0x1db8   :  { %4562 = vperm.xlu0 %6157, %v7546_v24   ;;  %4538 = vperm.xlu1 %6158, %v7549_v8  }
0x1e1b   :  { %v4521_v32 = vpop.permute.xlu0 %4520  ;;  %v4518_v6 = vpop.permute.xlu1 %4517 }
0x1e1c   :  { %v4571_v57 = vrot.slane %v4521_v32, %v7021_v43  ;;  %v4567_v1 = vrot.slane %v4518_v6, %v7021_v43 }
0x1e1e   :  { %v4628_v6 = vsel %vm2347_vm7, %v4571_v57, %v4567_v1 }
0x1e1f   :  { %v4545_v35 = vpop.permute.xlu0 %4544  ;;  %v4542_v56 = vpop.permute.xlu1 %4541 }
0x1e20   :  { %v4603_v59 = vrot.slane %v4545_v35, %v7021_v43  ;;  %v4599_v29 = vrot.slane %v4542_v56, %v7021_v43 }
0x1e22   :  { %v4635_v35 = vsel %vm2347_vm7, %v4603_v59, %v4599_v29 }
0x1e23   :  { %v4548_v3 = vpop.permute.xlu0 %4547  ;;  %v4524_v9 = vpop.permute.xlu1 %4523 }
0x1e24   :  { %v4607_v7 = vrot.slane %v4548_v3, %v7021_v43  ;;  %v4575_v27 = vrot.slane %v4524_v9, %v7021_v43 }
0x1e26   :  { %v4636_v9 = vsel %vm2349_vm8, %v4607_v7, %v4635_v35 }
0x1e27   :  { %v4551_v53 = vpop.permute.xlu0 %4550  ;;  %v4527_v63 = vpop.permute.xlu1 %4526 }
0x1e28   :  { %v4611_v10 = vrot.slane %v4551_v53, %v7021_v43  ;;  %v4579_v49 = vrot.slane %v4527_v63, %v7021_v43  ;;  %v4629_v53 = vsel %vm2349_vm8, %v4575_v27, %v4628_v6  ;;  %v4923_v6 = vrot.slane %v6912_v22, %v6924_v34 }
0x1e2a   :  { %v4630_v21 = vsel %vm2351_vm9, %v4579_v49, %v4629_v53 }
0x1e2b   :  { %v4554_v0 = vpop.permute.xlu0 %4553  ;;  %v4530_v51 = vpop.permute.xlu1 %4529 }
0x1e2c   :  { %v4615_v2 = vrot.slane %v4554_v0, %v7021_v43  ;;  %v4583_v31 = vrot.slane %v4530_v51, %v7021_v43  ;;  %v4637_v51 = vsel %vm2351_vm9, %v4611_v10, %v4636_v9 }
0x1e2e   :  { %v4638_v57 = vsel %vm2353_vm10, %v4615_v2, %v4637_v51  ;;  %v4631_v29 = vsel %vm2353_vm10, %v4583_v31, %v4630_v21 }
0x1e2f   :  { %v4557_v61 = vpop.permute.xlu0 %4556  ;;  %v4533_v46 = vpop.permute.xlu1 %4532 }
0x1e30   :  { %v4619_v56 = vrot.slane %v4557_v61, %v7021_v43  ;;  %v4587_v3 = vrot.slane %v4533_v46, %v7021_v43 }
0x1e32   :  { %v4639_v46 = vsel %vm2355_vm11, %v4619_v56, %v4638_v57  ;;  %v4632_v7 = vsel %vm2355_vm11, %v4587_v3, %v4631_v29 }
0x1e33   :  { %v4560_v54 = vpop.permute.xlu0 %4559  ;;  %v4536_v32 = vpop.permute.xlu1 %4535 }
0x1e34   :  { %v4623_v63 = vrot.slane %v4560_v54, %v7021_v43  ;;  %v4591_v0 = vrot.slane %v4536_v32, %v7021_v43  ;;  %v4930_v32 = vrot.slane %v6912_v22, %v6921_v33 }
0x1e36   :  { %v4640_v1 = vsel %vm2357_vm12, %v4623_v63, %v4639_v46  ;;  %v4633_v10 = vsel %vm2357_vm12, %v4591_v0, %v4632_v7 }
0x1e37   :  { %v4563_v59 = vpop.permute.xlu0 %4562  ;;  %v4539_v61 = vpop.permute.xlu1 %4538 }
0x1e38   :  { %v4627_v27 = vrot.slane %v4563_v59, %v7021_v43  ;;  %v4595_v54 = vrot.slane %v4539_v61, %v7021_v43 }
0x1e3a   :  { %v4641_v49 = vsel %vm2359_vm13, %v4627_v27, %v4640_v1  ;;  %v4634_v2 = vsel %vm2359_vm13, %v4595_v54, %v4633_v10  ;;  %v5377_v1 = vrot.slane %v6912_v22, %v6932_v38 }
0x1e3b   :  { %v4647_v21 = vsel %vm2112_vm6, %v4641_v49, -inf  ;;  %v4644_v31 = vsel %vm2112_vm6, %v4634_v2, -inf }
0x1e3c   :  { %4648 = vmax.xlane.f32.xlu0 %v4647_v21  ;;  %4645 = vmax.xlane.f32.xlu1 %v4644_v31 }
0x1e4d   :  { %4932 = vbcast.lane.b32.xlu1 %v4930_v32, 256 }
0x1e52   :  { %4925 = vbcast.lane.b32.xlu0 %v4923_v6, 256 }
0x1ec9   :  { %v7589_v35 = vpop.xlane.xlu0 %4648  ;;  %v7591_v56 = vpop.xlane.xlu1 %4645 }
0x1ecd   :  { %v4926_v3 = vpop.permute.xlu0 %4925  ;;  %v4933_v9 = vpop.permute.xlu1 %4932 }
0x1ece   :  { %v4936_v53 = vadd.f32 %v4926_v3, %v7591_v56  ;;  %v4937_v63 = vadd.f32 %v4933_v9, %v7589_v35 }
0x1ed0   :  { %v7596_v0 = vadd.f32 %v4936_v53, %v6939_v40  ;;  %v7599_v51 = vadd.f32 %v4936_v53, %v6941_v60  ;;  %v7604_v57 = vadd.f32 %v4937_v63, %v6939_v40  ;;  %v7607_v29 = vadd.f32 %v4937_v63, %v6941_v60 }
0x1ed1   :  { %v7612_v59 = vadd.f32 %v4937_v63, %v6945_v44  ;;  %v7615_v61 = vadd.f32 %v4936_v53, %v6945_v44  ;;  %v7620_v40 = vadd.f32 %v4937_v63, %v6943_v41  ;;  %v7623_v60 = vadd.f32 %v4936_v53, %v6943_v41 }
0x1ed2   :  { %4974 = vperm.xlu0 %6157, %v7596_v0   ;;  %4971 = vperm.xlu1 %6158, %v7599_v51   ;;  %v7628_v46 = vadd.f32 %v4937_v63, %v6977_v5  ;;  %v7631_v44 = vadd.f32 %v4936_v53, %v6977_v5  ;;  %v7636_v7 = vadd.f32 %v4937_v63, %v6987_v62 }
0x1ed3   :  { %v7639_v41 = vadd.f32 %v4936_v53, %v6987_v62  ;;  %v7644_v27 = vadd.f32 %v4937_v63, %v6997_v14  ;;  %v7647_v5 = vadd.f32 %v4936_v53, %v6997_v14  ;;  %v7652_v54 = vadd.f32 %v4937_v63, %v7007_v25 }
0x1ed4   :  { %v7655_v62 = vadd.f32 %v4936_v53, %v7007_v25  ;;  %v5384_v14 = vrot.slane %v6912_v22, %v6929_v37 }
0x1ed6   :  { %4998 = vperm.xlu0 %6157, %v7604_v57   ;;  %4995 = vperm.xlu1 %6158, %v7607_v29  }
0x1eda   :  { %5001 = vperm.xlu0 %6157, %v7612_v59   ;;  %4977 = vperm.xlu1 %6158, %v7615_v61  }
0x1ede   :  { %5004 = vperm.xlu0 %6157, %v7620_v40   ;;  %4980 = vperm.xlu1 %6158, %v7623_v60  }
0x1ee2   :  { %5007 = vperm.xlu0 %6157, %v7628_v46   ;;  %4983 = vperm.xlu1 %6158, %v7631_v44  }
0x1ee6   :  { %5010 = vperm.xlu0 %6157, %v7636_v7   ;;  %4986 = vperm.xlu1 %6158, %v7639_v41  }
0x1eea   :  { %5013 = vperm.xlu0 %6157, %v7644_v27   ;;  %4989 = vperm.xlu1 %6158, %v7647_v5  }
0x1eee   :  { %5016 = vperm.xlu0 %6157, %v7652_v54   ;;  %4992 = vperm.xlu1 %6158, %v7655_v62  }
0x1ef2   :  { %5379 = vbcast.lane.b32.xlu0 %v5377_v1, 256  ;;  %5386 = vbcast.lane.b32.xlu1 %v5384_v14, 256 }
0x1f51   :  { %v4975_v10 = vpop.permute.xlu0 %4974  ;;  %v4972_v49 = vpop.permute.xlu1 %4971 }
0x1f52   :  { %v5025_v4 = vrot.slane %v4975_v10, %v7021_v43  ;;  %v5021_v17 = vrot.slane %v4972_v49, %v7021_v43 }
0x1f54   :  { %v5082_v49 = vsel %vm2347_vm7, %v5025_v4, %v5021_v17 }
0x1f55   :  { %v4999_v2 = vpop.permute.xlu0 %4998  ;;  %v4996_v21 = vpop.permute.xlu1 %4995 }
0x1f56   :  { %v5057_v22 = vrot.slane %v4999_v2, %v7021_v43  ;;  %v5053_v1 = vrot.slane %v4996_v21, %v7021_v43 }
0x1f58   :  { %v5089_v2 = vsel %vm2347_vm7, %v5057_v22, %v5053_v1 }
0x1f59   :  { %v5002_v31 = vpop.permute.xlu0 %5001  ;;  %v4978_v32 = vpop.permute.xlu1 %4977 }
0x1f5a   :  { %v5061_v14 = vrot.slane %v5002_v31, %v7021_v43  ;;  %v5029_v19 = vrot.slane %v4978_v32, %v7021_v43 }
0x1f5c   :  { %v5090_v32 = vsel %vm2349_vm8, %v5061_v14, %v5089_v2 }
0x1f5d   :  { %v5005_v25 = vpop.permute.xlu0 %5004  ;;  %v4981_v6 = vpop.permute.xlu1 %4980 }
0x1f5e   :  { %v5065_v15 = vrot.slane %v5005_v25, %v7021_v43  ;;  %v5033_v24 = vrot.slane %v4981_v6, %v7021_v43  ;;  %v5083_v25 = vsel %vm2349_vm8, %v5029_v19, %v5082_v49 }
0x1f60   :  { %v5084_v28 = vsel %vm2351_vm9, %v5033_v24, %v5083_v25 }
0x1f61   :  { %v5008_v3 = vpop.permute.xlu0 %5007  ;;  %v4984_v9 = vpop.permute.xlu1 %4983 }
0x1f62   :  { %v5069_v55 = vrot.slane %v5008_v3, %v7021_v43  ;;  %v5037_v42 = vrot.slane %v4984_v9, %v7021_v43  ;;  %v5091_v9 = vsel %vm2351_vm9, %v5065_v15, %v5090_v32 }
0x1f64   :  { %v5092_v17 = vsel %vm2353_vm10, %v5069_v55, %v5091_v9  ;;  %v5085_v4 = vsel %vm2353_vm10, %v5037_v42, %v5084_v28  ;;  %v4659_v9 = vrot.slane %v7591_v56, %v6564_v13 }
0x1f65   :  { %v5011_v53 = vpop.permute.xlu0 %5010  ;;  %v4987_v63 = vpop.permute.xlu1 %4986 }
0x1f66   :  { %v5073_v21 = vrot.slane %v5011_v53, %v7021_v43  ;;  %v5041_v31 = vrot.slane %v4987_v63, %v7021_v43  ;;  %vm4733_vm14 = vcmp.eq.f32.partialorder %v7490_v23, %v4659_v9  ;;  %v4663_v23 = vrot.slane %v7591_v56, %v6905_v20 }
0x1f68   :  { %v5093_v63 = vsel %vm2355_vm11, %v5073_v21, %v5092_v17  ;;  %v5086_v1 = vsel %vm2355_vm11, %v5041_v31, %v5085_v4  ;;  %v4655_v17 = vrot.slane %v7591_v56, %v6558_v11  ;;  %vm4734_vm2 = vcmp.eq.f32.partialorder %v7509_v16, %v4663_v23 }
0x1f69   :  { %v5014_v48 = vpop.permute.xlu0 %5013  ;;  %v4990_v10 = vpop.permute.xlu1 %4989 }
0x1f6a   :  { %v5077_v6 = vrot.slane %v5014_v48, %v7021_v43  ;;  %v5045_v3 = vrot.slane %v4990_v10, %v7021_v43  ;;  %vm4732_vm15 = vcmp.eq.f32.partialorder %v7493_v52, %v4655_v17 }
0x1f6c   :  { %v5094_v14 = vsel %vm2357_vm12, %v5077_v6, %v5093_v63  ;;  %v5087_v15 = vsel %vm2357_vm12, %v5045_v3, %v5086_v1 }
0x1f6d   :  { %v5017_v22 = vpop.permute.xlu0 %5016  ;;  %v4993_v53 = vpop.permute.xlu1 %4992 }
0x1f6e   :  { %v5081_v19 = vrot.slane %v5017_v22, %v7021_v43  ;;  %v5049_v48 = vrot.slane %v4993_v53, %v7021_v43  ;;  %v4687_v22 = vrot.slane %v7589_v35, %v6558_v11 }
0x1f70   :  { %v5095_v24 = vsel %vm2359_vm13, %v5081_v19, %v5094_v14  ;;  %v5088_v55 = vsel %vm2359_vm13, %v5049_v48, %v5087_v15  ;;  %vm4740_vm0 = vcmp.eq.f32.partialorder %v7501_v45, %v4687_v22 }
0x1f71   :  { %v5101_v28 = vsel %vm2112_vm6, %v5095_v24, -inf  ;;  %v5098_v42 = vsel %vm2112_vm6, %v5088_v55, -inf  ;;  %v5380_v10 = vpop.permute.xlu0 %5379  ;;  %v5387_v49 = vpop.permute.xlu1 %5386 }
0x1f72   :  { %5102 = vmax.xlane.f32.xlu0 %v5101_v28  ;;  %5099 = vmax.xlane.f32.xlu1 %v5098_v42 }
0x1f83   :  { %5398 = vbcast.lane.b32.xlu1 %v6935_v39, 256 }
0x1fff   :  { %v7696_v2 = vpop.xlane.xlu0 %5102  ;;  %v7698_v21 = vpop.xlane.xlu1 %5099 }
0x2000   :  { %v5390_v31 = vadd.f32 %v5380_v10, %v7698_v21  ;;  %v5391_v32 = vadd.f32 %v5387_v49, %v7696_v2  ;;  %v5153_v53 = vrot.slane %v7696_v2, %v6902_v18  ;;  %v5137_v52 = vrot.slane %v7698_v21, %v6929_v37 }
0x2001   :  { %v5109_v45 = vrot.slane %v7698_v21, %v6558_v11  ;;  %v5113_v15 = vrot.slane %v7698_v21, %v6564_v13  ;;  %v5141_v16 = vrot.slane %v7696_v2, %v6558_v11  ;;  %v5145_v55 = vrot.slane %v7696_v2, %v6564_v13 }
0x2002   :  { %vm5197_vm1 = vcmp.eq.f32.partialorder %v7620_v40, %v5153_v53  ;;  %vm5193_vm3 = vcmp.eq.f32.partialorder %v7655_v62, %v5137_v52  ;;  %v5117_v28 = vrot.slane %v7698_v21, %v6905_v20  ;;  %v5149_v42 = vrot.slane %v7696_v2, %v6905_v20 }
0x2003   :  { %v5399_v25 = vpop.permute.xlu1 %5398  ;;  %vm5186_vm4 = vcmp.eq.f32.partialorder %v7599_v51, %v5109_v45  ;;  %vm5187_vm5 = vcmp.eq.f32.partialorder %v7596_v0, %v5113_v15  ;;  %v5169_v23 = vrot.slane %v7696_v2, %v6929_v37 }
0x2004   :  { %v7702_v6 = vadd.f32 %v5399_v25, %v5390_v31  ;;  %v7704_v3 = vadd.f32 %v5399_v25, %v5391_v32 }
0x2006   :  { %5409 = vperm.xlu1 %6158, %v7704_v3   ;;  %5406 = vperm.xlu0 %6157, %v7702_v6  }
0x200a   :  { %2475 = vbcast.lane.b32.xlu1 %v6869_v50, 256 }
0x2085   :  { %v5410_v39 = vpop.permute.xlu1 %5409  ;;  %v5407_v10 = vpop.permute.xlu0 %5406 }
0x2086   :  { %v5418_v49 = vrot.slane %v5410_v39, %v7021_v43  ;;  %v5414_v31 = vrot.slane %v5407_v10, %v7021_v43  ;;  %v5157_v39 = vrot.slane %v7696_v2, %v6924_v34 }
0x2088   :  { %v5419_v9 = vsel %vm2347_vm7, %v5418_v49, %v5414_v31 }
0x2089   :  { %v7713_v4 = vpop.permute.xlu1 %2475 }
0x208a   :  { %v4749_v63 = vsel %vm4733_vm14, %v7713_v4, 8  ;;  %v4748_v1 = vsel %vm4732_vm15, %v7713_v4, 8  ;;  %v4756_v19 = vsel %vm4740_vm0, %v7713_v4, 8  ;;  %v5213_v48 = vsel %vm5197_vm1, %v7713_v4, 8 }
0x208b   :  { %4768 = vperm.xlu1 %6158, %v4749_v63   ;;  %4765 = vperm.xlu0 %6157, %v4748_v1   ;;  %v4750_v40 = vsel %vm4734_vm2, %v7713_v4, 8  ;;  %v5209_v14 = vsel %vm5193_vm3, %v7713_v4, 8  ;;  %v5202_v24 = vsel %vm5186_vm4, %v7713_v4, 8  ;;  %v5203_v62 = vsel %vm5187_vm5, %v7713_v4, 8 }
0x208c   :  { %vm5194_vm14 = vcmp.eq.f32.partialorder %v7607_v29, %v5141_v16  ;;  %vm5195_vm15 = vcmp.eq.f32.partialorder %v7604_v57, %v5145_v55  ;;  %vm5188_vm0 = vcmp.eq.f32.partialorder %v7615_v61, %v5117_v28  ;;  %vm5196_vm1 = vcmp.eq.f32.partialorder %v7612_v59, %v5149_v42 }
0x208d   :  { %v5210_v51 = vsel %vm5194_vm14, %v7713_v4, 8  ;;  %v5211_v0 = vsel %vm5195_vm15, %v7713_v4, 8  ;;  %v5204_v29 = vsel %vm5188_vm0, %v7713_v4, 8  ;;  %v5121_v57 = vrot.slane %v7698_v21, %v6902_v18 }
0x208e   :  { %v5212_v32 = vsel %vm5196_vm1, %v7713_v4, 8  ;;  %v5125_v61 = vrot.slane %v7698_v21, %v6924_v34  ;;  %vm5421_vm3 = vcmask 58368   ;;  %vm5198_vm5 = vcmp.eq.f32.partialorder %v7628_v46, %v5157_v39 }
0x208f   :  { %4789 = vperm.xlu1 %6158, %v4756_v19   ;;  %5252 = vperm.xlu0 %6157, %v5213_v48   ;;  %vm5189_vm2 = vcmp.eq.f32.partialorder %v7623_v60, %v5121_v57  ;;  %v5422_v59 = vsel %vm5421_vm3, %v5419_v9, -inf  ;;  %v5129_v60 = vrot.slane %v7698_v21, %v6921_v33  ;;  %v5214_v22 = vsel %vm5198_vm5, %v7713_v4, 8 }
0x2090   :  { %v5205_v25 = vsel %vm5189_vm2, %v7713_v4, 8  ;;  %vm5190_vm4 = vcmp.eq.f32.partialorder %v7631_v44, %v5125_v61  ;;  %v5161_v44 = vrot.slane %v7696_v2, %v6921_v33  ;;  %v5133_v63 = vrot.slane %v7698_v21, %v6932_v38 }
0x2091   :  { %v5206_v17 = vsel %vm5190_vm4, %v7713_v4, 8  ;;  %vm5191_vm14 = vcmp.eq.f32.partialorder %v7639_v41, %v5129_v60  ;;  %v5165_v1 = vrot.slane %v7696_v2, %v6932_v38  ;;  %vm5201_vm2 = vcmp.eq.f32.partialorder %v7652_v54, %v5169_v23 }
0x2092   :  { %v5207_v53 = vsel %vm5191_vm14, %v7713_v4, 8  ;;  %vm5199_vm15 = vcmp.eq.f32.partialorder %v7636_v7, %v5161_v44  ;;  %vm5192_vm0 = vcmp.eq.f32.partialorder %v7647_v5, %v5133_v63  ;;  %v5217_v21 = vsel %vm5201_vm2, %v7713_v4, 8 }
0x2093   :  { %4771 = vperm.xlu1 %6158, %v4750_v40   ;;  %5240 = vperm.xlu0 %6157, %v5209_v14   ;;  %v5215_v46 = vsel %vm5199_vm15, %v7713_v4, 8  ;;  %v5208_v41 = vsel %vm5192_vm0, %v7713_v4, 8  ;;  %vm5200_vm1 = vcmp.eq.f32.partialorder %v7644_v27, %v5165_v1  ;;  %vm5470_vm4 = vcmask 1024  }
0x2094   :  { %v5216_v7 = vsel %vm5200_vm1, %v7713_v4, 8 }
0x2097   :  { %5219 = vperm.xlu1 %6158, %v5202_v24  }
0x209b   :  { %5222 = vperm.xlu1 %6158, %v5203_v62  }
0x209f   :  { %5243 = vperm.xlu1 %6158, %v5210_v51  }
0x20a3   :  { %5246 = vperm.xlu1 %6158, %v5211_v0  }
0x20a7   :  { %5225 = vperm.xlu1 %6158, %v5204_v29  }
0x20ab   :  { %5249 = vperm.xlu1 %6158, %v5212_v32  }
0x20af   :  { %5228 = vperm.xlu1 %6158, %v5205_v25  }
0x20b2   :  { %5423 = vmax.xlane.f32.xlu0 %v5422_v59 }
0x20b3   :  { %5231 = vperm.xlu1 %6158, %v5206_v17  }
0x20b7   :  { %5255 = vperm.xlu1 %6158, %v5214_v22  }
0x20bb   :  { %5234 = vperm.xlu1 %6158, %v5207_v53  }
0x20bf   :  { %5258 = vperm.xlu1 %6158, %v5215_v46  }
0x20c3   :  { %5237 = vperm.xlu1 %6158, %v5208_v41  }
0x20c7   :  { %5261 = vperm.xlu1 %6158, %v5216_v7  }
0x20cb   :  { %5264 = vperm.xlu1 %6158, %v5217_v21  }
0x210a   :  { %v7795_v5 = vpop.permute.xlu1 %4768  ;;  %v7801_v24 = vpop.permute.xlu0 %4765 }
0x210e   :  { %v7797_v52 = vpop.permute.xlu1 %4789  ;;  %v5253_v54 = vpop.permute.xlu0 %5252 }
0x210f   :  { %v5313_v21 = vrot.slane %v5253_v54, %v7021_v43 }
0x2112   :  { %v7799_v19 = vpop.permute.xlu1 %4771  ;;  %v5241_v51 = vpop.permute.xlu0 %5240 }
0x2113   :  { %v5297_v44 = vrot.slane %v5241_v51, %v7021_v43 }
0x2116   :  { %v5220_v48 = vpop.permute.xlu1 %5219 }
0x2117   :  { %v5269_v42 = vrot.slane %v5220_v48, %v7021_v43 }
0x211a   :  { %v5223_v45 = vpop.permute.xlu1 %5222 }
0x211b   :  { %v5273_v28 = vrot.slane %v5223_v45, %v7021_v43 }
0x211d   :  { %v5330_v31 = vsel %vm2347_vm7, %v5273_v28, %v5269_v42 }
0x211e   :  { %v5244_v27 = vpop.permute.xlu1 %5243 }
0x211f   :  { %v5301_v17 = vrot.slane %v5244_v27, %v7021_v43 }
0x2122   :  { %v5247_v40 = vpop.permute.xlu1 %5246 }
0x2123   :  { %v5305_v61 = vrot.slane %v5247_v40, %v7021_v43 }
0x2125   :  { %v5337_v63 = vsel %vm2347_vm7, %v5305_v61, %v5301_v17  ;;  %v4671_v61 = vrot.slane %v7591_v56, %v6924_v34 }
0x2126   :  { %v5226_v14 = vpop.permute.xlu1 %5225 }
0x2127   :  { %v5277_v0 = vrot.slane %v5226_v14, %v7021_v43  ;;  %vm4736_vm0 = vcmp.eq.f32.partialorder %v7525_v47, %v4671_v61 }
0x2129   :  { %v5331_v25 = vsel %vm2349_vm8, %v5277_v0, %v5330_v31  ;;  %v4667_v31 = vrot.slane %v7591_v56, %v6902_v18 }
0x212a   :  { %v5250_v2 = vpop.permute.xlu1 %5249 }
0x212b   :  { %v5309_v9 = vrot.slane %v5250_v2, %v7021_v43  ;;  %vm4735_vm15 = vcmp.eq.f32.partialorder %v7517_v26, %v4667_v31  ;;  %v8891_v31 = vld [vmem:[#allocation97_spill] sm:$0xff] }
0x212d   :  { %v5338_v1 = vsel %vm2349_vm8, %v5309_v9, %v5337_v63  ;;  %v4683_v9 = vrot.slane %v7591_v56, %v6929_v37 }
0x212e   :  { %v5229_v15 = vpop.permute.xlu1 %5228  ;;  %v5339_v14 = vsel %vm2351_vm9, %v5313_v21, %v5338_v1 }
0x212f   :  { %v5281_v29 = vrot.slane %v5229_v15, %v7021_v43 }
0x2131   :  { %v5332_v59 = vsel %vm2351_vm9, %v5281_v29, %v5331_v25  ;;  %v4679_v25 = vrot.slane %v7591_v56, %v6932_v38 }
0x2132   :  { %v5232_v16 = vpop.permute.xlu1 %5231 }
0x2133   :  { %v5285_v57 = vrot.slane %v5232_v16, %v7021_v43  ;;  %vm4738_vm2 = vcmp.eq.f32.partialorder %v7541_v12, %v4679_v25  ;;  %v4819_v12 = vrot.slane %v7795_v5, %v7021_v43  ;;  %v8893_v25 = vld [vmem:[#allocation99_spill] sm:$0xff] }
0x2134   :  { %v4754_v47 = vsel %vm4738_vm2, %v7713_v4, 8 }
0x2135   :  { %v5333_v60 = vsel %vm2353_vm10, %v5285_v57, %v5332_v59 }
0x2136   :  { %v5256_v62 = vpop.permute.xlu1 %5255 }
0x2137   :  { %v5317_v41 = vrot.slane %v5256_v62, %v7021_v43 }
0x2139   :  { %v5340_v2 = vsel %vm2353_vm10, %v5317_v41, %v5339_v14 }
0x213a   :  { %v5235_v55 = vpop.permute.xlu1 %5234 }
0x213b   :  { %v5289_v32 = vrot.slane %v5235_v55, %v7021_v43 }
0x213d   :  { %v5334_v53 = vsel %vm2355_vm11, %v5289_v32, %v5333_v60 }
0x213e   :  { %v5259_v10 = vpop.permute.xlu1 %5258 }
0x213f   :  { %v5424_v49 = vpop.xlane.xlu0 %5423  ;;  %v5321_v48 = vrot.slane %v5259_v10, %v7021_v43 }
0x2140   :  { %5471 = vst.msk [vmem:[%s8687_s10] sm:$0x3] %vm5470_vm4, %v5424_v49  ;;  %v5429_v29 = vrot.slane %v5424_v49, %v6558_v11  ;;  %v5433_v10 = vrot.slane %v5424_v49, %v6564_v13  ;;  %v4751_v49 = vsel %vm4735_vm15, %v7713_v4, 8  ;;  %vm4739_vm4 = vcmp.eq.f32.partialorder %v7549_v8, %v4683_v9  ;;  %s6319_s10 = smov [#allocation2]  }
0x2141   :  { %v5341_v62 = vsel %vm2355_vm11, %v5321_v48, %v5340_v2  ;;  %v4755_v59 = vsel %vm4739_vm4, %v7713_v4, 8  ;;  %s5663_s1 = sshll.u32 %s6319_s10, 4  ;;  %s5664_s1 = int_to_ptr.vmem [resolvable:$true] %s5663_s1 }
0x2142   :  { %v5238_v39 = vpop.permute.xlu1 %5237  ;;  %vm5436_vm5 = vcmp.eq.f32.partialorder %v7702_v6, %v5429_v29  ;;  %vm5437_vm14 = vcmp.eq.f32.partialorder %v7704_v3, %v5433_v10  ;;  %v4675_v6 = vrot.slane %v7591_v56, %v6921_v33  ;;  %v4752_v3 = vsel %vm4736_vm0, %v7713_v4, 8  ;;  %v8890_v10 = vld [vmem:[#allocation96_spill] sm:$0xff]  ;;  %s6287_s27 = scalar_lea.vmem %s5664_s1, 32  ;;  %p6292_p1 = scmp.lt.s32.totalorder %s5664_s1, %s5664_s1 }
0x2143   :  { %v5293_v22 = vrot.slane %v5238_v39, %v7021_v43  ;;  %v5438_v57 = vsel %vm5436_vm5, %v7713_v4, 8  ;;  %v5439_v32 = vsel %vm5437_vm14, %v7713_v4, 8  ;;  %v4815_v56 = vrot.slane %v7801_v24, %v7021_v43  ;;  %p6288_p0 = scmp.ne.s32.totalorder %s5664_s1, %s6287_s27  ;;  %p6293_p2 = scmp.lt.s32.totalorder %s6287_s27, %s6287_s27 }
0x2144   :  { %vm4737_vm1 = vcmp.eq.f32.partialorder %v7533_v36, %v4675_v6  ;;  %v4703_v29 = vrot.slane %v7589_v35, %v6924_v34  ;;  %v4715_v6 = vrot.slane %v7589_v35, %v6929_v37 }
0x2145   :  { %v5335_v46 = vsel %vm2357_vm12, %v5293_v22, %v5334_v53  ;;  %v4753_v26 = vsel %vm4737_vm1, %v7713_v4, 8  ;;  %p6294_p3 = por %p6293_p2, %p6292_p1 }
0x2146   :  { %v5262_v23 = vpop.permute.xlu1 %5261  ;;  %v5336_v7 = vsel %vm2359_vm13, %v5297_v44, %v5335_v46  ;;  %v4823_v44 = vrot.slane %v7799_v19, %v7021_v43  ;;  %v4876_v46 = vsel %vm2347_vm7, %v4819_v12, %v4815_v56  ;;  %vm4744_vm0 = vcmp.eq.f32.partialorder %v8890_v10, %v4703_v29  ;;  %v8897_v56 = vld [vmem:[#allocation84_spill] sm:$0xff] }
0x2147   :  { %v7830_v45 = vsel %vm2112_vm6, %v5336_v7, 2147483647  ;;  %v5325_v27 = vrot.slane %v5262_v23, %v7021_v43  ;;  %vm4747_vm4 = vcmp.eq.f32.partialorder %v8893_v25, %v4715_v6  ;;  %p6295_p4 = pnand %p6294_p3, %p6288_p0 }
0x2148   :  { %v5346_v40 = vshra.s32 %v7830_v45, 16  ;;  %v4877_v41 = vsel %vm2349_vm8, %v4823_v44, %v4876_v46 }
0x2149   :  { %v5342_v55 = vsel %vm2357_vm12, %v5325_v27, %v5341_v62  ;;  %v4695_v62 = vrot.slane %v7589_v35, %v6905_v20 }
0x214a   :  { %v5265_v15 = vpop.permute.xlu1 %5264  ;;  %v7836_v16 = vcvt.s32.f32 %v5346_v40 }
0x214b   :  { %v5329_v54 = vrot.slane %v5265_v15, %v7021_v43  ;;  %v4691_v15 = vrot.slane %v7589_v35, %v6564_v13  ;;  %vm4742_vm14 = vcmp.eq.f32.partialorder %v7506_v58, %v4695_v62  ;;  %v4760_v58 = vsel %vm4744_vm0, %v7713_v4, 8 }
0x214c   :  { %5349 = vmin.xlane.f32.xlu0 %v7836_v16 }
0x214d   :  { %v5343_v51 = vsel %vm2359_vm13, %v5329_v54, %v5342_v55  ;;  %vm4741_vm5 = vcmp.eq.f32.partialorder %v7498_v30, %v4691_v15  ;;  %v4699_v55 = vrot.slane %v7589_v35, %v6902_v18 }
0x214e   :  { %v7844_v28 = vsel %vm2112_vm6, %v5343_v51, 2147483647  ;;  %v4757_v54 = vsel %vm4741_vm5, %v7713_v4, 8  ;;  %v4758_v51 = vsel %vm4742_vm14, %v7713_v4, 8 }
0x214f   :  { %v5361_v0 = vshra.s32 %v7844_v28, 16 }
0x2151   :  { %v7847_v42 = vcvt.s32.f32 %v5361_v0  ;;  %v8889_v0 = vld [vmem:[#allocation95_spill] sm:$0xff] }
0x2152   :  { %vm4743_vm15 = vcmp.eq.f32.partialorder %v8889_v0, %v4699_v55 }
0x2153   :  { %5364 = vmin.xlane.f32.xlu1 %v7847_v42  ;;  %v4759_v30 = vsel %vm4743_vm15, %v7713_v4, 8 }
0x2162   :  { %5441 = vperm.xlu0 %6157, %v5438_v57   ;;  %v4707_v57 = vrot.slane %v7589_v35, %v6921_v33 }
0x2164   :  { %5444 = vperm.xlu1 %6158, %v5439_v32   ;;  %vm4745_vm1 = vcmp.eq.f32.partialorder %v8891_v31, %v4707_v57  ;;  %v4711_v32 = vrot.slane %v7589_v35, %v6932_v38  ;;  %v8896_v35 = vld [vmem:[#allocation82_spill] sm:$0xff] }
0x2165   :  { %v4761_v61 = vsel %vm4745_vm1, %v7713_v4, 8 }
0x2168   :  { %4774 = vperm.xlu1 %6158, %v4751_v49   ;;  %v8892_v49 = vld [vmem:[#allocation98_spill] sm:$0xff] }
0x2169   :  { %vm4746_vm2 = vcmp.eq.f32.partialorder %v8892_v49, %v4711_v32 }
0x216c   :  { %4777 = vperm.xlu1 %6158, %v4752_v3   ;;  %v4762_v3 = vsel %vm4746_vm2, %v7713_v4, 8 }
0x2170   :  { %4780 = vperm.xlu1 %6158, %v4753_v26   ;;  %v8894_v26 = vld [vmem:[#allocation94_spill] sm:$0xff] }
0x2171   :  { %v4201_v9 = vrot.slane %v8894_v26, %v6558_v11  ;;  %v4217_v44 = vrot.slane %v8894_v26, %v6924_v34 }
0x2174   :  { %4783 = vperm.xlu1 %6158, %v4754_v47   ;;  %v4763_v47 = vsel %vm4747_vm4, %v7713_v4, 8 }
0x2178   :  { %4786 = vperm.xlu1 %6158, %v4755_v59   ;;  %v8895_v59 = vld [vmem:[#allocation78_spill] sm:$0xff] }
0x2179   :  { %vm4278_vm5 = vcmp.eq.f32.partialorder %v8895_v59, %v4201_v9 }
0x21e0   :  { %v7876_v36 = vpop.xlane.xlu1 %5364 }
0x21e4   :  { %v7878_v39 = vpop.permute.xlu1 %5444 }
0x21e8   :  { %v4775_v17 = vpop.permute.xlu1 %4774 }
0x21e9   :  { %v4827_v8 = vrot.slane %v4775_v17, %v7021_v43  ;;  %v4209_v17 = vrot.slane %v8894_v26, %v6905_v20 }
0x21eb   :  { %v4878_v5 = vsel %vm2351_vm9, %v4827_v8, %v4877_v41  ;;  %vm4280_vm14 = vcmp.eq.f32.partialorder %v8896_v35, %v4209_v17  ;;  %v4225_v41 = vrot.slane %v8894_v26, %v6932_v38 }
0x21ec   :  { %v4778_v60 = vpop.permute.xlu1 %4777  ;;  %v4296_v12 = vsel %vm4280_vm14, %v7713_v4, 8 }
0x21ed   :  { %v4831_v53 = vrot.slane %v4778_v60, %v7021_v43  ;;  %v4294_v60 = vsel %vm4278_vm5, %v7713_v4, 8 }
0x21ef   :  { %v4879_v24 = vsel %vm2353_vm10, %v4831_v53, %v4878_v5  ;;  %v8898_v53 = vld [vmem:[#allocation86_spill] sm:$0xff] }
0x21f0   :  { %v4781_v22 = vpop.permute.xlu1 %4780  ;;  %vm4282_vm0 = vcmp.eq.f32.partialorder %v8898_v53, %v4217_v44  ;;  %v8900_v5 = vld [vmem:[#allocation90_spill] sm:$0xff]  ;;  %v8903_v44 = vld [vmem:[#allocation93_spill] sm:$0xff] }
0x21f1   :  { %v4835_v1 = vrot.slane %v4781_v22, %v7021_v43  ;;  %v4213_v22 = vrot.slane %v8894_v26, %v6902_v18  ;;  %v4298_v46 = vsel %vm4282_vm0, %v7713_v4, 8  ;;  %vm4284_vm2 = vcmp.eq.f32.partialorder %v8900_v5, %v4225_v41  ;;  %v8905_v41 = vld [vmem:[#allocation79_spill] sm:$0xff]  ;;  %v8906_v5 = vld [vmem:[#allocation81_spill] sm:$0xff] }
0x21f3   :  { %v4880_v19 = vsel %vm2355_vm11, %v4835_v1, %v4879_v24  ;;  %vm4281_vm15 = vcmp.eq.f32.partialorder %v8897_v56, %v4213_v22  ;;  %v8899_v1 = vld [vmem:[#allocation88_spill] sm:$0xff]  ;;  %v4229_v24 = vrot.slane %v8894_v26, %v6929_v37  ;;  %v8902_v56 = vld [vmem:[#allocation77_spill] sm:$0xff] }
0x21f4   :  { %v4784_v63 = vpop.permute.xlu1 %4783  ;;  %v4297_v8 = vsel %vm4281_vm15, %v7713_v4, 8 }
0x21f5   :  { %v4839_v23 = vrot.slane %v4784_v63, %v7021_v43  ;;  %v4221_v63 = vrot.slane %v8894_v26, %v6921_v33 }
0x21f7   :  { %v4881_v48 = vsel %vm2357_vm12, %v4839_v23, %v4880_v19  ;;  %vm4283_vm1 = vcmp.eq.f32.partialorder %v8899_v1, %v4221_v63  ;;  %v8901_v19 = vld [vmem:[#allocation92_spill] sm:$0xff] }
0x21f8   :  { %v4787_v7 = vpop.permute.xlu1 %4786  ;;  %v4299_v23 = vsel %vm4283_vm1, %v7713_v4, 8  ;;  %vm4285_vm4 = vcmp.eq.f32.partialorder %v8901_v19, %v4229_v24  ;;  %v8904_v63 = vld [vmem:[#allocation80_spill] sm:$0xff]  ;;  %v4245_v24 = vrot.slane %v8903_v44, %v6902_v18  ;;  %v8907_v19 = vld [vmem:[#allocation83_spill] sm:$0xff] }
0x21f9   :  { %v4843_v21 = vrot.slane %v4787_v7, %v7021_v43  ;;  %v4300_v7 = vsel %vm4284_vm2, %v7713_v4, 8 }
0x21fa   :  { %vm4289_vm2 = vcmp.eq.f32.partialorder %v8907_v19, %v4245_v24 }
0x21fb   :  { %v4882_v27 = vsel %vm2359_vm13, %v4843_v21, %v4881_v48  ;;  %v4301_v21 = vsel %vm4285_vm4, %v7713_v4, 8  ;;  %v7961_v48 = vpop.xlane.xlu0 %5349 }
0x21fc   :  { %v7899_v40 = vsel %vm2112_vm6, %v4882_v27, 2147483647 }
0x21fd   :  { %v4892_v14 = vshra.s32 %v7899_v40, 16 }
0x21ff   :  { %v7902_v2 = vcvt.s32.f32 %v4892_v14  ;;  %v7963_v27 = vpop.permute.xlu0 %5441  ;;  %v4891_v14 = vand.u32 65535, %v7899_v40  ;;  %v4847_v40 = vrot.slane %v7797_v52, %v7021_v43 }
0x2201   :  { %4895 = vmin.xlane.f32.xlu0 %v7902_v2  ;;  %v4893_v62 = vcvt.s32.f32 %v4891_v14  ;;  %v4305_v14 = vsel %vm4289_vm2, %v7713_v4, 8 }
0x2217   :  { %4792 = vperm.xlu0 %6157, %v4757_v54  }
0x221b   :  { %4795 = vperm.xlu0 %6157, %v4758_v51  }
0x221f   :  { %4798 = vperm.xlu0 %6157, %v4759_v30  }
0x2223   :  { %4801 = vperm.xlu0 %6157, %v4760_v58  }
0x2227   :  { %4804 = vperm.xlu0 %6157, %v4761_v61  }
0x222b   :  { %4807 = vperm.xlu0 %6157, %v4762_v3  }
0x222f   :  { %4810 = vperm.xlu0 %6157, %v4763_v47  }
0x2233   :  { %4311 = vperm.xlu0 %6157, %v4294_v60  }
0x2237   :  { %4317 = vperm.xlu0 %6157, %v4296_v12   ;;  %v4205_v12 = vrot.slane %v8894_v26, %v6564_v13  ;;  %v4241_v26 = vrot.slane %v8903_v44, %v6905_v20 }
0x2239   :  { %vm4279_vm14 = vcmp.eq.f32.partialorder %v8902_v56, %v4205_v12  ;;  %vm4288_vm1 = vcmp.eq.f32.partialorder %v8906_v5, %v4241_v26 }
0x223a   :  { %v4295_v53 = vsel %vm4279_vm14, %v7713_v4, 8 }
0x223b   :  { %4320 = vperm.xlu0 %6157, %v4297_v8   ;;  %v4233_v8 = vrot.slane %v8903_v44, %v6558_v11 }
0x223d   :  { %vm4286_vm15 = vcmp.eq.f32.partialorder %v8904_v63, %v4233_v8 }
0x223e   :  { %v4302_v1 = vsel %vm4286_vm15, %v7713_v4, 8  ;;  %vm5351_vm15 = vcmp.eq.f32.partialorder %v7836_v16, %v7961_v48 }
0x223f   :  { %4323 = vperm.xlu0 %6157, %v4298_v46   ;;  %v4237_v46 = vrot.slane %v8903_v44, %v6564_v13 }
0x2241   :  { %vm4287_vm0 = vcmp.eq.f32.partialorder %v8905_v41, %v4237_v46 }
0x2243   :  { %4326 = vperm.xlu0 %6157, %v4299_v23   ;;  %v4303_v23 = vsel %vm4287_vm0, %v7713_v4, 8 }
0x2247   :  { %4329 = vperm.xlu0 %6157, %v4300_v7   ;;  %v4304_v7 = vsel %vm4288_vm1, %v7713_v4, 8 }
0x224b   :  { %4332 = vperm.xlu0 %6157, %v4301_v21   ;;  %v4249_v21 = vrot.slane %v8903_v44, %v6924_v34 }
0x228e   :  { %v7966_v15 = vpop.xlane.xlu0 %4895 }
0x228f   :  { %vm4897_vm5 = vcmp.eq.f32.partialorder %v7902_v2, %v7966_v15 }
0x2290   :  { %v4898_v54 = vsel %vm4897_vm5, %v4893_v62, inf  ;;  %v8908_v62 = vld [vmem:[#allocation85_spill] sm:$0xff] }
0x2291   :  { %4899 = vmin.xlane.f32.xlu0 %v4898_v54  ;;  %vm4290_vm4 = vcmp.eq.f32.partialorder %v8908_v62, %v4249_v21  ;;  %v4253_v54 = vrot.slane %v8903_v44, %v6921_v33  ;;  %v8912_v21 = vld [vmem:[#allocation76_spill] sm:$0xff] }
0x2292   :  { %v8913_v62 = vld [vmem:[#allocation60_spill] sm:$0xff] }
0x2296   :  { %v4793_v55 = vpop.permute.xlu0 %4792 }
0x2297   :  { %v4851_v10 = vrot.slane %v4793_v55, %v7021_v43  ;;  %v4306_v55 = vsel %vm4290_vm4, %v7713_v4, 8 }
0x2299   :  { %v4883_v2 = vsel %vm2347_vm7, %v4851_v10, %v4847_v40 }
0x229a   :  { %v4796_v51 = vpop.permute.xlu0 %4795 }
0x229b   :  { %v4855_v57 = vrot.slane %v4796_v51, %v7021_v43  ;;  %v8909_v51 = vld [vmem:[#allocation87_spill] sm:$0xff] }
0x229c   :  { %vm4291_vm5 = vcmp.eq.f32.partialorder %v8909_v51, %v4253_v54  ;;  %v3754_v54 = vrot.slane %v8912_v21, %v6905_v20 }
0x229d   :  { %v4884_v49 = vsel %vm2349_vm8, %v4855_v57, %v4883_v2  ;;  %v5345_v57 = vand.u32 65535, %v7830_v45 }
0x229e   :  { %v4799_v0 = vpop.permute.xlu0 %4798 }
0x229f   :  { %v4859_v58 = vrot.slane %v4799_v0, %v7021_v43  ;;  %v4257_v0 = vrot.slane %v8903_v44, %v6932_v38  ;;  %v5347_v40 = vcvt.s32.f32 %v5345_v57  ;;  %v8915_v57 = vld [vmem:[#allocation66_spill] sm:$0xff] }
0x22a1   :  { %v4885_v3 = vsel %vm2351_vm9, %v4859_v58, %v4884_v49  ;;  %v5352_v58 = vsel %vm5351_vm15, %v5347_v40, inf  ;;  %v3762_v40 = vrot.slane %v8912_v21, %v6924_v34 }
0x22a2   :  { %v4802_v29 = vpop.permute.xlu0 %4801 }
0x22a3   :  { %v4863_v31 = vrot.slane %v4802_v29, %v7021_v43  ;;  %v4307_v29 = vsel %vm4291_vm5, %v7713_v4, 8 }
0x22a5   :  { %v4886_v25 = vsel %vm2353_vm10, %v4863_v31, %v4885_v3  ;;  %v4261_v31 = vrot.slane %v8903_v44, %v6929_v37 }
0x22a6   :  { %v4805_v30 = vpop.permute.xlu0 %4804 }
0x22a7   :  { %v4867_v61 = vrot.slane %v4805_v30, %v7021_v43  ;;  %v8910_v30 = vld [vmem:[#allocation89_spill] sm:$0xff] }
0x22a8   :  { %vm4292_vm14 = vcmp.eq.f32.partialorder %v8910_v30, %v4257_v0  ;;  %v8914_v0 = vld [vmem:[#allocation64_spill] sm:$0xff] }
0x22a9   :  { %v4887_v52 = vsel %vm2355_vm11, %v4867_v61, %v4886_v25  ;;  %v4308_v10 = vsel %vm4292_vm14, %v7713_v4, 8  ;;  %vm3825_vm4 = vcmp.eq.f32.partialorder %v8914_v0, %v3754_v54 }
0x22aa   :  { %v4808_v32 = vpop.permute.xlu0 %4807  ;;  %v3841_v30 = vsel %vm3825_vm4, %v7713_v4, 8 }
0x22ab   :  { %v4871_v6 = vrot.slane %v4808_v32, %v7021_v43  ;;  %v8911_v32 = vld [vmem:[#allocation91_spill] sm:$0xff] }
0x22ac   :  { %vm4293_vm0 = vcmp.eq.f32.partialorder %v8911_v32, %v4261_v31  ;;  %v8916_v31 = vld [vmem:[#allocation68_spill] sm:$0xff]  ;;  %v3766_v32 = vrot.slane %v8912_v21, %v6921_v33 }
0x22ad   :  { %v4888_v59 = vsel %vm2357_vm12, %v4871_v6, %v4887_v52  ;;  %v4309_v2 = vsel %vm4293_vm0, %v7713_v4, 8  ;;  %vm3827_vm14 = vcmp.eq.f32.partialorder %v8916_v31, %v3762_v40 }
0x22ae   :  { %v4811_v9 = vpop.permute.xlu0 %4810 }
0x22af   :  { %v4875_v47 = vrot.slane %v4811_v9, %v7021_v43 }
0x22b1   :  { %v4889_v17 = vsel %vm2359_vm13, %v4875_v47, %v4888_v59 }
0x22b2   :  { %v4905_v60 = vsel %vm2112_vm6, %v4889_v17, 2147483647  ;;  %v4312_v61 = vpop.permute.xlu0 %4311 }
0x22b3   :  { %v4907_v35 = vshra.s32 %v4905_v60, 16  ;;  %v4906_v45 = vand.u32 65535, %v4905_v60  ;;  %v4361_v17 = vrot.slane %v4312_v61, %v7021_v43 }
0x22b5   :  { %v4909_v22 = vcvt.s32.f32 %v4907_v35  ;;  %v4908_v16 = vcvt.s32.f32 %v4906_v45  ;;  %v8918_v45 = vld [vmem:[#allocation72_spill] sm:$0xff] }
0x22b6   :  { %v4318_v49 = vpop.permute.xlu0 %4317 }
0x22b7   :  { %4910 = vmin.xlane.f32.xlu1 %v4909_v22  ;;  %v4369_v12 = vrot.slane %v4318_v49, %v7021_v43  ;;  %v8917_v49 = vld [vmem:[#allocation70_spill] sm:$0xff] }
0x22b8   :  { %vm3828_vm15 = vcmp.eq.f32.partialorder %v8917_v49, %v3766_v32  ;;  %v8924_v49 = vld [vmem:[#allocation63_spill] sm:$0xff] }
0x22ba   :  { %v4321_v6 = vpop.permute.xlu0 %4320 }
0x22bb   :  { %v4373_v56 = vrot.slane %v4321_v6, %v7021_v43  ;;  %v3770_v6 = vrot.slane %v8912_v21, %v6932_v38 }
0x22bd   :  { %vm3829_vm0 = vcmp.eq.f32.partialorder %v8918_v45, %v3770_v6 }
0x22be   :  { %v4324_v3 = vpop.permute.xlu0 %4323 }
0x22bf   :  { %v4377_v60 = vrot.slane %v4324_v3, %v7021_v43  ;;  %v3844_v3 = vsel %vm3828_vm15, %v7713_v4, 8 }
0x22c2   :  { %v4327_v25 = vpop.permute.xlu0 %4326 }
0x22c6   :  { %v4330_v52 = vpop.permute.xlu0 %4329 }
0x22c7   :  { %v4385_v46 = vrot.slane %v4330_v52, %v7021_v43  ;;  %v3845_v52 = vsel %vm3829_vm0, %v7713_v4, 8 }
0x22c8   :  { %4314 = vperm.xlu1 %6158, %v4295_v53  }
0x22ca   :  { %v4333_v8 = vpop.permute.xlu0 %4332 }
0x22cb   :  { %v4389_v41 = vrot.slane %v4333_v8, %v7021_v43 }
0x22cc   :  { %4335 = vperm.xlu1 %6158, %v4302_v1  }
0x22d0   :  { %4338 = vperm.xlu1 %6158, %v4303_v23  }
0x22d4   :  { %4341 = vperm.xlu1 %6158, %v4304_v7  }
0x22d8   :  { %4344 = vperm.xlu1 %6158, %v4305_v14   ;;  %v3746_v14 = vrot.slane %v8912_v21, %v6558_v11 }
0x22da   :  { %vm3823_vm2 = vcmp.eq.f32.partialorder %v8913_v62, %v3746_v14 }
0x22dc   :  { %4347 = vperm.xlu1 %6158, %v4306_v55   ;;  %v3839_v55 = vsel %vm3823_vm2, %v7713_v4, 8 }
0x22e0   :  { %4350 = vperm.xlu1 %6158, %v4307_v29   ;;  %v3758_v29 = vrot.slane %v8912_v21, %v6902_v18 }
0x22e2   :  { %vm3826_vm5 = vcmp.eq.f32.partialorder %v8915_v57, %v3758_v29  ;;  %v3750_v29 = vrot.slane %v8912_v21, %v6564_v13 }
0x22e4   :  { %4353 = vperm.xlu1 %6158, %v4308_v10  }
0x2308   :  { %5353 = vmin.xlane.f32.xlu1 %v5352_v58  ;;  %v3842_v58 = vsel %vm3826_vm5, %v7713_v4, 8 }
0x2319   :  { %4356 = vperm.xlu1 %6158, %v4309_v2   ;;  %v3843_v2 = vsel %vm3827_vm14, %v7713_v4, 8 }
0x2344   :  { %v8026_v9 = vpop.xlane.xlu1 %4910 }
0x2345   :  { %vm4912_vm1 = vcmp.eq.f32.partialorder %v4909_v22, %v8026_v9  ;;  %v4381_v22 = vrot.slane %v4327_v25, %v7021_v43 }
0x2346   :  { %v4913_v47 = vsel %vm4912_vm1, %v4908_v16, inf  ;;  %v3774_v16 = vrot.slane %v8912_v21, %v6929_v37 }
0x2347   :  { %4914 = vmin.xlane.f32.xlu1 %v4913_v47  ;;  %v8919_v47 = vld [vmem:[#allocation74_spill] sm:$0xff] }
0x2348   :  { %v4315_v59 = vpop.permute.xlu1 %4314  ;;  %vm3830_vm1 = vcmp.eq.f32.partialorder %v8919_v47, %v3774_v16 }
0x2349   :  { %v4365_v35 = vrot.slane %v4315_v59, %v7021_v43  ;;  %v3846_v59 = vsel %vm3830_vm1, %v7713_v4, 8 }
0x234b   :  { %v4422_v44 = vsel %vm2347_vm7, %v4365_v35, %v4361_v17 }
0x234c   :  { %v4423_v53 = vsel %vm2349_vm8, %v4369_v12, %v4422_v44  ;;  %v4336_v51 = vpop.permute.xlu1 %4335 }
0x234d   :  { %v4424_v63 = vsel %vm2351_vm9, %v4373_v56, %v4423_v53 }
0x234e   :  { %v4425_v1 = vsel %vm2353_vm10, %v4377_v60, %v4424_v63  ;;  %v4393_v60 = vrot.slane %v4336_v51, %v7021_v43 }
0x234f   :  { %v4426_v26 = vsel %vm2355_vm11, %v4381_v22, %v4425_v1 }
0x2350   :  { %v4427_v23 = vsel %vm2357_vm12, %v4385_v46, %v4426_v26  ;;  %v4339_v10 = vpop.permute.xlu1 %4338 }
0x2351   :  { %v4428_v5 = vsel %vm2359_vm13, %v4389_v41, %v4427_v23  ;;  %v4397_v56 = vrot.slane %v4339_v10, %v7021_v43  ;;  %v8921_v10 = vld [vmem:[#allocation75_spill] sm:$0xff] }
0x2352   :  { %v8045_v24 = vsel %vm2112_vm6, %v4428_v5, 2147483647  ;;  %v3778_v57 = vrot.slane %v8921_v10, %v6558_v11  ;;  %v3782_v31 = vrot.slane %v8921_v10, %v6564_v13  ;;  %v3786_v21 = vrot.slane %v8921_v10, %v6905_v20 }
0x2353   :  { %v4438_v7 = vshra.s32 %v8045_v24, 16  ;;  %v4429_v63 = vsel %vm2347_vm7, %v4397_v56, %v4393_v60  ;;  %v3790_v6 = vrot.slane %v8921_v10, %v6902_v18  ;;  %v3794_v45 = vrot.slane %v8921_v10, %v6924_v34  ;;  %v8928_v56 = vld [vmem:[#allocation71_spill] sm:$0xff] }
0x2354   :  { %v4342_v61 = vpop.permute.xlu1 %4341  ;;  %vm3833_vm14 = vcmp.eq.f32.partialorder %v8924_v49, %v3786_v21  ;;  %v3798_v47 = vrot.slane %v8921_v10, %v6921_v33 }
0x2355   :  { %v8048_v19 = vcvt.s32.f32 %v4438_v7  ;;  %v4401_v44 = vrot.slane %v4342_v61, %v7021_v43 }
0x2357   :  { %4441 = vmin.xlane.f32.xlu0 %v8048_v19  ;;  %v4430_v1 = vsel %vm2349_vm8, %v4401_v44, %v4429_v63  ;;  %v3806_v44 = vrot.slane %v8921_v10, %v6929_v37  ;;  %v5453_v63 = vrot.slane %v7878_v39, %v7021_v43 }
0x2358   :  { %v4345_v25 = vpop.permute.xlu1 %4344 }
0x2359   :  { %v4405_v8 = vrot.slane %v4345_v25, %v7021_v43  ;;  %v8925_v25 = vld [vmem:[#allocation65_spill] sm:$0xff] }
0x235a   :  { %vm3834_vm15 = vcmp.eq.f32.partialorder %v8925_v25, %v3790_v6 }
0x235b   :  { %v4431_v26 = vsel %vm2351_vm9, %v4405_v8, %v4430_v1  ;;  %v3850_v16 = vsel %vm3834_vm15, %v7713_v4, 8  ;;  %v8929_v8 = vld [vmem:[#allocation73_spill] sm:$0xff]  ;;  %v4437_v1 = vand.u32 65535, %v8045_v24 }
0x235c   :  { %v4348_v17 = vpop.permute.xlu1 %4347 }
0x235d   :  { %v4409_v53 = vrot.slane %v4348_v17, %v7021_v43  ;;  %v8927_v17 = vld [vmem:[#allocation69_spill] sm:$0xff] }
0x235e   :  { %vm3836_vm1 = vcmp.eq.f32.partialorder %v8927_v17, %v3798_v47 }
0x235f   :  { %v4432_v23 = vsel %vm2353_vm10, %v4409_v53, %v4431_v26 }
0x2360   :  { %v4351_v35 = vpop.permute.xlu1 %4350 }
0x2361   :  { %v4413_v46 = vrot.slane %v4351_v35, %v7021_v43  ;;  %v3802_v35 = vrot.slane %v8921_v10, %v6932_v38 }
0x2363   :  { %v4433_v7 = vsel %vm2355_vm11, %v4413_v46, %v4432_v23  ;;  %v8141_v46 = vpop.xlane.xlu0 %4899 }
0x2364   :  { %v4354_v12 = vpop.permute.xlu1 %4353 }
0x2365   :  { %v4417_v41 = vrot.slane %v4354_v12, %v7021_v43  ;;  %v3852_v12 = vsel %vm3836_vm1, %v7713_v4, 8 }
0x2367   :  { %v4434_v62 = vsel %vm2357_vm12, %v4417_v41, %v4433_v7  ;;  %v5449_v41 = vrot.slane %v7963_v27, %v7021_v43  ;;  %v5360_v7 = vand.u32 65535, %v7844_v28 }
0x2369   :  { %v5454_v26 = vsel %vm2347_vm7, %v5453_v63, %v5449_v41  ;;  %v5362_v24 = vcvt.s32.f32 %v5360_v7 }
0x236a   :  { %v8153_v39 = vsel %vm5421_vm3, %v5454_v26, 2147483647 }
0x236b   :  { %v5457_v27 = vshra.s32 %v8153_v39, 16 }
0x236d   :  { %3856 = vperm.xlu0 %6157, %v3839_v55  }
0x2371   :  { %3862 = vperm.xlu0 %6157, %v3841_v30   ;;  %v8920_v30 = vld [vmem:[#allocation59_spill] sm:$0xff] }
0x2372   :  { %vm3824_vm2 = vcmp.eq.f32.partialorder %v8920_v30, %v3750_v29 }
0x2373   :  { %v3840_v40 = vsel %vm3824_vm2, %v7713_v4, 8  ;;  %vm3837_vm2 = vcmp.eq.f32.partialorder %v8928_v56, %v3802_v35 }
0x2374   :  { %v3853_v60 = vsel %vm3837_vm2, %v7713_v4, 8 }
0x2375   :  { %3865 = vperm.xlu0 %6157, %v3842_v58   ;;  %v8922_v58 = vld [vmem:[#allocation62_spill] sm:$0xff] }
0x2376   :  { %vm3831_vm4 = vcmp.eq.f32.partialorder %v8922_v58, %v3778_v57 }
0x2377   :  { %v3847_v32 = vsel %vm3831_vm4, %v7713_v4, 8  ;;  %vm3838_vm4 = vcmp.eq.f32.partialorder %v8929_v8, %v3806_v44 }
0x2378   :  { %v3854_v53 = vsel %vm3838_vm4, %v7713_v4, 8 }
0x2379   :  { %3868 = vperm.xlu0 %6157, %v3843_v2   ;;  %v8923_v2 = vld [vmem:[#allocation61_spill] sm:$0xff] }
0x237a   :  { %vm3832_vm5 = vcmp.eq.f32.partialorder %v8923_v2, %v3782_v31 }
0x237b   :  { %v3848_v61 = vsel %vm3832_vm5, %v7713_v4, 8 }
0x237d   :  { %3871 = vperm.xlu0 %6157, %v3844_v3   ;;  %v3849_v3 = vsel %vm3833_vm14, %v7713_v4, 8  ;;  %vm5366_vm14 = vcmp.eq.f32.partialorder %v7847_v42, %v7876_v36 }
0x2381   :  { %3874 = vperm.xlu0 %6157, %v3845_v52   ;;  %v8926_v52 = vld [vmem:[#allocation67_spill] sm:$0xff] }
0x2382   :  { %vm3835_vm0 = vcmp.eq.f32.partialorder %v8926_v52, %v3794_v45 }
0x2385   :  { %3877 = vperm.xlu0 %6157, %v3846_v59   ;;  %v3851_v59 = vsel %vm3835_vm0, %v7713_v4, 8 }
0x2395   :  { %v8084_v22 = vpop.xlane.xlu1 %5353 }
0x2399   :  { %v4357_v5 = vpop.permute.xlu1 %4356 }
0x239a   :  { %v4421_v14 = vrot.slane %v4357_v5, %v7021_v43  ;;  %v4439_v5 = vcvt.s32.f32 %v4437_v1 }
0x239c   :  { %v4435_v54 = vsel %vm2359_vm13, %v4421_v14, %v4434_v62  ;;  %v5367_v62 = vsel %vm5366_vm14, %v5362_v24, inf }
0x239d   :  { %v8097_v55 = vsel %vm2112_vm6, %v4435_v54, 2147483647  ;;  %v8158_v54 = vcvt.s32.f32 %v5457_v27 }
0x239e   :  { %v4453_v51 = vshra.s32 %v8097_v55, 16  ;;  %v4452_v57 = vand.u32 65535, %v8097_v55 }
0x23a0   :  { %v8100_v0 = vcvt.s32.f32 %v4453_v51  ;;  %v4454_v42 = vcvt.s32.f32 %v4452_v57 }
0x23a2   :  { %4456 = vmin.xlane.f32.xlu1 %v8100_v0 }
0x23b3   :  { %3859 = vperm.xlu1 %6158, %v3840_v40  }
0x23b7   :  { %3880 = vperm.xlu1 %6158, %v3847_v32  }
0x23bb   :  { %3883 = vperm.xlu1 %6158, %v3848_v61  }
0x23bf   :  { %3886 = vperm.xlu1 %6158, %v3849_v3  }
0x23c3   :  { %3889 = vperm.xlu1 %6158, %v3850_v16  }
0x23c7   :  { %3892 = vperm.xlu1 %6158, %v3851_v59  }
0x23cb   :  { %3895 = vperm.xlu1 %6158, %v3852_v12  }
0x23cf   :  { %3898 = vperm.xlu1 %6158, %v3853_v60  }
0x23d3   :  { %3901 = vperm.xlu1 %6158, %v3854_v53  }
0x23d4   :  { %v8161_v30 = vpop.xlane.xlu1 %4914 }
0x23e4   :  { %v8147_v23 = vpop.xlane.xlu0 %4441 }
0x23e5   :  { %vm4443_vm5 = vcmp.eq.f32.partialorder %v8048_v19, %v8147_v23 }
0x23e6   :  { %v4444_v14 = vsel %vm4443_vm5, %v4439_v5, inf }
0x23e7   :  { %4445 = vmin.xlane.f32.xlu0 %v4444_v14 }
0x23eb   :  { %5368 = vmin.xlane.f32.xlu0 %v5367_v62 }
0x23ec   :  { %v3857_v28 = vpop.permute.xlu0 %3856 }
0x23ed   :  { %v3906_v2 = vrot.slane %v3857_v28, %v7021_v43 }
0x23ef   :  { %5460 = vmin.xlane.f32.xlu0 %v8158_v54 }
0x23f0   :  { %v3863_v51 = vpop.permute.xlu0 %3862 }
0x23f1   :  { %v3914_v61 = vrot.slane %v3863_v51, %v7021_v43 }
0x23f4   :  { %v3866_v19 = vpop.permute.xlu0 %3865 }
0x23f5   :  { %v3918_v49 = vrot.slane %v3866_v19, %v7021_v43 }
0x23f8   :  { %v3869_v29 = vpop.permute.xlu0 %3868 }
0x23f9   :  { %v3922_v6 = vrot.slane %v3869_v29, %v7021_v43 }
0x23fc   :  { %v3872_v10 = vpop.permute.xlu0 %3871 }
0x23fd   :  { %v3926_v45 = vrot.slane %v3872_v10, %v7021_v43  ;;  %v8930_v10 = vld [vmem:[#allocation58_spill] sm:$0xff] }
0x23fe   :  { %v3292_v57 = vrot.slane %v8930_v10, %v6558_v11 }
0x2400   :  { %v3875_v58 = vpop.permute.xlu0 %3874 }
0x2401   :  { %v3930_v52 = vrot.slane %v3875_v58, %v7021_v43 }
0x2404   :  { %v3878_v3 = vpop.permute.xlu0 %3877 }
0x2405   :  { %v3934_v59 = vrot.slane %v3878_v3, %v7021_v43 }
0x242f   :  { %v8164_v40 = vpop.xlane.xlu1 %4456 }
0x2430   :  { %vm4458_vm15 = vcmp.eq.f32.partialorder %v8100_v0, %v8164_v40 }
0x2431   :  { %v4459_v31 = vsel %vm4458_vm15, %v4454_v42, inf }
0x2432   :  { %4460 = vmin.xlane.f32.xlu1 %v4459_v31 }
0x2433   :  { %v3860_v32 = vpop.permute.xlu1 %3859 }
0x2434   :  { %v3910_v21 = vrot.slane %v3860_v32, %v7021_v43 }
0x2436   :  { %v3967_v55 = vsel %vm2347_vm7, %v3910_v21, %v3906_v2 }
0x2437   :  { %v3968_v25 = vsel %vm2349_vm8, %v3914_v61, %v3967_v55  ;;  %v3881_v0 = vpop.permute.xlu1 %3880  ;;  %v8931_v61 = vld [vmem:[#allocation42_spill] sm:$0xff] }
0x2438   :  { %v3969_v16 = vsel %vm2351_vm9, %v3918_v49, %v3968_v25  ;;  %v3938_v7 = vrot.slane %v3881_v0, %v7021_v43  ;;  %vm3369_vm0 = vcmp.eq.f32.partialorder %v8931_v61, %v3292_v57  ;;  %v3300_v49 = vrot.slane %v8930_v10, %v6905_v20  ;;  %v8932_v0 = vld [vmem:[#allocation46_spill] sm:$0xff] }
0x2439   :  { %v3970_v47 = vsel %vm2353_vm10, %v3922_v6, %v3969_v16  ;;  %v3385_v55 = vsel %vm3369_vm0, %v7713_v4, 8 }
0x243a   :  { %v3971_v17 = vsel %vm2355_vm11, %v3926_v45, %v3970_v47  ;;  %vm3371_vm1 = vcmp.eq.f32.partialorder %v8932_v0, %v3300_v49  ;;  %v3304_v45 = vrot.slane %v8930_v10, %v6902_v18  ;;  %v3308_v47 = vrot.slane %v8930_v10, %v6924_v34 }
0x243b   :  { %v3884_v35 = vpop.permute.xlu1 %3883  ;;  %v3972_v12 = vsel %vm2357_vm12, %v3930_v52, %v3971_v17  ;;  %v3387_v16 = vsel %vm3371_vm1, %v7713_v4, 8  ;;  %v8933_v52 = vld [vmem:[#allocation48_spill] sm:$0xff]  ;;  %v8934_v17 = vld [vmem:[#allocation50_spill] sm:$0xff]  ;;  %v5456_v49 = vand.u32 65535, %v8153_v39 }
0x243c   :  { %v3973_v56 = vsel %vm2359_vm13, %v3934_v59, %v3972_v12  ;;  %v3942_v26 = vrot.slane %v3884_v35, %v7021_v43  ;;  %vm3372_vm2 = vcmp.eq.f32.partialorder %v8933_v52, %v3304_v45  ;;  %vm3373_vm4 = vcmp.eq.f32.partialorder %v8934_v17, %v3308_v47  ;;  %v8944_v52 = vld [vmem:[#allocation53_spill] sm:$0xff] }
0x243d   :  { %v8184_v44 = vsel %vm2112_vm6, %v3973_v56, 2147483647  ;;  %v3388_v59 = vsel %vm3372_vm2, %v7713_v4, 8  ;;  %v3312_v35 = vrot.slane %v8930_v10, %v6921_v33  ;;  %v3389_v12 = vsel %vm3373_vm4, %v7713_v4, 8  ;;  %v8935_v56 = vld [vmem:[#allocation52_spill] sm:$0xff] }
0x243e   :  { %v3983_v60 = vshra.s32 %v8184_v44, 16  ;;  %v3974_v62 = vsel %vm2347_vm7, %v3942_v26, %v3938_v7  ;;  %v5458_v45 = vcvt.s32.f32 %v5456_v49  ;;  %v3316_v17 = vrot.slane %v8930_v10, %v6932_v38 }
0x243f   :  { %v3887_v8 = vpop.permute.xlu1 %3886  ;;  %vm3374_vm5 = vcmp.eq.f32.partialorder %v8935_v56, %v3312_v35  ;;  %v8946_v35 = vld [vmem:[#allocation54_spill] sm:$0xff]  ;;  %v4448_v56 = vcvt.f32.s32 %v8147_v23 }
0x2440   :  { %v8187_v53 = vcvt.s32.f32 %v3983_v60  ;;  %v3946_v5 = vrot.slane %v3887_v8, %v7021_v43  ;;  %v3390_v60 = vsel %vm3374_vm5, %v7713_v4, 8  ;;  %v3296_v8 = vrot.slane %v8930_v10, %v6564_v13 }
0x2442   :  { %3986 = vmin.xlane.f32.xlu0 %v8187_v53  ;;  %v3975_v51 = vsel %vm2349_vm8, %v3946_v5, %v3974_v62  ;;  %v8938_v5 = vld [vmem:[#allocation44_spill] sm:$0xff] }
0x2443   :  { %v3890_v63 = vpop.permute.xlu1 %3889 }
0x2444   :  { %v3950_v14 = vrot.slane %v3890_v63, %v7021_v43  ;;  %v8936_v63 = vld [vmem:[#allocation41_spill] sm:$0xff] }
0x2445   :  { %vm3370_vm14 = vcmp.eq.f32.partialorder %v8936_v63, %v3296_v8  ;;  %v4449_v63 = vshll.u32 %v4448_v56, 16 }
0x2446   :  { %v3976_v29 = vsel %vm2351_vm9, %v3950_v14, %v3975_v51  ;;  %v3386_v26 = vsel %vm3370_vm14, %v7713_v4, 8  ;;  %v8940_v51 = vld [vmem:[#allocation45_spill] sm:$0xff] }
0x2447   :  { %v3893_v1 = vpop.permute.xlu1 %3892 }
0x2448   :  { %v3954_v24 = vrot.slane %v3893_v1, %v7021_v43  ;;  %v8937_v1 = vld [vmem:[#allocation57_spill] sm:$0xff] }
0x2449   :  { %v3328_v7 = vrot.slane %v8937_v1, %v6564_v13  ;;  %v3352_v39 = vrot.slane %v8937_v1, %v6929_v37 }
0x244a   :  { %v3977_v42 = vsel %vm2353_vm10, %v3954_v24, %v3976_v29  ;;  %v8939_v24 = vld [vmem:[#allocation43_spill] sm:$0xff] }
0x244b   :  { %v3896_v41 = vpop.permute.xlu1 %3895  ;;  %vm3378_vm0 = vcmp.eq.f32.partialorder %v8939_v24, %v3328_v7 }
0x244c   :  { %v3958_v28 = vrot.slane %v3896_v41, %v7021_v43  ;;  %v3324_v41 = vrot.slane %v8937_v1, %v6558_v11 }
0x244e   :  { %v3978_v31 = vsel %vm2355_vm11, %v3958_v28, %v3977_v42  ;;  %vm3377_vm15 = vcmp.eq.f32.partialorder %v8938_v5, %v3324_v41  ;;  %v3394_v28 = vsel %vm3378_vm0, %v7713_v4, 8  ;;  %v8941_v42 = vld [vmem:[#allocation47_spill] sm:$0xff] }
0x244f   :  { %v3899_v27 = vpop.permute.xlu1 %3898  ;;  %v3393_v14 = vsel %vm3377_vm15, %v7713_v4, 8 }
0x2450   :  { %v3962_v19 = vrot.slane %v3899_v27, %v7021_v43  ;;  %v3332_v27 = vrot.slane %v8937_v1, %v6905_v20 }
0x2452   :  { %v3979_v2 = vsel %vm2357_vm12, %v3962_v19, %v3978_v31  ;;  %vm3379_vm1 = vcmp.eq.f32.partialorder %v8940_v51, %v3332_v27  ;;  %v3336_v19 = vrot.slane %v8937_v1, %v6902_v18 }
0x2453   :  { %v3902_v58 = vpop.permute.xlu1 %3901  ;;  %v3395_v29 = vsel %vm3379_vm1, %v7713_v4, 8  ;;  %vm3375_vm1 = vcmp.eq.f32.partialorder %v8946_v35, %v3316_v17 }
0x2454   :  { %v3966_v32 = vrot.slane %v3902_v58, %v7021_v43  ;;  %vm3380_vm2 = vcmp.eq.f32.partialorder %v8941_v42, %v3336_v19  ;;  %v3340_v58 = vrot.slane %v8937_v1, %v6924_v34 }
0x2455   :  { %v3396_v31 = vsel %vm3380_vm2, %v7713_v4, 8 }
0x2456   :  { %v3980_v21 = vsel %vm2359_vm13, %v3966_v32, %v3979_v2  ;;  %v8942_v32 = vld [vmem:[#allocation49_spill] sm:$0xff]  ;;  %v3344_v2 = vrot.slane %v8937_v1, %v6921_v33 }
0x2457   :  { %v8212_v6 = vsel %vm2112_vm6, %v3980_v21, 2147483647  ;;  %vm3381_vm4 = vcmp.eq.f32.partialorder %v8942_v32, %v3340_v58 }
0x2458   :  { %3402 = vperm.xlu0 %6157, %v3385_v55   ;;  %v3998_v3 = vshra.s32 %v8212_v6, 16  ;;  %v3397_v61 = vsel %vm3381_vm4, %v7713_v4, 8  ;;  %v8943_v55 = vld [vmem:[#allocation51_spill] sm:$0xff]  ;;  %v3997_v42 = vand.u32 65535, %v8212_v6 }
0x2459   :  { %vm3382_vm14 = vcmp.eq.f32.partialorder %v8943_v55, %v3344_v2 }
0x245a   :  { %v8215_v25 = vcvt.s32.f32 %v3998_v3  ;;  %v3348_v3 = vrot.slane %v8937_v1, %v6932_v38  ;;  %v3398_v0 = vsel %vm3382_vm14, %v7713_v4, 8  ;;  %v3999_v32 = vcvt.s32.f32 %v3997_v42 }
0x245c   :  { %4001 = vmin.xlane.f32.xlu1 %v8215_v25  ;;  %3408 = vperm.xlu0 %6157, %v3387_v16   ;;  %vm3383_vm15 = vcmp.eq.f32.partialorder %v8944_v52, %v3348_v3 }
0x245d   :  { %v3399_v47 = vsel %vm3383_vm15, %v7713_v4, 8 }
0x2460   :  { %3411 = vperm.xlu0 %6157, %v3388_v59  }
0x2464   :  { %3414 = vperm.xlu0 %6157, %v3389_v12   ;;  %v3391_v12 = vsel %vm3375_vm1, %v7713_v4, 8 }
0x2468   :  { %3417 = vperm.xlu0 %6157, %v3390_v60   ;;  %v4463_v60 = vcvt.f32.s32 %v8164_v40 }
0x246a   :  { %v4464_v41 = vshll.u32 %v4463_v60, 16 }
0x246d   :  { %3405 = vperm.xlu1 %6158, %v3386_v26  }
0x2471   :  { %3426 = vperm.xlu1 %6158, %v3393_v14  }
0x2474   :  { %v4446_v62 = vpop.xlane.xlu0 %4445 }
0x2475   :  { %3429 = vperm.xlu1 %6158, %v3394_v28   ;;  %v4447_v8 = vcvt.f32.s32 %v4446_v62  ;;  %v3982_v28 = vand.u32 65535, %v8184_v44 }
0x2477   :  { %v4450_v26 = vadd.s32 %v4449_v63, %v4447_v8  ;;  %v3984_v23 = vcvt.s32.f32 %v3982_v28 }
0x2478   :  { %v8250_v57 = vpop.xlane.xlu0 %5368 }
0x2479   :  { %3432 = vperm.xlu1 %6158, %v3395_v29   ;;  %v5524_v14 = vrot.slane %v4450_v26, %v7021_v43 }
0x247c   :  { %v8259_v21 = vpop.xlane.xlu0 %5460 }
0x247d   :  { %3435 = vperm.xlu1 %6158, %v3396_v31   ;;  %vm5462_vm5 = vcmp.eq.f32.partialorder %v8158_v54, %v8259_v21  ;;  %v8945_v54 = vld [vmem:[#allocation55_spill] sm:$0xff] }
0x247e   :  { %v5463_v16 = vsel %vm5462_vm5, %v5458_v45, inf  ;;  %vm3384_vm0 = vcmp.eq.f32.partialorder %v8945_v54, %v3352_v39 }
0x247f   :  { %v3400_v59 = vsel %vm3384_vm0, %v7713_v4, 8 }
0x2481   :  { %3438 = vperm.xlu1 %6158, %v3397_v61  }
0x2485   :  { %3441 = vperm.xlu1 %6158, %v3398_v0  }
0x2487   :  { %5464 = vmin.xlane.f32.xlu0 %v5463_v16 }
0x2489   :  { %3444 = vperm.xlu1 %6158, %v3399_v47  }
0x248d   :  { %3447 = vperm.xlu1 %6158, %v3400_v59  }
0x249d   :  { %3420 = vperm.xlu0 %6157, %v3391_v12  }
0x24bf   :  { %v4461_v1 = vpop.xlane.xlu1 %4460 }
0x24c0   :  { %v4462_v5 = vcvt.f32.s32 %v4461_v1 }
0x24c2   :  { %v4465_v7 = vadd.s32 %v4464_v41, %v4462_v5 }
0x24c4   :  { %v5528_v24 = vrot.slane %v4465_v7, %v7021_v43  ;;  %v5371_v7 = vcvt.f32.s32 %v7876_v36  ;;  %v5355_v36 = vcvt.f32.s32 %v8084_v22 }
0x24c6   :  { %v8284_v27 = vsel %vm2347_vm7, %v5528_v24, %v5524_v14 }
0x24cf   :  { %v8287_v51 = vpop.xlane.xlu0 %3986 }
0x24d0   :  { %vm3988_vm2 = vcmp.eq.f32.partialorder %v8187_v53, %v8287_v51 }
0x24d1   :  { %v8291_v40 = vsel %vm3988_vm2, %v3984_v23, inf  ;;  %v5356_v23 = vcvt.f32.s32 %v7961_v48  ;;  %v5467_v48 = vcvt.f32.s32 %v8259_v21 }
0x24d3   :  { %v5468_v22 = vshll.u32 %v5467_v48, 16 }
0x24d7   :  { %v3403_v62 = vpop.permute.xlu0 %3402 }
0x24d8   :  { %v3452_v61 = vrot.slane %v3403_v62, %v7021_v43  ;;  %v5370_v62 = vcvt.f32.s32 %v8250_v57 }
0x24db   :  { %v3409_v19 = vpop.permute.xlu0 %3408 }
0x24dc   :  { %v3460_v49 = vrot.slane %v3409_v19, %v7021_v43 }
0x24df   :  { %v3412_v29 = vpop.permute.xlu0 %3411 }
0x24e0   :  { %v3464_v3 = vrot.slane %v3412_v29, %v7021_v43 }
0x24e3   :  { %v3415_v58 = vpop.permute.xlu0 %3414 }
0x24e4   :  { %v3468_v0 = vrot.slane %v3415_v58, %v7021_v43 }
0x24e7   :  { %v3418_v55 = vpop.permute.xlu0 %3417 }
0x24e9   :  { %v8294_v31 = vpop.xlane.xlu1 %4001 }
0x24ea   :  { %vm4003_vm4 = vcmp.eq.f32.partialorder %v8215_v25, %v8294_v31  ;;  %v3472_v25 = vrot.slane %v3418_v55, %v7021_v43 }
0x24eb   :  { %v4004_v44 = vsel %vm4003_vm4, %v3999_v32, inf  ;;  %v5372_v32 = vshll.u32 %v5371_v7, 16  ;;  %v8951_v7 = vld [vmem:[#allocation25_spill] sm:$0xff] }
0x24ec   :  { %4005 = vmin.xlane.f32.xlu1 %v4004_v44 }
0x24ed   :  { %v3406_v2 = vpop.permute.xlu1 %3405 }
0x24ee   :  { %v3456_v53 = vrot.slane %v3406_v2, %v7021_v43 }
0x24f0   :  { %v3513_v6 = vsel %vm2347_vm7, %v3456_v53, %v3452_v61  ;;  %v5357_v61 = vshll.u32 %v5356_v23, 16  ;;  %v5373_v53 = vadd.s32 %v5372_v32, %v5370_v62  ;;  %v8954_v32 = vld [vmem:[#allocation56_spill] sm:$0xff] }
0x24f1   :  { %v3514_v45 = vsel %vm2349_vm8, %v3460_v49, %v3513_v6  ;;  %v3427_v16 = vpop.permute.xlu1 %3426 }
0x24f2   :  { %v3515_v52 = vsel %vm2351_vm9, %v3464_v3, %v3514_v45  ;;  %v3484_v8 = vrot.slane %v3427_v16, %v7021_v43  ;;  %v5358_v55 = vadd.s32 %v5357_v61, %v5355_v36  ;;  %v8956_v61 = vld [vmem:[#allocation33_spill] sm:$0xff] }
0x24f3   :  { %v3516_v39 = vsel %vm2353_vm10, %v3468_v0, %v3515_v52  ;;  %v5480_v0 = vrot.slane %v5373_v53, %v7021_v43 }
0x24f4   :  { %v8309_v47 = vsel %vm2355_vm11, %v3472_v25, %v3516_v39  ;;  %v5476_v16 = vrot.slane %v5358_v55, %v7021_v43 }
0x24f5   :  { %v3430_v54 = vpop.permute.xlu1 %3429 }
0x24f6   :  { %v3488_v56 = vrot.slane %v3430_v54, %v7021_v43  ;;  %v5481_v21 = vsel %vm2347_vm7, %v5480_v0, %v5476_v16  ;;  %v8958_v0 = vld [vmem:[#allocation37_spill] sm:$0xff] }
0x24f8   :  { %v3520_v26 = vsel %vm2347_vm7, %v3488_v56, %v3484_v8  ;;  %v8949_v8 = vld [vmem:[#allocation39_spill] sm:$0xff] }
0x24f9   :  { %v3433_v59 = vpop.permute.xlu1 %3432  ;;  %v2882_v23 = vrot.slane %v8949_v8, %v6902_v18  ;;  %v2894_v53 = vrot.slane %v8949_v8, %v6932_v38  ;;  %v2898_v55 = vrot.slane %v8949_v8, %v6929_v37 }
0x24fa   :  { %v3492_v60 = vrot.slane %v3433_v59, %v7021_v43 }
0x24fc   :  { %v3521_v14 = vsel %vm2349_vm8, %v3492_v60, %v3520_v26  ;;  %v8948_v60 = vld [vmem:[#allocation23_spill] sm:$0xff]  ;;  %v2874_v26 = vrot.slane %v8949_v8, %v6564_v13 }
0x24fd   :  { %v3436_v17 = vpop.permute.xlu1 %3435 }
0x24fe   :  { %v3496_v63 = vrot.slane %v3436_v17, %v7021_v43  ;;  %vm2924_vm0 = vcmp.eq.f32.partialorder %v8951_v7, %v2874_v26 }
0x2500   :  { %v3522_v28 = vsel %vm2351_vm9, %v3496_v63, %v3521_v14  ;;  %v2870_v63 = vrot.slane %v8949_v8, %v6558_v11  ;;  %v2878_v14 = vrot.slane %v8949_v8, %v6905_v20 }
0x2501   :  { %v3439_v35 = vpop.permute.xlu1 %3438 }
0x2502   :  { %v3500_v1 = vrot.slane %v3439_v35, %v7021_v43  ;;  %v8947_v35 = vld [vmem:[#allocation40_spill] sm:$0xff] }
0x2504   :  { %v3523_v19 = vsel %vm2353_vm10, %v3500_v1, %v3522_v28  ;;  %v8952_v28 = vld [vmem:[#allocation27_spill] sm:$0xff] }
0x2505   :  { %v3442_v12 = vpop.permute.xlu1 %3441  ;;  %vm2925_vm1 = vcmp.eq.f32.partialorder %v8952_v28, %v2878_v14 }
0x2506   :  { %v3504_v5 = vrot.slane %v3442_v12, %v7021_v43  ;;  %v2842_v12 = vrot.slane %v8947_v35, %v6564_v13  ;;  %v2941_v62 = vsel %vm2925_vm1, %v7713_v4, 8 }
0x2508   :  { %v3524_v42 = vsel %vm2355_vm11, %v3504_v5, %v3523_v19  ;;  %vm2916_vm14 = vcmp.eq.f32.partialorder %v8948_v60, %v2842_v12  ;;  %v3320_v19 = vrot.slane %v8930_v10, %v6929_v37 }
0x2509   :  { %v3445_v41 = vpop.permute.xlu1 %3444  ;;  %v2932_v1 = vsel %vm2916_vm14, %v7713_v4, 8 }
0x250a   :  { %v3508_v24 = vrot.slane %v3445_v41, %v7021_v43  ;;  %v8950_v41 = vld [vmem:[#allocation26_spill] sm:$0xff]  ;;  %vm3376_vm4 = vcmp.eq.f32.partialorder %v8954_v32, %v3320_v19 }
0x250b   :  { %vm2923_vm15 = vcmp.eq.f32.partialorder %v8950_v41, %v2870_v63  ;;  %v3392_v36 = vsel %vm3376_vm4, %v7713_v4, 8 }
0x250c   :  { %v3525_v44 = vsel %vm2357_vm12, %v3508_v24, %v3524_v42  ;;  %v2939_v5 = vsel %vm2923_vm15, %v7713_v4, 8  ;;  %v2940_v24 = vsel %vm2924_vm0, %v7713_v4, 8  ;;  %v2886_v42 = vrot.slane %v8949_v8, %v6924_v34 }
0x250d   :  { %v3448_v29 = vpop.permute.xlu1 %3447  ;;  %vm2930_vm0 = vcmp.eq.f32.partialorder %v8958_v0, %v2898_v55 }
0x250e   :  { %v3512_v58 = vrot.slane %v3448_v29, %v7021_v43  ;;  %v8953_v29 = vld [vmem:[#allocation29_spill] sm:$0xff] }
0x250f   :  { %vm2926_vm2 = vcmp.eq.f32.partialorder %v8953_v29, %v2882_v23 }
0x2510   :  { %v3526_v2 = vsel %vm2359_vm13, %v3512_v58, %v3525_v44  ;;  %v2942_v58 = vsel %vm2926_vm2, %v7713_v4, 8  ;;  %v8955_v44 = vld [vmem:[#allocation31_spill] sm:$0xff] }
0x2511   :  { %v8332_v57 = vsel %vm2112_vm6, %v3526_v2, 2147483647  ;;  %v2890_v2 = vrot.slane %v8949_v8, %v6921_v33 }
0x2512   :  { %v3544_v49 = vshra.s32 %v8332_v57, 16 }
0x2513   :  { %vm2928_vm14 = vcmp.eq.f32.partialorder %v8956_v61, %v2890_v2 }
0x2514   :  { %v5465_v3 = vpop.xlane.xlu0 %5464  ;;  %v8335_v6 = vcvt.s32.f32 %v3544_v49  ;;  %v2944_v48 = vsel %vm2928_vm14, %v7713_v4, 8  ;;  %v8957_v49 = vld [vmem:[#allocation35_spill] sm:$0xff] }
0x2515   :  { %v5466_v45 = vcvt.f32.s32 %v5465_v3  ;;  %vm2929_vm15 = vcmp.eq.f32.partialorder %v8957_v49, %v2894_v53 }
0x2516   :  { %3547 = vmin.xlane.f32.xlu1 %v8335_v6  ;;  %v2945_v3 = vsel %vm2929_vm15, %v7713_v4, 8 }
0x2517   :  { %v8340_v25 = vadd.s32 %v5468_v22, %v5466_v45  ;;  %v2946_v22 = vsel %vm2930_vm0, %v7713_v4, 8  ;;  %v4008_v45 = vcvt.f32.s32 %v8294_v31 }
0x2519   :  { %vm5472_vm5 = vcmp.eq.s32.totalorder %v6869_v50, %v8340_v25 }
0x251a   :  { %v5482_v52 = vsel %vm5472_vm5, %v5481_v21, 0  ;;  %vm2927_vm5 = vcmp.eq.f32.partialorder %v8955_v44, %v2886_v42  ;;  %v4009_v21 = vshll.u32 %v4008_v45, 16 }
0x251b   :  { %v5483_v39 = vsel %vm5421_vm3, %v5482_v52, 0  ;;  %v2943_v10 = vsel %vm2927_vm5, %v7713_v4, 8 }
0x251c   :  { %v5485_v54 = vshrl.u32 %v5483_v39, 16  ;;  %v5484_v17 = vand.u32 65535, %v5483_v39 }
0x251e   :  { %v5487_v59 = vcvt.s32.f32 %v5485_v54  ;;  %v5486_v56 = vcvt.s32.f32 %v5484_v17  ;;  %v3543_v54 = vand.u32 65535, %v8332_v57 }
0x2520   :  { %5490 = vadd.xlane.f32.xlu0 %v5487_v59  ;;  %v3545_v17 = vcvt.s32.f32 %v3543_v54 }
0x2524   :  { %5488 = vadd.xlane.f32.xlu0 %v5486_v56 }
0x2527   :  { %2951 = vperm.xlu1 %6158, %v2932_v1  }
0x252b   :  { %2972 = vperm.xlu1 %6158, %v2939_v5  }
0x252f   :  { %2975 = vperm.xlu1 %6158, %v2940_v24  }
0x2533   :  { %2978 = vperm.xlu1 %6158, %v2941_v62  }
0x2537   :  { %2981 = vperm.xlu1 %6158, %v2942_v58  }
0x253a   :  { %3423 = vperm.xlu0 %6157, %v3392_v36  }
0x253b   :  { %2984 = vperm.xlu1 %6158, %v2943_v10  }
0x253f   :  { %2987 = vperm.xlu1 %6158, %v2944_v48  }
0x2543   :  { %2990 = vperm.xlu1 %6158, %v2945_v3  }
0x2547   :  { %2993 = vperm.xlu1 %6158, %v2946_v22  }
0x2559   :  { %3990 = vmin.xlane.f32.xlu0 %v8291_v40  ;;  %v3421_v40 = vpop.permute.xlu0 %3420 }
0x255a   :  { %v3476_v41 = vrot.slane %v3421_v40, %v7021_v43  ;;  %v4917_v40 = vcvt.f32.s32 %v8026_v9 }
0x255c   :  { %v3518_v7 = vsel %vm2357_vm12, %v3476_v41, %v8309_v47  ;;  %v8961_v41 = vld [vmem:[#allocation5_spill] sm:$0xff] }
0x2579   :  { %v4006_v16 = vpop.xlane.xlu1 %4005 }
0x257a   :  { %v4007_v52 = vcvt.f32.s32 %v4006_v16 }
0x257c   :  { %v8388_v39 = vadd.s32 %v4009_v21, %v4007_v52  ;;  %v2838_v21 = vrot.slane %v8947_v35, %v6558_v11  ;;  %v8959_v52 = vld [vmem:[#allocation24_spill] sm:$0xff] }
0x257e   :  { %vm2915_vm2 = vcmp.eq.f32.partialorder %v8959_v52, %v2838_v21 }
0x257f   :  { %v2931_v54 = vsel %vm2915_vm2, %v7713_v4, 8 }
0x25a3   :  { %v8391_v59 = vpop.xlane.xlu1 %3547 }
0x25a4   :  { %vm3549_vm1 = vcmp.eq.f32.partialorder %v8335_v6, %v8391_v59 }
0x25a5   :  { %v3550_v12 = vsel %vm3549_vm1, %v3545_v17, inf  ;;  %v8960_v17 = vld [vmem:[#allocation21_spill] sm:$0xff] }
0x25a6   :  { %3551 = vmin.xlane.f32.xlu1 %v3550_v12  ;;  %v2385_v12 = vrot.slane %v8960_v17, %v6564_v13 }
0x25a7   :  { %v8395_v56 = vpop.permute.xlu1 %2951 }
0x25a8   :  { %vm2459_vm4 = vcmp.eq.f32.partialorder %v8961_v41, %v2385_v12 }
0x25ab   :  { %v2973_v60 = vpop.permute.xlu1 %2972 }
0x25ac   :  { %v3030_v42 = vrot.slane %v2973_v60, %v7021_v43  ;;  %v4902_v60 = vcvt.f32.s32 %v7966_v15  ;;  %v3993_v15 = vcvt.f32.s32 %v8287_v51 }
0x25ad   :  { %v5491_v31 = vpop.xlane.xlu0 %5490 }
0x25af   :  { %v2976_v8 = vpop.permute.xlu1 %2975 }
0x25b0   :  { %v3034_v62 = vrot.slane %v2976_v8, %v7021_v43  ;;  %v4916_v8 = vcvt.f32.s32 %v8161_v30 }
0x25b1   :  { %v5489_v1 = vpop.xlane.xlu0 %5488 }
0x25b2   :  { %v3066_v36 = vsel %vm2347_vm7, %v3034_v62, %v3030_v42  ;;  %v8963_v62 = vld [vmem:[#allocation7_spill] sm:$0xff] }
0x25b3   :  { %v2979_v63 = vpop.permute.xlu1 %2978 }
0x25b4   :  { %v3038_v29 = vrot.slane %v2979_v63, %v7021_v43  ;;  %v5493_v63 = vcvt.f32.s32 %v5491_v31 }
0x25b6   :  { %v3067_v2 = vsel %vm2349_vm8, %v3038_v29, %v3066_v36  ;;  %v5494_v9 = vshll.u32 %v5493_v63, 16  ;;  %v8968_v63 = vld [vmem:[#allocation15_spill] sm:$0xff] }
0x25b7   :  { %v2982_v26 = vpop.permute.xlu1 %2981 }
0x25b8   :  { %v3042_v58 = vrot.slane %v2982_v26, %v7021_v43  ;;  %v8962_v26 = vld [vmem:[#allocation22_spill] sm:$0xff] }
0x25b9   :  { %v3424_v57 = vpop.permute.xlu0 %3423  ;;  %v2417_v30 = vrot.slane %v8962_v26, %v6564_v13  ;;  %v2421_v51 = vrot.slane %v8962_v26, %v6905_v20  ;;  %v2429_v21 = vrot.slane %v8962_v26, %v6924_v34  ;;  %v2433_v12 = vrot.slane %v8962_v26, %v6921_v33 }
0x25ba   :  { %v3480_v5 = vrot.slane %v3424_v57, %v7021_v43  ;;  %v3068_v61 = vsel %vm2351_vm9, %v3042_v58, %v3067_v2  ;;  %v2413_v57 = vrot.slane %v8962_v26, %v6558_v11  ;;  %v3994_v58 = vshll.u32 %v3993_v15, 16  ;;  %v8971_v15 = vld [vmem:[#allocation28_spill] sm:$0xff] }
0x25bb   :  { %v2985_v6 = vpop.permute.xlu1 %2984  ;;  %v2437_v41 = vrot.slane %v8962_v26, %v6932_v38 }
0x25bc   :  { %v3519_v14 = vsel %vm2359_vm13, %v3480_v5, %v3518_v7  ;;  %v3046_v47 = vrot.slane %v2985_v6, %v7021_v43  ;;  %v4901_v5 = vcvt.f32.s32 %v8141_v46  ;;  %v4918_v7 = vshll.u32 %v4917_v40, 16 }
0x25bd   :  { %v8403_v24 = vsel %vm2112_vm6, %v3519_v14, 2147483647  ;;  %v5492_v6 = vcvt.f32.s32 %v5489_v1  ;;  %v2478_v14 = vsel %vm2459_vm4, %v7713_v4, 8  ;;  %vm2466_vm5 = vcmp.eq.f32.partialorder %v8963_v62, %v2413_v57 }
0x25be   :  { %v3529_v28 = vshra.s32 %v8403_v24, 16  ;;  %v3069_v53 = vsel %vm2353_vm10, %v3046_v47, %v3068_v61  ;;  %v2485_v46 = vsel %vm2466_vm5, %v7713_v4, 8  ;;  %v5552_v61 = vrot.slane %v8388_v39, %v7021_v43 }
0x25bf   :  { %v2988_v23 = vpop.permute.xlu1 %2987  ;;  %v8449_v29 = vadd.s32 %v5494_v9, %v5492_v6  ;;  %vm2471_vm4 = vcmp.eq.f32.partialorder %v8968_v63, %v2433_v12  ;;  %v2441_v6 = vrot.slane %v8962_v26, %v6929_v37  ;;  %v2846_v9 = vrot.slane %v8947_v35, %v6905_v20 }
0x25c0   :  { %v8407_v19 = vcvt.s32.f32 %v3529_v28  ;;  %v3050_v44 = vrot.slane %v2988_v23, %v7021_v43  ;;  %v4903_v28 = vshll.u32 %v4902_v60, 16  ;;  %v4919_v23 = vadd.s32 %v4918_v7, %v4916_v8  ;;  %v8969_v7 = vld [vmem:[#allocation17_spill] sm:$0xff] }
0x25c1   :  { %vm5496_vm15 = vcmp.eq.s32.totalorder %v6869_v50, %v8449_v29  ;;  %v2490_v57 = vsel %vm2471_vm4, %v7713_v4, 8  ;;  %vm2472_vm5 = vcmp.eq.f32.partialorder %v8969_v7, %v2437_v41  ;;  %v2850_v62 = vrot.slane %v8947_v35, %v6902_v18 }
0x25c2   :  { %3532 = vmin.xlane.f32.xlu0 %v8407_v19  ;;  %v3070_v49 = vsel %vm2355_vm11, %v3050_v44, %v3069_v53  ;;  %v4904_v31 = vadd.s32 %v4903_v28, %v4901_v5  ;;  %v5504_v1 = vrot.slane %v4919_v23, %v7021_v43  ;;  %v8970_v28 = vld [vmem:[#allocation19_spill] sm:$0xff] }
0x25c3   :  { %v2991_v32 = vpop.permute.xlu1 %2990 }
0x25c4   :  { %v3054_v10 = vrot.slane %v2991_v32, %v7021_v43  ;;  %v8964_v32 = vld [vmem:[#allocation8_spill] sm:$0xff]  ;;  %v5500_v36 = vrot.slane %v4904_v31, %v7021_v43  ;;  %v2854_v31 = vrot.slane %v8947_v35, %v6924_v34 }
0x25c5   :  { %vm2467_vm14 = vcmp.eq.f32.partialorder %v8964_v32, %v2417_v30  ;;  %v2862_v32 = vrot.slane %v8947_v35, %v6932_v38 }
0x25c6   :  { %v3071_v3 = vsel %vm2357_vm12, %v3054_v10, %v3070_v49  ;;  %v2486_v13 = vsel %vm2467_vm14, %v7713_v4, 8  ;;  %v5505_v2 = vsel %vm2347_vm7, %v5504_v1, %v5500_v36  ;;  %v2425_v10 = vrot.slane %v8962_v26, %v6902_v18  ;;  %v8965_v49 = vld [vmem:[#allocation10_spill] sm:$0xff]  ;;  %v8973_v1 = vld [vmem:[#allocation32_spill] sm:$0xff] }
0x25c7   :  { %v2994_v48 = vpop.permute.xlu1 %2993  ;;  %v5506_v53 = vsel %vm5496_vm15, %v5505_v2, 0  ;;  %vm2468_vm0 = vcmp.eq.f32.partialorder %v8965_v49, %v2421_v51  ;;  %vm2473_vm14 = vcmp.eq.f32.partialorder %v8970_v28, %v2441_v6  ;;  %vm2917_vm15 = vcmp.eq.f32.partialorder %v8971_v15, %v2846_v9  ;;  %v8972_v26 = vld [vmem:[#allocation30_spill] sm:$0xff]  ;;  %v8975_v36 = vld [vmem:[#allocation36_spill] sm:$0xff] }
0x25c8   :  { %v3058_v55 = vrot.slane %v2994_v48, %v7021_v43  ;;  %v2492_v23 = vsel %vm2473_vm14, %v7713_v4, 8  ;;  %v2933_v30 = vsel %vm2917_vm15, %v7713_v4, 8  ;;  %vm2921_vm4 = vcmp.eq.f32.partialorder %v8975_v36, %v2862_v32  ;;  %v8976_v2 = vld [vmem:[#allocation38_spill] sm:$0xff] }
0x25ca   :  { %v3072_v0 = vsel %vm2359_vm13, %v3058_v55, %v3071_v3  ;;  %v2487_v55 = vsel %vm2468_vm0, %v7713_v4, 8  ;;  %vm2918_vm0 = vcmp.eq.f32.partialorder %v8972_v26, %v2850_v62 }
0x25cb   :  { %v8425_v22 = vsel %vm2112_vm6, %v3072_v0, 2147483647  ;;  %v5507_v0 = vsel %vm5421_vm3, %v5506_v53, 0 }
0x25cc   :  { %v3090_v45 = vshra.s32 %v8425_v22, 16  ;;  %v5509_v52 = vshrl.u32 %v5507_v0, 16  ;;  %v5508_v8 = vand.u32 65535, %v5507_v0  ;;  %v3528_v0 = vand.u32 65535, %v8403_v24 }
0x25ce   :  { %v8428_v16 = vcvt.s32.f32 %v3090_v45  ;;  %v8966_v45 = vld [vmem:[#allocation12_spill] sm:$0xff]  ;;  %v5511_v60 = vcvt.s32.f32 %v5509_v52  ;;  %v5510_v5 = vcvt.s32.f32 %v5508_v8 }
0x25cf   :  { %vm2469_vm1 = vcmp.eq.f32.partialorder %v8966_v45, %v2425_v10 }
0x25d0   :  { %3093 = vmin.xlane.f32.xlu1 %v8428_v16  ;;  %v2488_v39 = vsel %vm2469_vm1, %v7713_v4, 8  ;;  %vm2919_vm1 = vcmp.eq.f32.partialorder %v8973_v1, %v2854_v31 }
0x25d8   :  { %2948 = vperm.xlu0 %6157, %v2931_v54   ;;  %v8967_v54 = vld [vmem:[#allocation13_spill] sm:$0xff] }
0x25d9   :  { %vm2470_vm2 = vcmp.eq.f32.partialorder %v8967_v54, %v2429_v21 }
0x25da   :  { %v2489_v40 = vsel %vm2470_vm2, %v7713_v4, 8 }
0x25e1   :  { %2497 = vperm.xlu1 %6158, %v2478_v14   ;;  %v2491_v14 = vsel %vm2472_vm5, %v7713_v4, 8 }
0x25e5   :  { %2518 = vperm.xlu1 %6158, %v2485_v46   ;;  %v2934_v46 = vsel %vm2918_vm0, %v7713_v4, 8 }
0x25e6   :  { %v3991_v42 = vpop.xlane.xlu0 %3990 }
0x25e7   :  { %v3992_v47 = vcvt.f32.s32 %v3991_v42  ;;  %v2858_v42 = vrot.slane %v8947_v35, %v6921_v33 }
0x25e9   :  { %v3995_v44 = vadd.s32 %v3994_v58, %v3992_v47  ;;  %2521 = vperm.xlu1 %6158, %v2486_v13   ;;  %v2935_v58 = vsel %vm2919_vm1, %v7713_v4, 8  ;;  %v8974_v47 = vld [vmem:[#allocation34_spill] sm:$0xff]  ;;  %v2866_v13 = vrot.slane %v8947_v35, %v6929_v37  ;;  %v3530_v35 = vcvt.s32.f32 %v3528_v0 }
0x25ea   :  { %vm2920_vm2 = vcmp.eq.f32.partialorder %v8974_v47, %v2858_v42 }
0x25eb   :  { %v5548_v48 = vrot.slane %v3995_v44, %v7021_v43  ;;  %v2936_v51 = vsel %vm2920_vm2, %v7713_v4, 8  ;;  %v2937_v44 = vsel %vm2921_vm4, %v7713_v4, 8  ;;  %vm2922_vm5 = vcmp.eq.f32.partialorder %v8976_v2, %v2866_v13 }
0x25ec   :  { %v2938_v10 = vsel %vm2922_vm5, %v7713_v4, 8 }
0x25ed   :  { %2524 = vperm.xlu1 %6158, %v2487_v55   ;;  %v8469_v3 = vsel %vm2347_vm7, %v5552_v61, %v5548_v48  ;;  %v3554_v61 = vcvt.f32.s32 %v8391_v59 }
0x25ef   :  { %v3555_v48 = vshll.u32 %v3554_v61, 16 }
0x25f1   :  { %2527 = vperm.xlu1 %6158, %v2488_v39   ;;  %v3089_v39 = vand.u32 65535, %v8425_v22 }
0x25f3   :  { %v3091_v59 = vcvt.s32.f32 %v3089_v39 }
0x25f5   :  { %2530 = vperm.xlu1 %6158, %v2489_v40  }
0x25f7   :  { %5514 = vadd.xlane.f32.xlu0 %v5511_v60 }
0x25f9   :  { %2533 = vperm.xlu1 %6158, %v2490_v57  }
0x25fb   :  { %5512 = vadd.xlane.f32.xlu0 %v5510_v5 }
0x25fd   :  { %2536 = vperm.xlu1 %6158, %v2491_v14  }
0x2601   :  { %2539 = vperm.xlu1 %6158, %v2492_v23  }
0x2611   :  { %2954 = vperm.xlu0 %6157, %v2933_v30  }
0x2615   :  { %2957 = vperm.xlu0 %6157, %v2934_v46  }
0x2619   :  { %2960 = vperm.xlu0 %6157, %v2935_v58  }
0x261d   :  { %2963 = vperm.xlu0 %6157, %v2936_v51  }
0x2621   :  { %2966 = vperm.xlu0 %6157, %v2937_v44  }
0x2625   :  { %2969 = vperm.xlu0 %6157, %v2938_v10  }
0x2633   :  { %v3552_v53 = vpop.xlane.xlu1 %3551 }
0x2634   :  { %v3553_v49 = vcvt.f32.s32 %v3552_v53 }
0x2636   :  { %v8515_v55 = vadd.s32 %v3555_v48, %v3553_v49 }
0x264f   :  { %v8518_v45 = vpop.xlane.xlu0 %3532 }
0x2650   :  { %vm3534_vm14 = vcmp.eq.f32.partialorder %v8407_v19, %v8518_v45 }
0x2651   :  { %v3535_v21 = vsel %vm3534_vm14, %v3530_v35, inf  ;;  %v3002_v35 = vrot.slane %v8395_v56, %v7021_v43 }
0x2652   :  { %3536 = vmin.xlane.f32.xlu0 %v3535_v21 }
0x2657   :  { %v2949_v30 = vpop.permute.xlu0 %2948 }
0x2658   :  { %v2998_v48 = vrot.slane %v2949_v30, %v7021_v43  ;;  %v2389_v30 = vrot.slane %v8960_v17, %v6905_v20  ;;  %v8980_v20 = vld [vmem:[#allocation14_spill] sm:$0xff] }
0x265d   :  { %v8523_v52 = vpop.xlane.xlu1 %3093 }
0x265e   :  { %vm3095_vm15 = vcmp.eq.f32.partialorder %v8428_v16, %v8523_v52 }
0x265f   :  { %v3096_v54 = vsel %vm3095_vm15, %v3091_v59, inf }
0x2660   :  { %3097 = vmin.xlane.f32.xlu1 %v3096_v54  ;;  %v3059_v54 = vsel %vm2347_vm7, %v3002_v35, %v2998_v48 }
0x2661   :  { %v8527_v12 = vpop.permute.xlu1 %2497 }
0x2665   :  { %v2519_v24 = vpop.permute.xlu1 %2518 }
0x2666   :  { %v2576_v57 = vrot.slane %v2519_v24, %v7021_v43 }
0x2669   :  { %v2522_v40 = vpop.permute.xlu1 %2521 }
0x266a   :  { %v2580_v41 = vrot.slane %v2522_v40, %v7021_v43 }
0x266c   :  { %v2612_v6 = vsel %vm2347_vm7, %v2580_v41, %v2576_v57 }
0x266d   :  { %v2525_v60 = vpop.permute.xlu1 %2524 }
0x266e   :  { %v2584_v22 = vrot.slane %v2525_v60, %v7021_v43 }
0x2670   :  { %v2613_v28 = vsel %vm2349_vm8, %v2584_v22, %v2612_v6 }
0x2671   :  { %v2528_v8 = vpop.permute.xlu1 %2527 }
0x2672   :  { %v2588_v5 = vrot.slane %v2528_v8, %v7021_v43 }
0x2674   :  { %v2614_v9 = vsel %vm2351_vm9, %v2588_v5, %v2613_v28 }
0x2675   :  { %v2531_v63 = vpop.permute.xlu1 %2530 }
0x2676   :  { %v2592_v16 = vrot.slane %v2531_v63, %v7021_v43 }
0x2678   :  { %v2615_v15 = vsel %vm2353_vm10, %v2592_v16, %v2614_v9 }
0x2679   :  { %v2534_v19 = vpop.permute.xlu1 %2533 }
0x267a   :  { %v2596_v14 = vrot.slane %v2534_v19, %v7021_v43 }
0x267c   :  { %v2616_v26 = vsel %vm2355_vm11, %v2596_v14, %v2615_v15  ;;  %v2381_v15 = vrot.slane %v8960_v17, %v6558_v11  ;;  %v2397_v11 = vrot.slane %v8960_v17, %v6924_v34  ;;  %v3539_v34 = vcvt.f32.s32 %v8518_v45 }
0x267d   :  { %v2537_v7 = vpop.permute.xlu1 %2536 }
0x267e   :  { %v2600_v23 = vrot.slane %v2537_v7, %v7021_v43  ;;  %vm2462_vm5 = vcmp.eq.f32.partialorder %v8980_v20, %v2397_v11 }
0x2680   :  { %v2617_v46 = vsel %vm2357_vm12, %v2600_v23, %v2616_v26 }
0x2681   :  { %v2540_v62 = vpop.permute.xlu1 %2539 }
0x2682   :  { %v2604_v31 = vrot.slane %v2540_v62, %v7021_v43  ;;  %v8977_v62 = vld [vmem:[#allocation6_spill] sm:$0xff] }
0x2683   :  { %vm2458_vm1 = vcmp.eq.f32.partialorder %v8977_v62, %v2381_v15 }
0x2684   :  { %v2618_v1 = vsel %vm2359_vm13, %v2604_v31, %v2617_v46  ;;  %v5515_v58 = vpop.xlane.xlu0 %5514  ;;  %v2477_v26 = vsel %vm2458_vm1, %v7713_v4, 8  ;;  %v8978_v31 = vld [vmem:[#allocation9_spill] sm:$0xff]  ;;  %v2393_v46 = vrot.slane %v8960_v17, %v6902_v18  ;;  %v8981_v18 = vld [vmem:[#allocation16_spill] sm:$0xff] }
0x2685   :  { %v8545_v42 = vsel %vm2112_vm6, %v2618_v1, 2147483647  ;;  %v5517_v44 = vcvt.f32.s32 %v5515_v58  ;;  %vm2460_vm2 = vcmp.eq.f32.partialorder %v8978_v31, %v2389_v30  ;;  %v8979_v58 = vld [vmem:[#allocation11_spill] sm:$0xff] }
0x2686   :  { %v2636_v47 = vshra.s32 %v8545_v42, 16  ;;  %v2479_v1 = vsel %vm2460_vm2, %v7713_v4, 8  ;;  %vm2461_vm4 = vcmp.eq.f32.partialorder %v8979_v58, %v2393_v46 }
0x2687   :  { %v5518_v61 = vshll.u32 %v5517_v44, 16 }
0x2688   :  { %v8548_v32 = vcvt.s32.f32 %v2636_v47  ;;  %v5513_v51 = vpop.xlane.xlu0 %5512  ;;  %v2480_v47 = vsel %vm2461_vm4, %v7713_v4, 8 }
0x2689   :  { %v5516_v10 = vcvt.f32.s32 %v5513_v51  ;;  %v2401_v51 = vrot.slane %v8960_v17, %v6921_v33  ;;  %v3540_v33 = vshll.u32 %v3539_v34, 16 }
0x268a   :  { %2639 = vmin.xlane.f32.xlu1 %v8548_v32 }
0x268b   :  { %v8552_v49 = vadd.s32 %v5518_v61, %v5516_v10  ;;  %vm2463_vm14 = vcmp.eq.f32.partialorder %v8981_v18, %v2401_v51 }
0x268c   :  { %v2482_v44 = vsel %vm2463_vm14, %v7713_v4, 8  ;;  %vm5650_vm14 = vcmask 48128  }
0x268d   :  { %vm5520_vm0 = vcmp.eq.s32.totalorder %v6869_v50, %v8552_v49 }
0x268e   :  { %v5530_v19 = vsel %vm5520_vm0, %v8284_v27, 0 }
0x268f   :  { %v5531_v7 = vsel %vm5421_vm3, %v5530_v19, 0 }
0x2690   :  { %v2955_v36 = vpop.permute.xlu0 %2954  ;;  %v5533_v28 = vshrl.u32 %v5531_v7, 16  ;;  %v5532_v9 = vand.u32 65535, %v5531_v7 }
0x2691   :  { %v3006_v0 = vrot.slane %v2955_v36, %v7021_v43  ;;  %v2481_v36 = vsel %vm2462_vm5, %v7713_v4, 8 }
0x2692   :  { %v5535_v23 = vcvt.s32.f32 %v5533_v28  ;;  %v5534_v27 = vcvt.s32.f32 %v5532_v9  ;;  %v8983_v9 = vld [vmem:[#allocation20_spill] sm:$0xff] }
0x2693   :  { %v3060_v40 = vsel %vm2349_vm8, %v3006_v0, %v3059_v54  ;;  %v5576_v0 = vrot.slane %v8515_v55, %v7021_v43 }
0x2694   :  { %v2958_v13 = vpop.permute.xlu0 %2957 }
0x2695   :  { %v3010_v21 = vrot.slane %v2958_v13, %v7021_v43  ;;  %v2405_v13 = vrot.slane %v8960_v17, %v6932_v38 }
0x2697   :  { %v3061_v8 = vsel %vm2351_vm9, %v3010_v21, %v3060_v40  ;;  %v3100_v21 = vcvt.f32.s32 %v8523_v52 }
0x2698   :  { %v2961_v2 = vpop.permute.xlu0 %2960 }
0x2699   :  { %v3014_v39 = vrot.slane %v2961_v2, %v7021_v43  ;;  %v8982_v2 = vld [vmem:[#allocation18_spill] sm:$0xff]  ;;  %v3101_v45 = vshll.u32 %v3100_v21, 16 }
0x269a   :  { %vm2464_vm15 = vcmp.eq.f32.partialorder %v8982_v2, %v2405_v13 }
0x269b   :  { %v3062_v56 = vsel %vm2353_vm10, %v3014_v39, %v3061_v8  ;;  %v2483_v10 = vsel %vm2464_vm15, %v7713_v4, 8  ;;  %vm5652_vm15 = vcmask 56320  }
0x269c   :  { %v2964_v53 = vpop.permute.xlu0 %2963 }
0x269d   :  { %v3018_v24 = vrot.slane %v2964_v53, %v7021_v43 }
0x269f   :  { %v3063_v41 = vsel %vm2355_vm11, %v3018_v24, %v3062_v56  ;;  %v2635_v24 = vand.u32 65535, %v8545_v42 }
0x26a0   :  { %v2967_v59 = vpop.permute.xlu0 %2966 }
0x26a1   :  { %v3022_v60 = vrot.slane %v2967_v59, %v7021_v43 }
0x26a3   :  { %v3064_v57 = vsel %vm2357_vm12, %v3022_v60, %v3063_v41  ;;  %v2637_v60 = vcvt.s32.f32 %v2635_v24 }
0x26a4   :  { %v2970_v63 = vpop.permute.xlu0 %2969 }
0x26a5   :  { %v3026_v22 = vrot.slane %v2970_v63, %v7021_v43 }
0x26a7   :  { %v3065_v5 = vsel %vm2359_vm13, %v3026_v22, %v3064_v57 }
0x26a8   :  { %v3073_v16 = vsel %vm2112_vm6, %v3065_v5, 2147483647 }
0x26a9   :  { %v3075_v6 = vshra.s32 %v3073_v16, 16  ;;  %v3074_v8 = vand.u32 65535, %v3073_v16 }
0x26ab   :  { %v3077_v14 = vcvt.s32.f32 %v3075_v6  ;;  %v3076_v63 = vcvt.s32.f32 %v3074_v8 }
0x26ad   :  { %3078 = vmin.xlane.f32.xlu0 %v3077_v14 }
0x26b1   :  { %5538 = vadd.xlane.f32.xlu0 %v5535_v23  ;;  %v2409_v23 = vrot.slane %v8960_v17, %v6929_v37 }
0x26b3   :  { %vm2465_vm4 = vcmp.eq.f32.partialorder %v8983_v9, %v2409_v23 }
0x26b5   :  { %5536 = vadd.xlane.f32.xlu0 %v5534_v27  ;;  %v2484_v27 = vsel %vm2465_vm4, %v7713_v4, 8  ;;  %v2548_v4 = vrot.slane %v8527_v12, %v7021_v43 }
0x26cb   :  { %2494 = vperm.xlu0 %6157, %v2477_v26  }
0x26cf   :  { %2500 = vperm.xlu0 %6157, %v2479_v1  }
0x26d3   :  { %2503 = vperm.xlu0 %6157, %v2480_v47  }
0x26d7   :  { %2506 = vperm.xlu0 %6157, %v2481_v36  }
0x26db   :  { %2509 = vperm.xlu0 %6157, %v2482_v44  }
0x26df   :  { %2512 = vperm.xlu0 %6157, %v2483_v10   ;;  %v3537_v61 = vpop.xlane.xlu0 %3536 }
0x26e0   :  { %v3538_v53 = vcvt.f32.s32 %v3537_v61 }
0x26e2   :  { %v3541_v48 = vadd.s32 %v3540_v33, %v3538_v53 }
0x26e4   :  { %v5572_v35 = vrot.slane %v3541_v48, %v7021_v43 }
0x26e6   :  { %v5577_v38 = vsel %vm2347_vm7, %v5576_v0, %v5572_v35 }
0x26ed   :  { %v3098_v39 = vpop.xlane.xlu1 %3097 }
0x26ee   :  { %v3099_v59 = vcvt.f32.s32 %v3098_v39 }
0x26f0   :  { %v8604_v54 = vadd.s32 %v3101_v45, %v3099_v59 }
0x2717   :  { %v8607_v40 = vpop.xlane.xlu1 %2639 }
0x2718   :  { %vm2641_vm0 = vcmp.eq.f32.partialorder %v8548_v32, %v8607_v40 }
0x2719   :  { %v2642_v55 = vsel %vm2641_vm0, %v2637_v60, inf }
0x271a   :  { %2643 = vmin.xlane.f32.xlu1 %v2642_v55 }
0x273a   :  { %v8611_v56 = vpop.xlane.xlu0 %3078 }
0x273b   :  { %vm3080_vm1 = vcmp.eq.f32.partialorder %v3077_v14, %v8611_v56  ;;  %v3085_v55 = vcvt.f32.s32 %v8611_v56 }
0x273c   :  { %v3081_v52 = vsel %vm3080_vm1, %v3076_v63, inf }
0x273d   :  { %v3086_v63 = vshll.u32 %v3085_v55, 16 }
0x273e   :  { %v5539_v19 = vpop.xlane.xlu0 %5538 }
0x273f   :  { %v5541_v41 = vcvt.f32.s32 %v5539_v19 }
0x2741   :  { %v5542_v57 = vshll.u32 %v5541_v41, 16  ;;  %v5600_v41 = vrot.slane %v8604_v54, %v7021_v43 }
0x2742   :  { %v5537_v22 = vpop.xlane.xlu0 %5536 }
0x2743   :  { %v5540_v42 = vcvt.f32.s32 %v5537_v22 }
0x2745   :  { %v8614_v5 = vadd.s32 %v5542_v57, %v5540_v42 }
0x2747   :  { %vm5544_vm2 = vcmp.eq.s32.totalorder %v6869_v50, %v8614_v5 }
0x2748   :  { %v5554_v32 = vsel %vm5544_vm2, %v8469_v3, 0 }
0x2749   :  { %v5555_v16 = vsel %vm5421_vm3, %v5554_v32, 0 }
0x274a   :  { %v5557_v7 = vshrl.u32 %v5555_v16, 16  ;;  %v5556_v28 = vand.u32 65535, %v5555_v16  ;;  %v2495_v15 = vpop.permute.xlu0 %2494 }
0x274b   :  { %v2544_v11 = vrot.slane %v2495_v15, %v7021_v43 }
0x274c   :  { %v5559_v6 = vcvt.s32.f32 %v5557_v7  ;;  %v5558_v14 = vcvt.s32.f32 %v5556_v28 }
0x274d   :  { %v2605_v18 = vsel %vm2347_vm7, %v2548_v4, %v2544_v11 }
0x274e   :  { %5562 = vadd.xlane.f32.xlu0 %v5559_v6  ;;  %v2501_v62 = vpop.permute.xlu0 %2500 }
0x274f   :  { %v2552_v37 = vrot.slane %v2501_v62, %v7021_v43 }
0x2751   :  { %v2606_v44 = vsel %vm2349_vm8, %v2552_v37, %v2605_v18 }
0x2752   :  { %5560 = vadd.xlane.f32.xlu0 %v5558_v14  ;;  %v2504_v3 = vpop.permute.xlu0 %2503 }
0x2753   :  { %v2556_v17 = vrot.slane %v2504_v3, %v7021_v43 }
0x2755   :  { %v2607_v12 = vsel %vm2351_vm9, %v2556_v17, %v2606_v44 }
0x2756   :  { %v2507_v30 = vpop.permute.xlu0 %2506 }
0x2757   :  { %v2560_v36 = vrot.slane %v2507_v30, %v7021_v43 }
0x2759   :  { %v2608_v61 = vsel %vm2353_vm10, %v2560_v36, %v2607_v12  ;;  %vm5640_vm10 = vcmask 7168  }
0x275a   :  { %v2510_v26 = vpop.permute.xlu0 %2509 }
0x275b   :  { %v2564_v13 = vrot.slane %v2510_v26, %v7021_v43 }
0x275d   :  { %v2609_v48 = vsel %vm2355_vm11, %v2564_v13, %v2608_v61  ;;  %vm5642_vm11 = vcmask 15360  }
0x275e   :  { %v2513_v31 = vpop.permute.xlu0 %2512 }
0x275f   :  { %v2568_v34 = vrot.slane %v2513_v31, %v7021_v43 }
0x2761   :  { %v2610_v35 = vsel %vm2357_vm12, %v2568_v34, %v2609_v48  ;;  %vm5646_vm12 = vcmask 31744  }
0x2768   :  { %2515 = vperm.xlu0 %6157, %v2484_v27  }
0x2787   :  { %3082 = vmin.xlane.f32.xlu0 %v3081_v52 }
0x27a7   :  { %v2644_v31 = vpop.xlane.xlu1 %2643 }
0x27a8   :  { %v2645_v11 = vcvt.f32.s32 %v2644_v31 }
0x27db   :  { %v5563_v46 = vpop.xlane.xlu0 %5562 }
0x27dc   :  { %v5565_v1 = vcvt.f32.s32 %v5563_v46  ;;  %v2646_v46 = vcvt.f32.s32 %v8607_v40 }
0x27de   :  { %v5566_v47 = vshll.u32 %v5565_v1, 16 }
0x27df   :  { %v5561_v58 = vpop.xlane.xlu0 %5560 }
0x27e0   :  { %v5564_v20 = vcvt.f32.s32 %v5561_v58 }
0x27e2   :  { %v8629_v51 = vadd.s32 %v5566_v47, %v5564_v20  ;;  %v2647_v20 = vshll.u32 %v2646_v46, 16 }
0x27e4   :  { %vm5568_vm5 = vcmp.eq.s32.totalorder %v6869_v50, %v8629_v51  ;;  %v2648_v36 = vadd.s32 %v2647_v20, %v2645_v11 }
0x27e5   :  { %v5578_v2 = vsel %vm5568_vm5, %v5577_v38, 0 }
0x27e6   :  { %v5579_v10 = vsel %vm5421_vm3, %v5578_v2, 0  ;;  %v5624_v2 = vrot.slane %v2648_v36, %v7021_v43 }
0x27e7   :  { %v2516_v33 = vpop.permute.xlu0 %2515  ;;  %v5581_v53 = vshrl.u32 %v5579_v10, 16  ;;  %v5580_v39 = vand.u32 65535, %v5579_v10 }
0x27e8   :  { %v2572_v0 = vrot.slane %v2516_v33, %v7021_v43 }
0x27e9   :  { %v5583_v21 = vcvt.s32.f32 %v5581_v53  ;;  %v5582_v59 = vcvt.s32.f32 %v5580_v39 }
0x27ea   :  { %v2611_v45 = vsel %vm2359_vm13, %v2572_v0, %v2610_v35  ;;  %vm5648_vm13 = vcmask 39936  }
0x27eb   :  { %5586 = vadd.xlane.f32.xlu0 %v5583_v21  ;;  %v2619_v38 = vsel %vm2112_vm6, %v2611_v45, 2147483647 }
0x27ec   :  { %v2621_v24 = vshra.s32 %v2619_v38, 16  ;;  %v2620_v7 = vand.u32 65535, %v2619_v38 }
0x27ee   :  { %v2623_v60 = vcvt.s32.f32 %v2621_v24  ;;  %v2622_v56 = vcvt.s32.f32 %v2620_v7 }
0x27ef   :  { %5584 = vadd.xlane.f32.xlu0 %v5582_v59 }
0x27f3   :  { %2624 = vmin.xlane.f32.xlu0 %v2623_v60 }
0x2814   :  { %v3083_v8 = vpop.xlane.xlu0 %3082 }
0x2815   :  { %v3084_v52 = vcvt.f32.s32 %v3083_v8 }
0x2817   :  { %v3087_v19 = vadd.s32 %v3086_v63, %v3084_v52 }
0x2819   :  { %v5596_v22 = vrot.slane %v3087_v19, %v7021_v43 }
0x281b   :  { %v5601_v57 = vsel %vm2347_vm7, %v5600_v41, %v5596_v22 }
0x2878   :  { %v5587_v42 = vpop.xlane.xlu0 %5586 }
0x2879   :  { %v5589_v32 = vcvt.f32.s32 %v5587_v42 }
0x287b   :  { %v5590_v6 = vshll.u32 %v5589_v32, 16 }
0x287c   :  { %v5585_v16 = vpop.xlane.xlu0 %5584 }
0x287d   :  { %v5588_v28 = vcvt.f32.s32 %v5585_v16 }
0x287f   :  { %v5591_v14 = vadd.s32 %v5590_v6, %v5588_v28 }
0x2880   :  { %v2625_v23 = vpop.xlane.xlu0 %2624 }
0x2881   :  { %vm5592_vm6 = vcmp.eq.s32.totalorder %v6869_v50, %v5591_v14  ;;  %vm2626_vm8 = vcmp.eq.f32.partialorder %v2623_v60, %v2625_v23  ;;  %v2631_v26 = vcvt.f32.s32 %v2625_v23 }
0x2882   :  { %v5602_v9 = vsel %vm5592_vm6, %v5601_v57, 0  ;;  %v2627_v27 = vsel %vm2626_vm8, %v2622_v56, inf }
0x2883   :  { %2628 = vmin.xlane.f32.xlu0 %v2627_v27  ;;  %v5603_v54 = vsel %vm5421_vm3, %v5602_v9, 0  ;;  %v2632_v47 = vshll.u32 %v2631_v26, 16 }
0x2884   :  { %v5604_v15 = vand.u32 65535, %v5603_v54  ;;  %v5605_v62 = vshrl.u32 %v5603_v54, 16 }
0x2886   :  { %v5606_v3 = vcvt.s32.f32 %v5604_v15  ;;  %v5607_v30 = vcvt.s32.f32 %v5605_v62 }
0x2888   :  { %5608 = vadd.xlane.f32.xlu1 %v5606_v3  ;;  %5610 = vadd.xlane.f32.xlu0 %v5607_v30 }
0x2910   :  { %v2629_v1 = vpop.xlane.xlu0 %2628 }
0x2911   :  { %v2630_v58 = vcvt.f32.s32 %v2629_v1 }
0x2913   :  { %v2633_v37 = vadd.s32 %v2632_v47, %v2630_v58 }
0x2915   :  { %v5609_v4 = vpop.xlane.xlu1 %5608  ;;  %v5611_v17 = vpop.xlane.xlu0 %5610  ;;  %v5620_v13 = vrot.slane %v2633_v37, %v7021_v43 }
0x2916   :  { %v5613_v18 = vcvt.f32.s32 %v5611_v17  ;;  %v5612_v44 = vcvt.f32.s32 %v5609_v4 }
0x2917   :  { %v5625_v10 = vsel %vm2347_vm7, %v5624_v2, %v5620_v13  ;;  %vm5644_vm7 = vcmask 23552  }
0x2918   :  { %v5614_v34 = vshll.u32 %v5613_v18, 16 }
0x291a   :  { %v5615_v12 = vadd.s32 %v5614_v34, %v5612_v44 }
0x291c   :  { %vm5616_vm9 = vcmp.eq.s32.totalorder %v6869_v50, %v5615_v12 }
0x291d   :  { %v5626_v40 = vsel %vm5616_vm9, %v5625_v10, 0 }
0x291e   :  { %v5627_v61 = vsel %vm5421_vm3, %v5626_v40, 0 }
0x291f   :  { %v5629_v33 = vshrl.u32 %v5627_v61, 16  ;;  %v5628_v53 = vand.u32 65535, %v5627_v61 }
0x2921   :  { %v5631_v48 = vcvt.s32.f32 %v5629_v33  ;;  %v5630_v0 = vcvt.s32.f32 %v5628_v53 }
0x2923   :  { %5634 = vadd.xlane.f32.xlu0 %v5631_v48  ;;  %5632 = vadd.xlane.f32.xlu1 %v5630_v0 }
0x29b0   :  { %v5635_v35 = vpop.xlane.xlu0 %5634  ;;  %v5633_v21 = vpop.xlane.xlu1 %5632 }
0x29b1   :  { %v5637_v39 = vcvt.f32.s32 %v5635_v35  ;;  %v5636_v38 = vcvt.f32.s32 %v5633_v21 }
0x29b3   :  { %v5638_v45 = vshll.u32 %v5637_v39, 16 }
0x29b5   :  { %v5639_v43 = vadd.s32 %v5638_v45, %v5636_v38 }
0x29b7   :  { %v5641_v59 = vsel %vm5640_vm10, %v5639_v43, %v5615_v12 }
0x29b8   :  { %v5643_v50 = vsel %vm5642_vm11, %v5641_v59, %v5591_v14 }
0x29b9   :  { %v5645_v24 = vsel %vm5644_vm7, %v5643_v50, %v8629_v51 }
0x29ba   :  { %v5647_v60 = vsel %vm5646_vm12, %v5645_v24, %v8614_v5 }
0x29bb   :  { %v5649_v55 = vsel %vm5648_vm13, %v5647_v60, %v8552_v49 }
0x29bc   :  { %v5651_v8 = vsel %vm5650_vm14, %v5649_v55, %v8449_v29 }
0x29bd   :  { %v5653_v63 = vsel %vm5652_vm15, %v5651_v8, %v8340_v25 }
0x29be   :  { %5654 = vst.msk [vmem:[#allocation2] sm:$0x3] %vm5421_vm3, %v5653_v63 }
0x29bf   :  { %6298 = shalt.err (!%p6295_p4)
}
0x29c0   :  { %s6299_s4 = scalar_lea.hbm %s8688_s11, 32 }
0x29c1   :  { %p6300_p5 = scmp.ne.s32.totalorder %s8688_s11, %s6299_s4  ;;  %p6303_p6 = scmp.lt.u32.totalorder %s6299_s4, %s8688_s11 }
0x29c3   :  { %p6305_p7 = pnand %p6303_p6, %p6300_p5 }
0x29c5   :  { %6308 = shalt.err (!%p6305_p7)
}
0x29c6   :  { %5666 = dma.vmem_to_hbm [thread:$0]  %s5664_s1, 32, %s8688_s11, [#allocation3]  }
0x29c7   :  { %6309 = dma.done.wait [#allocation3], 32  }
0x29c8   :  { %6310 = vsyncadd [#allocation3], 4294967264 }
0x29c9   :  { %5672 = vsyncpa [#allocation3], 1 }

</bundles_post_ra>
